<compile_context>
chip_gen: v7x
topology: tpu7x:2x2x1
jax: 0.10.0
libtpu: 0.0.40
codegen_flags: <defaults>
</compile_context>

<pallas_src>
import functools

import jax
import jax.numpy as jnp
from jax import lax
from jax.experimental import pallas as pl
from jax.experimental.pallas import tpu as pltpu

LN_EPS = 1e-5        # default nn.LayerNorm eps
HEAD_LN_EPS = 1e-12  # BertOnlyMLMHead LayerNorm eps
BN_EPS = 1e-5        # BatchNorm1d eps (eval / running stats)
NEG_BIG = -1e30      # additive mask / logsumexp init (avoids inf-inf NaNs)


# ----------------------- generation-adaptive configuration -------------------

def _detect_vmem_capacity():
    try:
        info = pltpu.get_tpu_info()
        for name in ("vmem_capacity_bytes", "vmem_bytes", "vmem_size_bytes"):
            v = getattr(info, name, None)
            if v:
                return int(v)
    except Exception:
        pass
    return 64 * 1024 * 1024   # conservative (v7x-class) default


_VMEM_CAP = _detect_vmem_capacity()
if _VMEM_CAP >= 100 * 1024 * 1024:        # v5e / v6e: 128 MiB VMEM
    VMEM_LIMIT = 100 * 1024 * 1024
    ROW_TILE = 1024
    VOCAB_TILE = 2048
else:                                     # v7x-class: 64 MiB per TensorCore
    VMEM_LIMIT = 44 * 1024 * 1024
    ROW_TILE = 256
    VOCAB_TILE = 1024


def _probe_single_buffer():
    """Return pl.Buffered(1) iff single-buffered constant BlockSpecs lower and
    run on this JAX/Mosaic install; otherwise None (default double-buffering)."""
    if not hasattr(pl, "Buffered"):
        return None
    try:
        mode = pl.Buffered(1)
    except TypeError:
        try:
            mode = pl.Buffered(buffer_count=1)
        except Exception:
            return None
    try:
        def _k(x_ref, w_ref, o_ref):
            o_ref[...] = x_ref[...] + w_ref[...]
        x = jnp.zeros((16, 128), jnp.float32)
        w = jnp.zeros((1, 128), jnp.float32)
        out = pl.pallas_call(
            _k,
            out_shape=jax.ShapeDtypeStruct((16, 128), jnp.float32),
            grid=(2,),
            in_specs=[pl.BlockSpec((8, 128), lambda i: (i, 0)),
                      pl.BlockSpec((1, 128), lambda i: (0, 0),
                                   pipeline_mode=mode)],
            out_specs=pl.BlockSpec((8, 128), lambda i: (i, 0)),
        )(x, w)
        jax.block_until_ready(out)
        return mode
    except Exception:
        return None


_SINGLE_BUF = _probe_single_buffer()


def _const_spec(shape, grid_ndim=1):
    """BlockSpec for a grid-invariant operand; single-buffered when supported."""
    if grid_ndim == 1:
        idx = lambda i: (0,) * len(shape)
    elif grid_ndim == 2:
        idx = lambda i, j: (0,) * len(shape)
    else:
        idx = lambda *a: (0,) * len(shape)
    if _SINGLE_BUF is not None:
        try:
            return pl.BlockSpec(shape, idx, pipeline_mode=_SINGLE_BUF)
        except TypeError:
            pass
    return pl.BlockSpec(shape, idx)


# ----------------------------- tiling helpers --------------------------------

def _row_tile(n):
    # Either the full extent (always a legal block) or a multiple-of-8 tile.
    return n if n <= ROW_TILE else ROW_TILE


def _vocab_tile(v):
    # Either the full extent or a multiple-of-128 tile (partial last tile OK).
    return v if v <= VOCAB_TILE else VOCAB_TILE


# ----------------------------- in-kernel helpers -----------------------------

def _layernorm(x, g, b, eps):
    mu = jnp.mean(x, axis=-1, keepdims=True)
    var = jnp.mean((x - mu) ** 2, axis=-1, keepdims=True)
    return (x - mu) * lax.rsqrt(var + eps) * g + b


def _silu(x):
    return x * jax.nn.sigmoid(x)


def _gelu_exact(x):
    return 0.5 * x * (1.0 + lax.erf(x * (1.0 / jnp.sqrt(2.0).astype(x.dtype))))


# --------------------------------- kernels -----------------------------------

def layernorm_kernel(x_ref, g_ref, b_ref, o_ref, *, eps):
    o_ref[...] = _layernorm(x_ref[...], g_ref[...], b_ref[...], eps)


def ff_block_kernel(x_ref, g_ref, b_ref, w1_ref, b1_ref, w2_ref, b2_ref,
                    *rest, eps, out_ln):
    # y = x + 0.5 * Linear2(SiLU(Linear1(LN(x))));  optional fused output LN.
    if out_ln:
        og_ref, ob_ref, o_ref = rest
    else:
        (o_ref,) = rest
    x = x_ref[...]
    h = _layernorm(x, g_ref[...], b_ref[...], eps)
    w1 = w1_ref[...]
    h = jnp.dot(h.astype(w1.dtype), w1,
                preferred_element_type=jnp.float32) + b1_ref[...]
    h = _silu(h)
    w2 = w2_ref[...]
    h = jnp.dot(h.astype(w2.dtype), w2,
                preferred_element_type=jnp.float32) + b2_ref[...]
    y = x + 0.5 * h
    if out_ln:
        y = _layernorm(y, og_ref[...], ob_ref[...], eps)
    o_ref[...] = y


def attn_conv_kernel(x_ref, bias_ref,
                     ag_ref, ab_ref, wqkv_ref, wo_ref, bo_ref,
                     cg_ref, cb_ref, w1_ref, b1_ref, dww_ref, dwb_ref,
                     bng_ref, bnb_ref, bnm_ref, bnv_ref, w2_ref, b2_ref,
                     o_ref, ctx_scr, *, heads, K, eps, bn_eps):
    # Fused per-layer: PreNorm MHSA (+residual)  ->  Conformer conv module
    # (LN -> pointwise -> GLU -> depthwise "same" -> BN(eval) -> Swish ->
    #  pointwise -> +residual).
    # TODO(synk): relative positional attention bias (REL pos-emb inside the
    # original ConformerBlock attention) not reproduced -- source not provided.
    # TODO(synk): for very long T with tiny batch, add a query-tile / head grid
    # axis (flash-style) so both v7x TensorCores stay busy and DMAs pipeline.
    x = x_ref[0]            # (T, D)   fp32
    bias = bias_ref[0]      # (1, T)   additive key-padding bias (0 / -1e30)
    T, D = x.shape
    dh = D // heads
    scale = float(dh) ** -0.5

    # ---------------- multi-head self-attention (pre-norm, residual) ---------
    h = _layernorm(x, ag_ref[...], ab_ref[...], eps)
    wqkv = wqkv_ref[...]
    qkv = jnp.dot(h.astype(wqkv.dtype), wqkv,
                  preferred_element_type=jnp.float32)            # (T, 3D) f32
    q_all = (qkv[:, :D] * scale).astype(jnp.bfloat16)            # scale folded
    k_all = qkv[:, D:2 * D].astype(jnp.bfloat16)
    v_all = qkv[:, 2 * D:].astype(jnp.bfloat16)

    for hh in range(heads):
        lo = hh * dh
        qh = q_all[:, lo:lo + dh]
        kh = k_all[:, lo:lo + dh]
        vh = v_all[:, lo:lo + dh]
        s = lax.dot_general(qh, kh, (((1,), (1,)), ((), ())),
                            preferred_element_type=jnp.float32) + bias  # (T,T)
        s = s - jnp.max(s, axis=-1, keepdims=True)
        p = jnp.exp(s)
        p = p * pl.reciprocal(jnp.sum(p, axis=-1, keepdims=True), approx=True)
        ctx_scr[:, lo:lo + dh] = jnp.dot(p.astype(jnp.bfloat16), vh,
                                         preferred_element_type=jnp.float32)

    wo = wo_ref[...]
    attn_out = jnp.dot(ctx_scr[...].astype(wo.dtype), wo,
                       preferred_element_type=jnp.float32) + bo_ref[...]
    y = x + attn_out

    # ---------------- conformer conv module (pre-norm, residual) -------------
    # TODO(synk): BatchNorm1d training-mode batch statistics not implemented
    # (eval-mode running stats used).  'same' padding assumes odd K.
    Dc = dww_ref.shape[1]
    hc = _layernorm(y, cg_ref[...], cb_ref[...], eps)
    w1 = w1_ref[...]
    z = jnp.dot(hc.astype(w1.dtype), w1,
                preferred_element_type=jnp.float32) + b1_ref[...]   # (T, 2Dc)
    g = z[:, :Dc] * jax.nn.sigmoid(z[:, Dc:])                       # GLU (T,Dc)

    half = K // 2
    t_idx = lax.broadcasted_iota(jnp.int32, (T, 1), 0)
    acc = jnp.zeros((T, Dc), jnp.float32)
    for tap in range(K):
        s_off = tap - half                 # out[t] += w[tap] * g[t + s_off]
        if s_off == 0:
            shifted = g
        else:
            shifted = pltpu.roll(g, shift=(-s_off) % T, axis=0)
        valid = jnp.logical_and(t_idx + s_off >= 0, t_idx + s_off <= T - 1)
        acc = acc + jnp.where(valid, shifted, 0.0) * dww_ref[tap:tap + 1, :]
    acc = acc + dwb_ref[...]
    acc = (acc - bnm_ref[...]) * lax.rsqrt(bnv_ref[...] + bn_eps) \
          * bng_ref[...] + bnb_ref[...]
    acc = _silu(acc)

    w2 = w2_ref[...]
    conv_out = jnp.dot(acc.astype(w2.dtype), w2,
                       preferred_element_type=jnp.float32) + b2_ref[...]
    o_ref[0] = y + conv_out


def mlm_head_kernel(x_ref, lbl_ref, wt_ref, bt_ref, g_ref, b_ref,
                    wd_ref, bd_ref,
                    logits_ref, lse_ref, lbl_logit_ref,
                    h_scr, m_scr, l_scr, acc_scr, *, eps, vocab, tv):
    # Transform (Linear -> GELU -> LayerNorm(1e-12)) computed once per row tile
    # (vocab tile 0), cached in VMEM; decoder tiled over vocab.  Fused online
    # logsumexp + label-logit so the MLM loss needs no second (N,V) pass.
    j = pl.program_id(1)

    @pl.when(j == 0)
    def _():
        x = x_ref[...]
        wt = wt_ref[...]
        h = jnp.dot(x.astype(wt.dtype), wt,
                    preferred_element_type=jnp.float32) + bt_ref[...]
        h = _gelu_exact(h)
        h_scr[...] = _layernorm(h, g_ref[...], b_ref[...], eps
                                ).astype(jnp.bfloat16)
        m_scr[...] = jnp.full_like(m_scr, NEG_BIG)
        l_scr[...] = jnp.zeros_like(l_scr)
        acc_scr[...] = jnp.zeros_like(acc_scr)

    wd = wd_ref[...]
    logits = jnp.dot(h_scr[...], wd,
                     preferred_element_type=jnp.float32) + bd_ref[...]
    logits_ref[...] = logits.astype(logits_ref.dtype)

    # Global column index; mask out-of-vocab lanes of a partial last tile.
    col = j * tv + lax.broadcasted_iota(jnp.int32, logits.shape, 1)
    lm = jnp.where(col < vocab, logits, NEG_BIG)

    # Online logsumexp over vocab tiles.
    tile_max = jnp.max(lm, axis=-1, keepdims=True)
    m_new = jnp.maximum(m_scr[...], tile_max)
    l_scr[...] = (l_scr[...] * jnp.exp(m_scr[...] - m_new)
                  + jnp.sum(jnp.exp(lm - m_new), axis=-1, keepdims=True))
    m_scr[...] = m_new

    # Label logit via one-hot (each row's label falls in exactly one tile).
    hit = col == lbl_ref[...]
    acc_scr[...] += jnp.sum(jnp.where(hit, logits, 0.0), axis=-1, keepdims=True)

    @pl.when(j == pl.num_programs(1) - 1)
    def _():
        lse_ref[...] = m_scr[...] + jnp.log(l_scr[...])
        lbl_logit_ref[...] = acc_scr[...]


# -------------------------------- wrappers ------------------------------------

def layernorm(x, g, b, eps):
    N, D = x.shape
    tm = _row_tile(N)
    return pl.pallas_call(
        functools.partial(layernorm_kernel, eps=eps),
        out_shape=jax.ShapeDtypeStruct((N, D), jnp.float32),
        grid=(pl.cdiv(N, tm),),
        in_specs=[pl.BlockSpec((tm, D), lambda i: (i, 0)),
                  _const_spec((1, D)), _const_spec((1, D))],
        out_specs=pl.BlockSpec((tm, D), lambda i: (i, 0)),
        compiler_params=pltpu.CompilerParams(
            dimension_semantics=("parallel",),
            vmem_limit_bytes=VMEM_LIMIT),
    )(x, g, b)


def ff_block(x, p, post_ln=None):
    N, D = x.shape
    H = p['w1'].shape[1]
    tm = _row_tile(N)

    args = [x, p['g'], p['b'], p['w1'], p['b1'], p['w2'], p['b2']]
    in_specs = [
        pl.BlockSpec((tm, D), lambda i: (i, 0)),
        _const_spec((1, D)), _const_spec((1, D)),
        _const_spec((D, H)), _const_spec((1, H)),
        _const_spec((H, D)), _const_spec((1, D)),
    ]
    if post_ln is not None:
        args += [post_ln['g'], post_ln['b']]
        in_specs += [_const_spec((1, D)), _const_spec((1, D))]

    return pl.pallas_call(
        functools.partial(ff_block_kernel, eps=LN_EPS,
                          out_ln=post_ln is not None),
        out_shape=jax.ShapeDtypeStruct((N, D), jnp.float32),
        grid=(pl.cdiv(N, tm),),
        in_specs=in_specs,
        out_specs=pl.BlockSpec((tm, D), lambda i: (i, 0)),
        compiler_params=pltpu.CompilerParams(
            dimension_semantics=("parallel",),
            vmem_limit_bytes=VMEM_LIMIT),
    )(*args)


def attn_conv_block(x, mask_bias, ap, cp, heads, K):
    B, T, D = x.shape
    Dc = cp['dw_w'].shape[1]
    return pl.pallas_call(
        functools.partial(attn_conv_kernel, heads=heads, K=K,
                          eps=LN_EPS, bn_eps=BN_EPS),
        out_shape=jax.ShapeDtypeStruct((B, T, D), jnp.float32),
        grid=(B,),
        in_specs=[
            pl.BlockSpec((1, T, D), lambda b: (b, 0, 0)),
            pl.BlockSpec((1, 1, T), lambda b: (b, 0, 0)),
            _const_spec((1, D)), _const_spec((1, D)),
            _const_spec((D, 3 * D)), _const_spec((D, D)), _const_spec((1, D)),
            _const_spec((1, D)), _const_spec((1, D)),
            _const_spec((D, 2 * Dc)), _const_spec((1, 2 * Dc)),
            _const_spec((K, Dc)), _const_spec((1, Dc)),
            _const_spec((1, Dc)), _const_spec((1, Dc)),
            _const_spec((1, Dc)), _const_spec((1, Dc)),
            _const_spec((Dc, D)), _const_spec((1, D)),
        ],
        out_specs=pl.BlockSpec((1, T, D), lambda b: (b, 0, 0)),
        scratch_shapes=[pltpu.VMEM((T, D), jnp.float32)],
        compiler_params=pltpu.CompilerParams(
            dimension_semantics=("parallel",),
            vmem_limit_bytes=VMEM_LIMIT),
    )(x, mask_bias,
      ap['ln_g'], ap['ln_b'], ap['wqkv'], ap['wo'], ap['bo'],
      cp['g'], cp['b'], cp['w_pw1'], cp['b_pw1'], cp['dw_w'], cp['dw_b'],
      cp['bn_g'], cp['bn_b'], cp['bn_m'], cp['bn_v'], cp['w_pw2'], cp['b_pw2'])


def mlm_head(x, labels2d, p, vocab_size):
    N, D = x.shape
    V = vocab_size
    tm = _row_tile(N)
    tv = _vocab_tile(V)
    return pl.pallas_call(
        functools.partial(mlm_head_kernel, eps=HEAD_LN_EPS, vocab=V, tv=tv),
        out_shape=(jax.ShapeDtypeStruct((N, V), jnp.bfloat16),
                   jax.ShapeDtypeStruct((N, 1), jnp.float32),
                   jax.ShapeDtypeStruct((N, 1), jnp.float32)),
        grid=(pl.cdiv(N, tm), pl.cdiv(V, tv)),
        in_specs=[
            pl.BlockSpec((tm, D), lambda i, j: (i, 0)),
            pl.BlockSpec((tm, 1), lambda i, j: (i, 0)),
            _const_spec((D, D), 2),
            _const_spec((1, D), 2),
            _const_spec((1, D), 2),
            _const_spec((1, D), 2),
            pl.BlockSpec((D, tv), lambda i, j: (0, j)),
            pl.BlockSpec((1, tv), lambda i, j: (0, j)),
        ],
        out_specs=(pl.BlockSpec((tm, tv), lambda i, j: (i, j)),
                   pl.BlockSpec((tm, 1), lambda i, j: (i, 0)),
                   pl.BlockSpec((tm, 1), lambda i, j: (i, 0))),
        scratch_shapes=[pltpu.VMEM((tm, D), jnp.bfloat16),
                        pltpu.VMEM((tm, 1), jnp.float32),
                        pltpu.VMEM((tm, 1), jnp.float32),
                        pltpu.VMEM((tm, 1), jnp.float32)],
        compiler_params=pltpu.CompilerParams(
            dimension_semantics=("parallel", "arbitrary"),
            vmem_limit_bytes=VMEM_LIMIT),
    )(x, labels2d, p['wt'], p['bt'], p['ln_g'], p['ln_b'], p['wd'], p['bd'])


# ----------------------------- parameter setup --------------------------------

def init_params(key, D, heads, depth, K, expansion, vocab_size, pad_id):
    keys = iter(jax.random.split(key, 256))
    Dc = D * expansion
    BF = jnp.bfloat16  # MXU weight storage dtype (fp32 accumulation in-kernel)

    def dense(i, o, scale=0.02):
        return (jax.random.normal(next(keys), (i, o), jnp.float32) * scale
                ).astype(BF)

    def vec(n, val):
        return jnp.full((1, n), val, jnp.float32)

    emb = jax.random.normal(next(keys), (vocab_size, D), jnp.float32) * 0.02
    emb = emb.at[pad_id].set(0.0)   # padding_idx row zeroed

    def ff():
        return dict(g=vec(D, 1.), b=vec(D, 0.),
                    w1=dense(D, 4 * D), b1=vec(4 * D, 0.),
                    w2=dense(4 * D, D), b2=vec(D, 0.))

    layers = []
    for _ in range(depth):
        layers.append(dict(
            ff1=ff(),
            attn=dict(ln_g=vec(D, 1.), ln_b=vec(D, 0.),
                      wqkv=dense(D, 3 * D),          # fused Q/K/V projection
                      wo=dense(D, D), bo=vec(D, 0.)),
            conv=dict(g=vec(D, 1.), b=vec(D, 0.),
                      w_pw1=dense(D, 2 * Dc), b_pw1=vec(2 * Dc, 0.),
                      dw_w=jax.random.normal(next(keys), (K, Dc),
                                             jnp.float32) * 0.1,
                      dw_b=vec(Dc, 0.),
                      bn_g=vec(Dc, 1.), bn_b=vec(Dc, 0.),
                      bn_m=vec(Dc, 0.), bn_v=vec(Dc, 1.),
                      w_pw2=dense(Dc, D), b_pw2=vec(D, 0.)),
            ff2=ff(),
            post_ln=dict(g=vec(D, 1.), b=vec(D, 0.)),
        ))

    cls = dict(wt=dense(D, D), bt=vec(D, 0.),
               ln_g=vec(D, 1.), ln_b=vec(D, 0.),
               wd=dense(D, vocab_size), bd=vec(vocab_size, 0.))

    return dict(emb=emb, post_emb_ln=dict(g=vec(D, 1.), b=vec(D, 0.)),
                layers=layers, cls=cls)


# --------------------------------- forward ------------------------------------

def bertformer_forward(params, input_ids, attention_mask=None, labels=None,
                       *, heads, K):
    B, T = input_ids.shape
    D = params['emb'].shape[1]
    V = params['cls']['wd'].shape[1]
    N = B * T

    # Embedding lookup (glue).  REL positional embedding => no additive pos emb.
    x = jnp.take(params['emb'], input_ids, axis=0).astype(jnp.float32)  # (B,T,D)

    # post_emb_norm (row-tiled LN kernel)
    x = layernorm(x.reshape(N, D), params['post_emb_ln']['g'],
                  params['post_emb_ln']['b'], LN_EPS).reshape(B, T, D)

    if attention_mask is None:
        attention_mask = jnp.ones((B, T), jnp.float32)
    # Additive key-padding bias (0 keep / -1e30 pad), added once to the scores.
    mask_bias = ((1.0 - attention_mask.astype(jnp.float32)) * NEG_BIG
                 ).reshape(B, 1, T)

    h = x
    for lyr in params['layers']:
        # half-step FF 1
        h = ff_block(h.reshape(N, D), lyr['ff1']).reshape(B, T, D)
        # fused MHSA + conformer conv module (one HBM pass for both residuals)
        h = attn_conv_block(h, mask_bias, lyr['attn'], lyr['conv'], heads, K)
        # half-step FF 2 with fused per-layer post LayerNorm epilogue
        h = ff_block(h.reshape(N, D), lyr['ff2'],
                     post_ln=lyr['post_ln']).reshape(B, T, D)

    # MLM head: bf16 logits + fused per-row logsumexp / label-logit.
    if labels is not None:
        labels_flat = labels.reshape(N)
        valid = labels_flat != -100
        safe_labels = jnp.where(valid, labels_flat, 0).astype(jnp.int32)
    else:
        valid = None
        safe_labels = jnp.zeros((N,), jnp.int32)

    logits, lse, lbl_logit = mlm_head(h.reshape(N, D),
                                      safe_labels.reshape(N, 1),
                                      params['cls'], V)
    logits = logits.reshape(B, T, V)

    loss = None
    if labels is not None:
        nll = lse[:, 0] - lbl_logit[:, 0]           # -log p(label) per token
        vf = valid.astype(jnp.float32)
        loss = jnp.sum(nll * vf) / jnp.maximum(jnp.sum(vf), 1.0)

    return loss, h, logits   # (loss, last_hidden_state, prediction_scores)


# ----------------------------------- main --------------------------------------

if __name__ == "__main__":
    B, T, D = 2, 8, 32
    HEADS, DEPTH, KSIZE, EXPANSION = 4, 2, 3, 2
    VOCAB, PAD_ID = 64, 0

    root = jax.random.PRNGKey(0)
    k_par, k_ids, k_lbl = jax.random.split(root, 3)

    params = init_params(k_par, D, HEADS, DEPTH, KSIZE, EXPANSION, VOCAB, PAD_ID)

    input_ids = jax.random.randint(k_ids, (B, T), 1, VOCAB, dtype=jnp.int32)
    attention_mask = jnp.ones((B, T), jnp.float32).at[1, -1].set(0.0)
    labels = jax.random.randint(k_lbl, (B, T), 0, VOCAB, dtype=jnp.int32)
    labels = labels.at[:, ::2].set(-100)   # ignore half the positions

    fwd = jax.jit(functools.partial(bertformer_forward, heads=HEADS, K=KSIZE))
    loss, hidden, logits = fwd(params, input_ids, attention_mask, labels)

    jax.block_until_ready((loss, hidden, logits))
    assert logits.shape == (B, T, VOCAB)
    assert hidden.shape == (B, T, D)
    assert bool(jnp.isfinite(loss)) and bool(jnp.all(jnp.isfinite(logits)))
    print("KERNEL_OK")
</pallas_src>

<mosaic_0001>
module attributes {stable_mosaic.version = 11 : i64} {
  func.func @_k(%arg0: i32, %arg1: memref<8x128xf32, #tpu.memory_space<vmem>>, %arg2: memref<1x128xf32, #tpu.memory_space<vmem>>, %arg3: memref<8x128xf32, #tpu.memory_space<vmem>>) attributes {dimension_semantics = [#tpu.dimension_semantics<arbitrary>], iteration_bounds = array<i64: 2>, scalar_prefetch = 0 : i64, scratch_operands = 0 : i64, tpu.core_type = #tpu.core_type<tc>, window_params = [{transform_indices = @transform_0, window_bounds = array<i64: 8, 128>}, {pipeline_mode = #tpu.pipeline_mode<synchronous>, transform_indices = @transform_1, window_bounds = array<i64: 1, 128>}, {transform_indices = @transform_2, window_bounds = array<i64: 8, 128>}]} {
    %c0 = arith.constant 0 : index
    %c0_0 = arith.constant 0 : index
    %0 = vector.load %arg1[%c0, %c0_0] : memref<8x128xf32, #tpu.memory_space<vmem>>, vector<8x128xf32>
    %c0_1 = arith.constant 0 : index
    %c0_2 = arith.constant 0 : index
    %1 = vector.load %arg2[%c0_1, %c0_2] : memref<1x128xf32, #tpu.memory_space<vmem>>, vector<1x128xf32>
    %2 = vector.broadcast %1 : vector<1x128xf32> to vector<8x128xf32>
    %3 = arith.addf %0, %2 : vector<8x128xf32>
    %c0_3 = arith.constant 0 : index
    %c0_4 = arith.constant 0 : index
    %4 = vector.load %arg3[%c0_3, %c0_4] : memref<8x128xf32, #tpu.memory_space<vmem>>, vector<8x128xf32>
    tpu.vector_store %arg3[%c0_3, %c0_4], %3 {strides = array<i32>} : memref<8x128xf32, #tpu.memory_space<vmem>>, vector<8x128xf32>,
    return
  }
  func.func @transform_0(%arg0: i32) -> (i32, i32) {
    %c0_i32 = arith.constant 0 : i32
    %c0_i32_0 = arith.constant 0 : i32
    return %arg0, %c0_i32 : i32, i32
  }
  func.func @transform_1(%arg0: i32) -> (i32, i32) {
    %c0_i32 = arith.constant 0 : i32
    %c0_i32_0 = arith.constant 0 : i32
    %c0_i32_1 = arith.constant 0 : i32
    return %c0_i32, %c0_i32_0 : i32, i32
  }
  func.func @transform_2(%arg0: i32) -> (i32, i32) {
    %c0_i32 = arith.constant 0 : i32
    %c0_i32_0 = arith.constant 0 : i32
    return %arg0, %c0_i32 : i32, i32
  }
}

module attributes {stable_mosaic.version = 11 : i64} {
  func.func @ff_block_kernel(%arg0: i32, %arg1: memref<16x32xf32, #tpu.memory_space<vmem>>, %arg2: memref<1x32xf32, #tpu.memory_space<vmem>>, %arg3: memref<1x32xf32, #tpu.memory_space<vmem>>, %arg4: memref<32x128xbf16, #tpu.memory_space<vmem>>, %arg5: memref<1x128xf32, #tpu.memory_space<vmem>>, %arg6: memref<128x32xbf16, #tpu.memory_space<vmem>>, %arg7: memref<1x32xf32, #tpu.memory_space<vmem>>, %arg8: memref<16x32xf32, #tpu.memory_space<vmem>>) attributes {dimension_semantics = [#tpu.dimension_semantics<parallel>], iteration_bounds = array<i64: 1>, scalar_prefetch = 0 : i64, scratch_operands = 0 : i64, tpu.core_type = #tpu.core_type<tc>, window_params = [{transform_indices = @transform_0, window_bounds = array<i64: 16, 32>}, {pipeline_mode = #tpu.pipeline_mode<synchronous>, transform_indices = @transform_1, window_bounds = array<i64: 1, 32>}, {pipeline_mode = #tpu.pipeline_mode<synchronous>, transform_indices = @transform_2, window_bounds = array<i64: 1, 32>}, {pipeline_mode = #tpu.pipeline_mode<synchronous>, transform_indices = @transform_3, window_bounds = array<i64: 32, 128>}, {pipeline_mode = #tpu.pipeline_mode<synchronous>, transform_indices = @transform_4, window_bounds = array<i64: 1, 128>}, {pipeline_mode = #tpu.pipeline_mode<synchronous>, transform_indices = @transform_5, window_bounds = array<i64: 128, 32>}, {pipeline_mode = #tpu.pipeline_mode<synchronous>, transform_indices = @transform_6, window_bounds = array<i64: 1, 32>}, {transform_indices = @transform_7, window_bounds = array<i64: 16, 32>}]} {
    %c0 = arith.constant 0 : index
    %c0_0 = arith.constant 0 : index
    %0 = vector.load %arg1[%c0, %c0_0] : memref<16x32xf32, #tpu.memory_space<vmem>>, vector<16x32xf32>
    %c0_1 = arith.constant 0 : index
    %c0_2 = arith.constant 0 : index
    %1 = vector.load %arg2[%c0_1, %c0_2] : memref<1x32xf32, #tpu.memory_space<vmem>>, vector<1x32xf32>
    %c0_3 = arith.constant 0 : index
    %c0_4 = arith.constant 0 : index
    %2 = vector.load %arg3[%c0_3, %c0_4] : memref<1x32xf32, #tpu.memory_space<vmem>>, vector<1x32xf32>
    %cst = arith.constant dense<0.000000e+00> : vector<16xf32>
    %3 = vector.multi_reduction <add>, %0, %cst [1] : vector<16x32xf32> to vector<16xf32>
    %4 = vector.shape_cast %3 : vector<16xf32> to vector<16x1xf32>
    %cst_5 = arith.constant 3.200000e+01 : f32
    %5 = vector.broadcast %cst_5 : f32 to vector<16x1xf32>
    %6 = arith.divf %4, %5 : vector<16x1xf32>
    %7 = vector.broadcast %6 : vector<16x1xf32> to vector<16x32xf32>
    %8 = arith.subf %0, %7 : vector<16x32xf32>
    %9 = arith.mulf %8, %8 : vector<16x32xf32>
    %cst_6 = arith.constant dense<0.000000e+00> : vector<16xf32>
    %10 = vector.multi_reduction <add>, %9, %cst_6 [1] : vector<16x32xf32> to vector<16xf32>
    %11 = vector.shape_cast %10 : vector<16xf32> to vector<16x1xf32>
    %cst_7 = arith.constant 3.200000e+01 : f32
    %12 = vector.broadcast %cst_7 : f32 to vector<16x1xf32>
    %13 = arith.divf %11, %12 : vector<16x1xf32>
    %14 = vector.broadcast %6 : vector<16x1xf32> to vector<16x32xf32>
    %15 = arith.subf %0, %14 : vector<16x32xf32>
    %cst_8 = arith.constant 9.99999974E-6 : f32
    %16 = vector.broadcast %cst_8 : f32 to vector<16x1xf32>
    %17 = arith.addf %13, %16 : vector<16x1xf32>
    %18 = math.rsqrt %17 : vector<16x1xf32>
    %19 = vector.broadcast %18 : vector<16x1xf32> to vector<16x32xf32>
    %20 = arith.mulf %15, %19 : vector<16x32xf32>
    %21 = vector.broadcast %1 : vector<1x32xf32> to vector<16x32xf32>
    %22 = arith.mulf %20, %21 : vector<16x32xf32>
    %23 = vector.broadcast %2 : vector<1x32xf32> to vector<16x32xf32>
    %24 = arith.addf %22, %23 : vector<16x32xf32>
    %c0_9 = arith.constant 0 : index
    %c0_10 = arith.constant 0 : index
    %25 = vector.load %arg4[%c0_9, %c0_10] : memref<32x128xbf16, #tpu.memory_space<vmem>>, vector<32x128xbf16>
    %26 = arith.truncf %24 : vector<16x32xf32> to vector<16x32xbf16>
    %cst_11 = arith.constant dense<0.000000e+00> : vector<16x128xf32>
    %27 = tpu.matmul %26, %25, %cst_11 {dimension_numbers = #tpu.dot_dimension_numbers<[1], [0], [0], [1], [0, 0, 1, 1], [], []>} : vector<16x32xbf16>, vector<32x128xbf16>, vector<16x128xf32> -> vector<16x128xf32>
    %c0_12 = arith.constant 0 : index
    %c0_13 = arith.constant 0 : index
    %28 = vector.load %arg5[%c0_12, %c0_13] : memref<1x128xf32, #tpu.memory_space<vmem>>, vector<1x128xf32>
    %29 = vector.broadcast %28 : vector<1x128xf32> to vector<16x128xf32>
    %30 = arith.addf %27, %29 : vector<16x128xf32>
    %31 = arith.negf %30 : vector<16x128xf32>
    %32 = math.exp %31 : vector<16x128xf32>
    %cst_14 = arith.constant 1.000000e+00 : f32
    %33 = vector.broadcast %cst_14 : f32 to vector<16x128xf32>
    %34 = arith.addf %33, %32 : vector<16x128xf32>
    %35 = arith.divf %33, %34 : vector<16x128xf32>
    %36 = arith.mulf %30, %35 : vector<16x128xf32>
    %c0_15 = arith.constant 0 : index
    %c0_16 = arith.constant 0 : index
    %37 = vector.load %arg6[%c0_15, %c0_16] : memref<128x32xbf16, #tpu.memory_space<vmem>>, vector<128x32xbf16>
    %38 = arith.truncf %36 : vector<16x128xf32> to vector<16x128xbf16>
    %cst_17 = arith.constant dense<0.000000e+00> : vector<16x32xf32>
    %39 = tpu.matmul %38, %37, %cst_17 {dimension_numbers = #tpu.dot_dimension_numbers<[1], [0], [0], [1], [0, 0, 1, 1], [], []>} : vector<16x128xbf16>, vector<128x32xbf16>, vector<16x32xf32> -> vector<16x32xf32>
    %c0_18 = arith.constant 0 : index
    %c0_19 = arith.constant 0 : index
    %40 = vector.load %arg7[%c0_18, %c0_19] : memref<1x32xf32, #tpu.memory_space<vmem>>, vector<1x32xf32>
    %41 = vector.broadcast %40 : vector<1x32xf32> to vector<16x32xf32>
    %42 = arith.addf %39, %41 : vector<16x32xf32>
    %cst_20 = arith.constant 5.000000e-01 : f32
    %43 = vector.broadcast %cst_20 : f32 to vector<16x32xf32>
    %44 = arith.mulf %43, %42 : vector<16x32xf32>
    %45 = arith.addf %0, %44 : vector<16x32xf32>
    %c0_21 = arith.constant 0 : index
    %c0_22 = arith.constant 0 : index
    %46 = vector.load %arg8[%c0_21, %c0_22] : memref<16x32xf32, #tpu.memory_space<vmem>>, vector<16x32xf32>
    tpu.vector_store %arg8[%c0_21, %c0_22], %45 {strides = array<i32>} : memref<16x32xf32, #tpu.memory_space<vmem>>, vector<16x32xf32>,
    return
  }
  func.func @transform_0(%arg0: i32) -> (i32, i32) {
    %c0_i32 = arith.constant 0 : i32
    %c0_i32_0 = arith.constant 0 : i32
    return %arg0, %c0_i32 : i32, i32
  }
  func.func @transform_1(%arg0: i32) -> (i32, i32) {
    %c0_i32 = arith.constant 0 : i32
    %c0_i32_0 = arith.constant 0 : i32
    %c0_i32_1 = arith.constant 0 : i32
    return %c0_i32, %c0_i32_0 : i32, i32
  }
  func.func @transform_2(%arg0: i32) -> (i32, i32) {
    %c0_i32 = arith.constant 0 : i32
    %c0_i32_0 = arith.constant 0 : i32
    %c0_i32_1 = arith.constant 0 : i32
    return %c0_i32, %c0_i32_0 : i32, i32
  }
  func.func @transform_3(%arg0: i32) -> (i32, i32) {
    %c0_i32 = arith.constant 0 : i32
    %c0_i32_0 = arith.constant 0 : i32
    %c0_i32_1 = arith.constant 0 : i32
    return %c0_i32, %c0_i32_0 : i32, i32
  }
  func.func @transform_4(%arg0: i32) -> (i32, i32) {
    %c0_i32 = arith.constant 0 : i32
    %c0_i32_0 = arith.constant 0 : i32
    %c0_i32_1 = arith.constant 0 : i32
    return %c0_i32, %c0_i32_0 : i32, i32
  }
  func.func @transform_5(%arg0: i32) -> (i32, i32) {
    %c0_i32 = arith.constant 0 : i32
    %c0_i32_0 = arith.constant 0 : i32
    %c0_i32_1 = arith.constant 0 : i32
    return %c0_i32, %c0_i32_0 : i32, i32
  }
  func.func @transform_6(%arg0: i32) -> (i32, i32) {
    %c0_i32 = arith.constant 0 : i32
    %c0_i32_0 = arith.constant 0 : i32
    %c0_i32_1 = arith.constant 0 : i32
    return %c0_i32, %c0_i32_0 : i32, i32
  }
  func.func @transform_7(%arg0: i32) -> (i32, i32) {
    %c0_i32 = arith.constant 0 : i32
    %c0_i32_0 = arith.constant 0 : i32
    return %arg0, %c0_i32 : i32, i32
  }
}

module attributes {stable_mosaic.version = 11 : i64} {
  func.func @attn_conv_kernel(%arg0: i32, %arg1: memref<1x8x32xf32, #tpu.memory_space<vmem>>, %arg2: memref<1x1x8xf32, #tpu.memory_space<vmem>>, %arg3: memref<1x32xf32, #tpu.memory_space<vmem>>, %arg4: memref<1x32xf32, #tpu.memory_space<vmem>>, %arg5: memref<32x96xbf16, #tpu.memory_space<vmem>>, %arg6: memref<32x32xbf16, #tpu.memory_space<vmem>>, %arg7: memref<1x32xf32, #tpu.memory_space<vmem>>, %arg8: memref<1x32xf32, #tpu.memory_space<vmem>>, %arg9: memref<1x32xf32, #tpu.memory_space<vmem>>, %arg10: memref<32x128xbf16, #tpu.memory_space<vmem>>, %arg11: memref<1x128xf32, #tpu.memory_space<vmem>>, %arg12: memref<3x64xf32, #tpu.memory_space<vmem>>, %arg13: memref<1x64xf32, #tpu.memory_space<vmem>>, %arg14: memref<1x64xf32, #tpu.memory_space<vmem>>, %arg15: memref<1x64xf32, #tpu.memory_space<vmem>>, %arg16: memref<1x64xf32, #tpu.memory_space<vmem>>, %arg17: memref<1x64xf32, #tpu.memory_space<vmem>>, %arg18: memref<64x32xbf16, #tpu.memory_space<vmem>>, %arg19: memref<1x32xf32, #tpu.memory_space<vmem>>, %arg20: memref<1x8x32xf32, #tpu.memory_space<vmem>>, %arg21: memref<8x32xf32, #tpu.memory_space<vmem>>) attributes {dimension_semantics = [#tpu.dimension_semantics<parallel>], iteration_bounds = array<i64: 2>, scalar_prefetch = 0 : i64, scratch_operands = 1 : i64, tpu.core_type = #tpu.core_type<tc>, window_params = [{transform_indices = @transform_0, window_bounds = array<i64: 1, 8, 32>}, {transform_indices = @transform_1, window_bounds = array<i64: 1, 1, 8>}, {pipeline_mode = #tpu.pipeline_mode<synchronous>, transform_indices = @transform_2, window_bounds = array<i64: 1, 32>}, {pipeline_mode = #tpu.pipeline_mode<synchronous>, transform_indices = @transform_3, window_bounds = array<i64: 1, 32>}, {pipeline_mode = #tpu.pipeline_mode<synchronous>, transform_indices = @transform_4, window_bounds = array<i64: 32, 96>}, {pipeline_mode = #tpu.pipeline_mode<synchronous>, transform_indices = @transform_5, window_bounds = array<i64: 32, 32>}, {pipeline_mode = #tpu.pipeline_mode<synchronous>, transform_indices = @transform_6, window_bounds = array<i64: 1, 32>}, {pipeline_mode = #tpu.pipeline_mode<synchronous>, transform_indices = @transform_7, window_bounds = array<i64: 1, 32>}, {pipeline_mode = #tpu.pipeline_mode<synchronous>, transform_indices = @transform_8, window_bounds = array<i64: 1, 32>}, {pipeline_mode = #tpu.pipeline_mode<synchronous>, transform_indices = @transform_9, window_bounds = array<i64: 32, 128>}, {pipeline_mode = #tpu.pipeline_mode<synchronous>, transform_indices = @transform_10, window_bounds = array<i64: 1, 128>}, {pipeline_mode = #tpu.pipeline_mode<synchronous>, transform_indices = @transform_11, window_bounds = array<i64: 3, 64>}, {pipeline_mode = #tpu.pipeline_mode<synchronous>, transform_indices = @transform_12, window_bounds = array<i64: 1, 64>}, {pipeline_mode = #tpu.pipeline_mode<synchronous>, transform_indices = @transform_13, window_bounds = array<i64: 1, 64>}, {pipeline_mode = #tpu.pipeline_mode<synchronous>, transform_indices = @transform_14, window_bounds = array<i64: 1, 64>}, {pipeline_mode = #tpu.pipeline_mode<synchronous>, transform_indices = @transform_15, window_bounds = array<i64: 1, 64>}, {pipeline_mode = #tpu.pipeline_mode<synchronous>, transform_indices = @transform_16, window_bounds = array<i64: 1, 64>}, {pipeline_mode = #tpu.pipeline_mode<synchronous>, transform_indices = @transform_17, window_bounds = array<i64: 64, 32>}, {pipeline_mode = #tpu.pipeline_mode<synchronous>, transform_indices = @transform_18, window_bounds = array<i64: 1, 32>}, {transform_indices = @transform_19, window_bounds = array<i64: 1, 8, 32>}]} {
    %c0 = arith.constant 0 : index
    %c0_0 = arith.constant 0 : index
    %c0_1 = arith.constant 0 : index
    %0 = vector.load %arg1[%c0, %c0_0, %c0_1] : memref<1x8x32xf32, #tpu.memory_space<vmem>>, vector<1x8x32xf32>
    %1 = vector.shape_cast %0 : vector<1x8x32xf32> to vector<8x32xf32>
    %c0_2 = arith.constant 0 : index
    %c0_3 = arith.constant 0 : index
    %c0_4 = arith.constant 0 : index
    %2 = vector.load %arg2[%c0_2, %c0_3, %c0_4] : memref<1x1x8xf32, #tpu.memory_space<vmem>>, vector<1x1x8xf32>
    %3 = vector.shape_cast %2 : vector<1x1x8xf32> to vector<1x8xf32>
    %c0_5 = arith.constant 0 : index
    %c0_6 = arith.constant 0 : index
    %4 = vector.load %arg3[%c0_5, %c0_6] : memref<1x32xf32, #tpu.memory_space<vmem>>, vector<1x32xf32>
    %c0_7 = arith.constant 0 : index
    %c0_8 = arith.constant 0 : index
    %5 = vector.load %arg4[%c0_7, %c0_8] : memref<1x32xf32, #tpu.memory_space<vmem>>, vector<1x32xf32>
    %cst = arith.constant dense<0.000000e+00> : vector<8xf32>
    %6 = vector.multi_reduction <add>, %1, %cst [1] : vector<8x32xf32> to vector<8xf32>
    %7 = vector.shape_cast %6 : vector<8xf32> to vector<8x1xf32>
    %cst_9 = arith.constant 3.200000e+01 : f32
    %8 = vector.broadcast %cst_9 : f32 to vector<8x1xf32>
    %9 = arith.divf %7, %8 : vector<8x1xf32>
    %10 = vector.broadcast %9 : vector<8x1xf32> to vector<8x32xf32>
    %11 = arith.subf %1, %10 : vector<8x32xf32>
    %12 = arith.mulf %11, %11 : vector<8x32xf32>
    %cst_10 = arith.constant dense<0.000000e+00> : vector<8xf32>
    %13 = vector.multi_reduction <add>, %12, %cst_10 [1] : vector<8x32xf32> to vector<8xf32>
    %14 = vector.shape_cast %13 : vector<8xf32> to vector<8x1xf32>
    %cst_11 = arith.constant 3.200000e+01 : f32
    %15 = vector.broadcast %cst_11 : f32 to vector<8x1xf32>
    %16 = arith.divf %14, %15 : vector<8x1xf32>
    %17 = vector.broadcast %9 : vector<8x1xf32> to vector<8x32xf32>
    %18 = arith.subf %1, %17 : vector<8x32xf32>
    %cst_12 = arith.constant 9.99999974E-6 : f32
    %19 = vector.broadcast %cst_12 : f32 to vector<8x1xf32>
    %20 = arith.addf %16, %19 : vector<8x1xf32>
    %21 = math.rsqrt %20 : vector<8x1xf32>
    %22 = vector.broadcast %21 : vector<8x1xf32> to vector<8x32xf32>
    %23 = arith.mulf %18, %22 : vector<8x32xf32>
    %24 = vector.broadcast %4 : vector<1x32xf32> to vector<8x32xf32>
    %25 = arith.mulf %23, %24 : vector<8x32xf32>
    %26 = vector.broadcast %5 : vector<1x32xf32> to vector<8x32xf32>
    %27 = arith.addf %25, %26 : vector<8x32xf32>
    %c0_13 = arith.constant 0 : index
    %c0_14 = arith.constant 0 : index
    %28 = vector.load %arg5[%c0_13, %c0_14] : memref<32x96xbf16, #tpu.memory_space<vmem>>, vector<32x96xbf16>
    %29 = arith.truncf %27 : vector<8x32xf32> to vector<8x32xbf16>
    %cst_15 = arith.constant dense<0.000000e+00> : vector<8x96xf32>
    %30 = tpu.matmul %29, %28, %cst_15 {dimension_numbers = #tpu.dot_dimension_numbers<[1], [0], [0], [1], [0, 0, 1, 1], [], []>} : vector<8x32xbf16>, vector<32x96xbf16>, vector<8x96xf32> -> vector<8x96xf32>
    %31 = vector.extract_strided_slice %30 {offsets = [0, 0], sizes = [8, 32], strides = [1, 1]} : vector<8x96xf32> to vector<8x32xf32>
    %cst_16 = arith.constant 0.353553385 : f32
    %32 = vector.broadcast %cst_16 : f32 to vector<8x32xf32>
    %33 = arith.mulf %31, %32 : vector<8x32xf32>
    %34 = arith.truncf %33 : vector<8x32xf32> to vector<8x32xbf16>
    %35 = vector.extract_strided_slice %30 {offsets = [0, 32], sizes = [8, 32], strides = [1, 1]} : vector<8x96xf32> to vector<8x32xf32>
    %36 = arith.truncf %35 : vector<8x32xf32> to vector<8x32xbf16>
    %37 = vector.extract_strided_slice %30 {offsets = [0, 64], sizes = [8, 32], strides = [1, 1]} : vector<8x96xf32> to vector<8x32xf32>
    %38 = arith.truncf %37 : vector<8x32xf32> to vector<8x32xbf16>
    %39 = vector.extract_strided_slice %34 {offsets = [0, 0], sizes = [8, 8], strides = [1, 1]} : vector<8x32xbf16> to vector<8x8xbf16>
    %40 = vector.extract_strided_slice %36 {offsets = [0, 0], sizes = [8, 8], strides = [1, 1]} : vector<8x32xbf16> to vector<8x8xbf16>
    %41 = vector.extract_strided_slice %38 {offsets = [0, 0], sizes = [8, 8], strides = [1, 1]} : vector<8x32xbf16> to vector<8x8xbf16>
    %cst_17 = arith.constant dense<0.000000e+00> : vector<8x8xf32>
    %42 = tpu.matmul %39, %40, %cst_17 {dimension_numbers = #tpu.dot_dimension_numbers<[1], [1], [0], [0], [0, 0, 1, 0], [], []>} : vector<8x8xbf16>, vector<8x8xbf16>, vector<8x8xf32> -> vector<8x8xf32>
    %43 = vector.broadcast %3 : vector<1x8xf32> to vector<8x8xf32>
    %44 = arith.addf %42, %43 : vector<8x8xf32>
    %cst_18 = arith.constant dense<0xFF800000> : vector<8xf32>
    %45 = vector.multi_reduction <maximumf>, %44, %cst_18 [1] : vector<8x8xf32> to vector<8xf32>
    %46 = vector.shape_cast %45 : vector<8xf32> to vector<8x1xf32>
    %47 = vector.broadcast %46 : vector<8x1xf32> to vector<8x8xf32>
    %48 = arith.subf %44, %47 : vector<8x8xf32>
    %49 = math.exp %48 : vector<8x8xf32>
    %cst_19 = arith.constant dense<0.000000e+00> : vector<8xf32>
    %50 = vector.multi_reduction <add>, %49, %cst_19 [1] : vector<8x8xf32> to vector<8xf32>
    %51 = vector.shape_cast %50 : vector<8xf32> to vector<8x1xf32>
    %52 = tpu.reciprocal %51 {approx = true} : vector<8x1xf32> -> vector<8x1xf32>
    %53 = vector.broadcast %52 : vector<8x1xf32> to vector<8x8xf32>
    %54 = arith.mulf %49, %53 : vector<8x8xf32>
    %55 = arith.truncf %54 : vector<8x8xf32> to vector<8x8xbf16>
    %cst_20 = arith.constant dense<0.000000e+00> : vector<8x8xf32>
    %56 = tpu.matmul %55, %41, %cst_20 {dimension_numbers = #tpu.dot_dimension_numbers<[1], [0], [0], [1], [0, 0, 1, 1], [], []>} : vector<8x8xbf16>, vector<8x8xbf16>, vector<8x8xf32> -> vector<8x8xf32>
    %c0_21 = arith.constant 0 : index
    %c0_22 = arith.constant 0 : index
    %57 = vector.load %arg21[%c0_21, %c0_22] : memref<8x32xf32, #tpu.memory_space<vmem>>, vector<8x8xf32>
    tpu.vector_store %arg21[%c0_21, %c0_22], %56 {strides = array<i32>} : memref<8x32xf32, #tpu.memory_space<vmem>>, vector<8x8xf32>,
    %58 = vector.extract_strided_slice %34 {offsets = [0, 8], sizes = [8, 8], strides = [1, 1]} : vector<8x32xbf16> to vector<8x8xbf16>
    %59 = vector.extract_strided_slice %36 {offsets = [0, 8], sizes = [8, 8], strides = [1, 1]} : vector<8x32xbf16> to vector<8x8xbf16>
    %60 = vector.extract_strided_slice %38 {offsets = [0, 8], sizes = [8, 8], strides = [1, 1]} : vector<8x32xbf16> to vector<8x8xbf16>
    %cst_23 = arith.constant dense<0.000000e+00> : vector<8x8xf32>
    %61 = tpu.matmul %58, %59, %cst_23 {dimension_numbers = #tpu.dot_dimension_numbers<[1], [1], [0], [0], [0, 0, 1, 0], [], []>} : vector<8x8xbf16>, vector<8x8xbf16>, vector<8x8xf32> -> vector<8x8xf32>
    %62 = vector.broadcast %3 : vector<1x8xf32> to vector<8x8xf32>
    %63 = arith.addf %61, %62 : vector<8x8xf32>
    %cst_24 = arith.constant dense<0xFF800000> : vector<8xf32>
    %64 = vector.multi_reduction <maximumf>, %63, %cst_24 [1] : vector<8x8xf32> to vector<8xf32>
    %65 = vector.shape_cast %64 : vector<8xf32> to vector<8x1xf32>
    %66 = vector.broadcast %65 : vector<8x1xf32> to vector<8x8xf32>
    %67 = arith.subf %63, %66 : vector<8x8xf32>
    %68 = math.exp %67 : vector<8x8xf32>
    %cst_25 = arith.constant dense<0.000000e+00> : vector<8xf32>
    %69 = vector.multi_reduction <add>, %68, %cst_25 [1] : vector<8x8xf32> to vector<8xf32>
    %70 = vector.shape_cast %69 : vector<8xf32> to vector<8x1xf32>
    %71 = tpu.reciprocal %70 {approx = true} : vector<8x1xf32> -> vector<8x1xf32>
    %72 = vector.broadcast %71 : vector<8x1xf32> to vector<8x8xf32>
    %73 = arith.mulf %68, %72 : vector<8x8xf32>
    %74 = arith.truncf %73 : vector<8x8xf32> to vector<8x8xbf16>
    %cst_26 = arith.constant dense<0.000000e+00> : vector<8x8xf32>
    %75 = tpu.matmul %74, %60, %cst_26 {dimension_numbers = #tpu.dot_dimension_numbers<[1], [0], [0], [1], [0, 0, 1, 1], [], []>} : vector<8x8xbf16>, vector<8x8xbf16>, vector<8x8xf32> -> vector<8x8xf32>
    %c0_27 = arith.constant 0 : index
    %c8 = arith.constant 8 : index
    %76 = vector.load %arg21[%c0_27, %c8] : memref<8x32xf32, #tpu.memory_space<vmem>>, vector<8x8xf32>
    tpu.vector_store %arg21[%c0_27, %c8], %75 {strides = array<i32>} : memref<8x32xf32, #tpu.memory_space<vmem>>, vector<8x8xf32>,
    %77 = vector.extract_strided_slice %34 {offsets = [0, 16], sizes = [8, 8], strides = [1, 1]} : vector<8x32xbf16> to vector<8x8xbf16>
    %78 = vector.extract_strided_slice %36 {offsets = [0, 16], sizes = [8, 8], strides = [1, 1]} : vector<8x32xbf16> to vector<8x8xbf16>
    %79 = vector.extract_strided_slice %38 {offsets = [0, 16], sizes = [8, 8], strides = [1, 1]} : vector<8x32xbf16> to vector<8x8xbf16>
    %cst_28 = arith.constant dense<0.000000e+00> : vector<8x8xf32>
    %80 = tpu.matmul %77, %78, %cst_28 {dimension_numbers = #tpu.dot_dimension_numbers<[1], [1], [0], [0], [0, 0, 1, 0], [], []>} : vector<8x8xbf16>, vector<8x8xbf16>, vector<8x8xf32> -> vector<8x8xf32>
    %81 = vector.broadcast %3 : vector<1x8xf32> to vector<8x8xf32>
    %82 = arith.addf %80, %81 : vector<8x8xf32>
    %cst_29 = arith.constant dense<0xFF800000> : vector<8xf32>
    %83 = vector.multi_reduction <maximumf>, %82, %cst_29 [1] : vector<8x8xf32> to vector<8xf32>
    %84 = vector.shape_cast %83 : vector<8xf32> to vector<8x1xf32>
    %85 = vector.broadcast %84 : vector<8x1xf32> to vector<8x8xf32>
    %86 = arith.subf %82, %85 : vector<8x8xf32>
    %87 = math.exp %86 : vector<8x8xf32>
    %cst_30 = arith.constant dense<0.000000e+00> : vector<8xf32>
    %88 = vector.multi_reduction <add>, %87, %cst_30 [1] : vector<8x8xf32> to vector<8xf32>
    %89 = vector.shape_cast %88 : vector<8xf32> to vector<8x1xf32>
    %90 = tpu.reciprocal %89 {approx = true} : vector<8x1xf32> -> vector<8x1xf32>
    %91 = vector.broadcast %90 : vector<8x1xf32> to vector<8x8xf32>
    %92 = arith.mulf %87, %91 : vector<8x8xf32>
    %93 = arith.truncf %92 : vector<8x8xf32> to vector<8x8xbf16>
    %cst_31 = arith.constant dense<0.000000e+00> : vector<8x8xf32>
    %94 = tpu.matmul %93, %79, %cst_31 {dimension_numbers = #tpu.dot_dimension_numbers<[1], [0], [0], [1], [0, 0, 1, 1], [], []>} : vector<8x8xbf16>, vector<8x8xbf16>, vector<8x8xf32> -> vector<8x8xf32>
    %c0_32 = arith.constant 0 : index
    %c16 = arith.constant 16 : index
    %95 = vector.load %arg21[%c0_32, %c16] : memref<8x32xf32, #tpu.memory_space<vmem>>, vector<8x8xf32>
    tpu.vector_store %arg21[%c0_32, %c16], %94 {strides = array<i32>} : memref<8x32xf32, #tpu.memory_space<vmem>>, vector<8x8xf32>,
    %96 = vector.extract_strided_slice %34 {offsets = [0, 24], sizes = [8, 8], strides = [1, 1]} : vector<8x32xbf16> to vector<8x8xbf16>
    %97 = vector.extract_strided_slice %36 {offsets = [0, 24], sizes = [8, 8], strides = [1, 1]} : vector<8x32xbf16> to vector<8x8xbf16>
    %98 = vector.extract_strided_slice %38 {offsets = [0, 24], sizes = [8, 8], strides = [1, 1]} : vector<8x32xbf16> to vector<8x8xbf16>
    %cst_33 = arith.constant dense<0.000000e+00> : vector<8x8xf32>
    %99 = tpu.matmul %96, %97, %cst_33 {dimension_numbers = #tpu.dot_dimension_numbers<[1], [1], [0], [0], [0, 0, 1, 0], [], []>} : vector<8x8xbf16>, vector<8x8xbf16>, vector<8x8xf32> -> vector<8x8xf32>
    %100 = vector.broadcast %3 : vector<1x8xf32> to vector<8x8xf32>
    %101 = arith.addf %99, %100 : vector<8x8xf32>
    %cst_34 = arith.constant dense<0xFF800000> : vector<8xf32>
    %102 = vector.multi_reduction <maximumf>, %101, %cst_34 [1] : vector<8x8xf32> to vector<8xf32>
    %103 = vector.shape_cast %102 : vector<8xf32> to vector<8x1xf32>
    %104 = vector.broadcast %103 : vector<8x1xf32> to vector<8x8xf32>
    %105 = arith.subf %101, %104 : vector<8x8xf32>
    %106 = math.exp %105 : vector<8x8xf32>
    %cst_35 = arith.constant dense<0.000000e+00> : vector<8xf32>
    %107 = vector.multi_reduction <add>, %106, %cst_35 [1] : vector<8x8xf32> to vector<8xf32>
    %108 = vector.shape_cast %107 : vector<8xf32> to vector<8x1xf32>
    %109 = tpu.reciprocal %108 {approx = true} : vector<8x1xf32> -> vector<8x1xf32>
    %110 = vector.broadcast %109 : vector<8x1xf32> to vector<8x8xf32>
    %111 = arith.mulf %106, %110 : vector<8x8xf32>
    %112 = arith.truncf %111 : vector<8x8xf32> to vector<8x8xbf16>
    %cst_36 = arith.constant dense<0.000000e+00> : vector<8x8xf32>
    %113 = tpu.matmul %112, %98, %cst_36 {dimension_numbers = #tpu.dot_dimension_numbers<[1], [0], [0], [1], [0, 0, 1, 1], [], []>} : vector<8x8xbf16>, vector<8x8xbf16>, vector<8x8xf32> -> vector<8x8xf32>
    %c0_37 = arith.constant 0 : index
    %c24 = arith.constant 24 : index
    %114 = vector.load %arg21[%c0_37, %c24] : memref<8x32xf32, #tpu.memory_space<vmem>>, vector<8x8xf32>
    tpu.vector_store %arg21[%c0_37, %c24], %113 {strides = array<i32>} : memref<8x32xf32, #tpu.memory_space<vmem>>, vector<8x8xf32>,
    %c0_38 = arith.constant 0 : index
    %c0_39 = arith.constant 0 : index
    %115 = vector.load %arg6[%c0_38, %c0_39] : memref<32x32xbf16, #tpu.memory_space<vmem>>, vector<32x32xbf16>
    %c0_40 = arith.constant 0 : index
    %c0_41 = arith.constant 0 : index
    %116 = vector.load %arg21[%c0_40, %c0_41] : memref<8x32xf32, #tpu.memory_space<vmem>>, vector<8x32xf32>
    %117 = arith.truncf %116 : vector<8x32xf32> to vector<8x32xbf16>
    %cst_42 = arith.constant dense<0.000000e+00> : vector<8x32xf32>
    %118 = tpu.matmul %117, %115, %cst_42 {dimension_numbers = #tpu.dot_dimension_numbers<[1], [0], [0], [1], [0, 0, 1, 1], [], []>} : vector<8x32xbf16>, vector<32x32xbf16>, vector<8x32xf32> -> vector<8x32xf32>
    %c0_43 = arith.constant 0 : index
    %c0_44 = arith.constant 0 : index
    %119 = vector.load %arg7[%c0_43, %c0_44] : memref<1x32xf32, #tpu.memory_space<vmem>>, vector<1x32xf32>
    %120 = vector.broadcast %119 : vector<1x32xf32> to vector<8x32xf32>
    %121 = arith.addf %118, %120 : vector<8x32xf32>
    %122 = arith.addf %1, %121 : vector<8x32xf32>
    %c0_45 = arith.constant 0 : index
    %c0_46 = arith.constant 0 : index
    %123 = vector.load %arg8[%c0_45, %c0_46] : memref<1x32xf32, #tpu.memory_space<vmem>>, vector<1x32xf32>
    %c0_47 = arith.constant 0 : index
    %c0_48 = arith.constant 0 : index
    %124 = vector.load %arg9[%c0_47, %c0_48] : memref<1x32xf32, #tpu.memory_space<vmem>>, vector<1x32xf32>
    %cst_49 = arith.constant dense<0.000000e+00> : vector<8xf32>
    %125 = vector.multi_reduction <add>, %122, %cst_49 [1] : vector<8x32xf32> to vector<8xf32>
    %126 = vector.shape_cast %125 : vector<8xf32> to vector<8x1xf32>
    %cst_50 = arith.constant 3.200000e+01 : f32
    %127 = vector.broadcast %cst_50 : f32 to vector<8x1xf32>
    %128 = arith.divf %126, %127 : vector<8x1xf32>
    %129 = vector.broadcast %128 : vector<8x1xf32> to vector<8x32xf32>
    %130 = arith.subf %122, %129 : vector<8x32xf32>
    %131 = arith.mulf %130, %130 : vector<8x32xf32>
    %cst_51 = arith.constant dense<0.000000e+00> : vector<8xf32>
    %132 = vector.multi_reduction <add>, %131, %cst_51 [1] : vector<8x32xf32> to vector<8xf32>
    %133 = vector.shape_cast %132 : vector<8xf32> to vector<8x1xf32>
    %cst_52 = arith.constant 3.200000e+01 : f32
    %134 = vector.broadcast %cst_52 : f32 to vector<8x1xf32>
    %135 = arith.divf %133, %134 : vector<8x1xf32>
    %136 = vector.broadcast %128 : vector<8x1xf32> to vector<8x32xf32>
    %137 = arith.subf %122, %136 : vector<8x32xf32>
    %cst_53 = arith.constant 9.99999974E-6 : f32
    %138 = vector.broadcast %cst_53 : f32 to vector<8x1xf32>
    %139 = arith.addf %135, %138 : vector<8x1xf32>
    %140 = math.rsqrt %139 : vector<8x1xf32>
    %141 = vector.broadcast %140 : vector<8x1xf32> to vector<8x32xf32>
    %142 = arith.mulf %137, %141 : vector<8x32xf32>
    %143 = vector.broadcast %123 : vector<1x32xf32> to vector<8x32xf32>
    %144 = arith.mulf %142, %143 : vector<8x32xf32>
    %145 = vector.broadcast %124 : vector<1x32xf32> to vector<8x32xf32>
    %146 = arith.addf %144, %145 : vector<8x32xf32>
    %c0_54 = arith.constant 0 : index
    %c0_55 = arith.constant 0 : index
    %147 = vector.load %arg10[%c0_54, %c0_55] : memref<32x128xbf16, #tpu.memory_space<vmem>>, vector<32x128xbf16>
    %148 = arith.truncf %146 : vector<8x32xf32> to vector<8x32xbf16>
    %cst_56 = arith.constant dense<0.000000e+00> : vector<8x128xf32>
    %149 = tpu.matmul %148, %147, %cst_56 {dimension_numbers = #tpu.dot_dimension_numbers<[1], [0], [0], [1], [0, 0, 1, 1], [], []>} : vector<8x32xbf16>, vector<32x128xbf16>, vector<8x128xf32> -> vector<8x128xf32>
    %c0_57 = arith.constant 0 : index
    %c0_58 = arith.constant 0 : index
    %150 = vector.load %arg11[%c0_57, %c0_58] : memref<1x128xf32, #tpu.memory_space<vmem>>, vector<1x128xf32>
    %151 = vector.broadcast %150 : vector<1x128xf32> to vector<8x128xf32>
    %152 = arith.addf %149, %151 : vector<8x128xf32>
    %153 = vector.extract_strided_slice %152 {offsets = [0, 0], sizes = [8, 64], strides = [1, 1]} : vector<8x128xf32> to vector<8x64xf32>
    %154 = vector.extract_strided_slice %152 {offsets = [0, 64], sizes = [8, 64], strides = [1, 1]} : vector<8x128xf32> to vector<8x64xf32>
    %155 = arith.negf %154 : vector<8x64xf32>
    %156 = math.exp %155 : vector<8x64xf32>
    %cst_59 = arith.constant 1.000000e+00 : f32
    %157 = vector.broadcast %cst_59 : f32 to vector<8x64xf32>
    %158 = arith.addf %157, %156 : vector<8x64xf32>
    %159 = arith.divf %157, %158 : vector<8x64xf32>
    %160 = arith.mulf %153, %159 : vector<8x64xf32>
    %161 = tpu.iota {dimensions = array<i32: 0>} : vector<8x1xi32>
    %cst_60 = arith.constant 0.000000e+00 : f32
    %162 = vector.broadcast %cst_60 : f32 to vector<8x64xf32>
    %c1_i32 = arith.constant 1 : i32
    %163 = tpu.dynamic_rotate %160 by %c1_i32 dim 0 : vector<8x64xf32>, i32 -> vector<8x64xf32>
    %c-1_i32 = arith.constant -1 : i32
    %164 = vector.broadcast %c-1_i32 : i32 to vector<8x1xi32>
    %165 = arith.addi %161, %164 : vector<8x1xi32>
    %c0_i32 = arith.constant 0 : i32
    %166 = vector.broadcast %c0_i32 : i32 to vector<8x1xi32>
    %167 = arith.cmpi sge, %165, %166 : vector<8x1xi32>
    %c-1_i32_61 = arith.constant -1 : i32
    %168 = vector.broadcast %c-1_i32_61 : i32 to vector<8x1xi32>
    %169 = arith.addi %161, %168 : vector<8x1xi32>
    %c7_i32 = arith.constant 7 : i32
    %170 = vector.broadcast %c7_i32 : i32 to vector<8x1xi32>
    %171 = arith.cmpi sle, %169, %170 : vector<8x1xi32>
    %172 = arith.andi %167, %171 : vector<8x1xi1>
    %cst_62 = arith.constant 0.000000e+00 : f32
    %173 = vector.shape_cast %172 : vector<8x1xi1> to vector<8x1xi1>
    %174 = vector.broadcast %173 : vector<8x1xi1> to vector<8x64xi1>
    %175 = vector.broadcast %cst_62 : f32 to vector<8x64xf32>
    %176 = arith.select %174, %163, %175 : vector<8x64xi1>, vector<8x64xf32>
    %c0_63 = arith.constant 0 : index
    %c0_64 = arith.constant 0 : index
    %177 = vector.load %arg12[%c0_63, %c0_64] : memref<3x64xf32, #tpu.memory_space<vmem>>, vector<1x64xf32>
    %178 = vector.broadcast %177 : vector<1x64xf32> to vector<8x64xf32>
    %179 = arith.mulf %176, %178 : vector<8x64xf32>
    %180 = arith.addf %162, %179 : vector<8x64xf32>
    %c0_i32_65 = arith.constant 0 : i32
    %181 = vector.broadcast %c0_i32_65 : i32 to vector<8x1xi32>
    %182 = arith.addi %161, %181 : vector<8x1xi32>
    %c0_i32_66 = arith.constant 0 : i32
    %183 = vector.broadcast %c0_i32_66 : i32 to vector<8x1xi32>
    %184 = arith.cmpi sge, %182, %183 : vector<8x1xi32>
    %c0_i32_67 = arith.constant 0 : i32
    %185 = vector.broadcast %c0_i32_67 : i32 to vector<8x1xi32>
    %186 = arith.addi %161, %185 : vector<8x1xi32>
    %c7_i32_68 = arith.constant 7 : i32
    %187 = vector.broadcast %c7_i32_68 : i32 to vector<8x1xi32>
    %188 = arith.cmpi sle, %186, %187 : vector<8x1xi32>
    %189 = arith.andi %184, %188 : vector<8x1xi1>
    %cst_69 = arith.constant 0.000000e+00 : f32
    %190 = vector.shape_cast %189 : vector<8x1xi1> to vector<8x1xi1>
    %191 = vector.broadcast %190 : vector<8x1xi1> to vector<8x64xi1>
    %192 = vector.broadcast %cst_69 : f32 to vector<8x64xf32>
    %193 = arith.select %191, %160, %192 : vector<8x64xi1>, vector<8x64xf32>
    %c1 = arith.constant 1 : index
    %c0_70 = arith.constant 0 : index
    %194 = vector.load %arg12[%c1, %c0_70] : memref<3x64xf32, #tpu.memory_space<vmem>>, vector<1x64xf32>
    %195 = vector.broadcast %194 : vector<1x64xf32> to vector<8x64xf32>
    %196 = arith.mulf %193, %195 : vector<8x64xf32>
    %197 = arith.addf %180, %196 : vector<8x64xf32>
    %c7_i32_71 = arith.constant 7 : i32
    %198 = tpu.dynamic_rotate %160 by %c7_i32_71 dim 0 : vector<8x64xf32>, i32 -> vector<8x64xf32>
    %c1_i32_72 = arith.constant 1 : i32
    %199 = vector.broadcast %c1_i32_72 : i32 to vector<8x1xi32>
    %200 = arith.addi %161, %199 : vector<8x1xi32>
    %c0_i32_73 = arith.constant 0 : i32
    %201 = vector.broadcast %c0_i32_73 : i32 to vector<8x1xi32>
    %202 = arith.cmpi sge, %200, %201 : vector<8x1xi32>
    %c1_i32_74 = arith.constant 1 : i32
    %203 = vector.broadcast %c1_i32_74 : i32 to vector<8x1xi32>
    %204 = arith.addi %161, %203 : vector<8x1xi32>
    %c7_i32_75 = arith.constant 7 : i32
    %205 = vector.broadcast %c7_i32_75 : i32 to vector<8x1xi32>
    %206 = arith.cmpi sle, %204, %205 : vector<8x1xi32>
    %207 = arith.andi %202, %206 : vector<8x1xi1>
    %cst_76 = arith.constant 0.000000e+00 : f32
    %208 = vector.shape_cast %207 : vector<8x1xi1> to vector<8x1xi1>
    %209 = vector.broadcast %208 : vector<8x1xi1> to vector<8x64xi1>
    %210 = vector.broadcast %cst_76 : f32 to vector<8x64xf32>
    %211 = arith.select %209, %198, %210 : vector<8x64xi1>, vector<8x64xf32>
    %c2 = arith.constant 2 : index
    %c0_77 = arith.constant 0 : index
    %212 = vector.load %arg12[%c2, %c0_77] : memref<3x64xf32, #tpu.memory_space<vmem>>, vector<1x64xf32>
    %213 = vector.broadcast %212 : vector<1x64xf32> to vector<8x64xf32>
    %214 = arith.mulf %211, %213 : vector<8x64xf32>
    %215 = arith.addf %197, %214 : vector<8x64xf32>
    %c0_78 = arith.constant 0 : index
    %c0_79 = arith.constant 0 : index
    %216 = vector.load %arg13[%c0_78, %c0_79] : memref<1x64xf32, #tpu.memory_space<vmem>>, vector<1x64xf32>
    %217 = vector.broadcast %216 : vector<1x64xf32> to vector<8x64xf32>
    %218 = arith.addf %215, %217 : vector<8x64xf32>
    %c0_80 = arith.constant 0 : index
    %c0_81 = arith.constant 0 : index
    %219 = vector.load %arg16[%c0_80, %c0_81] : memref<1x64xf32, #tpu.memory_space<vmem>>, vector<1x64xf32>
    %220 = vector.broadcast %219 : vector<1x64xf32> to vector<8x64xf32>
    %221 = arith.subf %218, %220 : vector<8x64xf32>
    %c0_82 = arith.constant 0 : index
    %c0_83 = arith.constant 0 : index
    %222 = vector.load %arg17[%c0_82, %c0_83] : memref<1x64xf32, #tpu.memory_space<vmem>>, vector<1x64xf32>
    %cst_84 = arith.constant 9.99999974E-6 : f32
    %223 = vector.broadcast %cst_84 : f32 to vector<1x64xf32>
    %224 = arith.addf %222, %223 : vector<1x64xf32>
    %225 = math.rsqrt %224 : vector<1x64xf32>
    %226 = vector.broadcast %225 : vector<1x64xf32> to vector<8x64xf32>
    %227 = arith.mulf %221, %226 : vector<8x64xf32>
    %c0_85 = arith.constant 0 : index
    %c0_86 = arith.constant 0 : index
    %228 = vector.load %arg14[%c0_85, %c0_86] : memref<1x64xf32, #tpu.memory_space<vmem>>, vector<1x64xf32>
    %229 = vector.broadcast %228 : vector<1x64xf32> to vector<8x64xf32>
    %230 = arith.mulf %227, %229 : vector<8x64xf32>
    %c0_87 = arith.constant 0 : index
    %c0_88 = arith.constant 0 : index
    %231 = vector.load %arg15[%c0_87, %c0_88] : memref<1x64xf32, #tpu.memory_space<vmem>>, vector<1x64xf32>
    %232 = vector.broadcast %231 : vector<1x64xf32> to vector<8x64xf32>
    %233 = arith.addf %230, %232 : vector<8x64xf32>
    %234 = arith.negf %233 : vector<8x64xf32>
    %235 = math.exp %234 : vector<8x64xf32>
    %cst_89 = arith.constant 1.000000e+00 : f32
    %236 = vector.broadcast %cst_89 : f32 to vector<8x64xf32>
    %237 = arith.addf %236, %235 : vector<8x64xf32>
    %238 = arith.divf %236, %237 : vector<8x64xf32>
    %239 = arith.mulf %233, %238 : vector<8x64xf32>
    %c0_90 = arith.constant 0 : index
    %c0_91 = arith.constant 0 : index
    %240 = vector.load %arg18[%c0_90, %c0_91] : memref<64x32xbf16, #tpu.memory_space<vmem>>, vector<64x32xbf16>
    %241 = arith.truncf %239 : vector<8x64xf32> to vector<8x64xbf16>
    %cst_92 = arith.constant dense<0.000000e+00> : vector<8x32xf32>
    %242 = tpu.matmul %241, %240, %cst_92 {dimension_numbers = #tpu.dot_dimension_numbers<[1], [0], [0], [1], [0, 0, 1, 1], [], []>} : vector<8x64xbf16>, vector<64x32xbf16>, vector<8x32xf32> -> vector<8x32xf32>
    %c0_93 = arith.constant 0 : index
    %c0_94 = arith.constant 0 : index
    %243 = vector.load %arg19[%c0_93, %c0_94] : memref<1x32xf32, #tpu.memory_space<vmem>>, vector<1x32xf32>
    %244 = vector.broadcast %243 : vector<1x32xf32> to vector<8x32xf32>
    %245 = arith.addf %242, %244 : vector<8x32xf32>
    %246 = arith.addf %122, %245 : vector<8x32xf32>
    %c0_95 = arith.constant 0 : index
    %c0_96 = arith.constant 0 : index
    %c0_97 = arith.constant 0 : index
    %247 = vector.load %arg20[%c0_95, %c0_96, %c0_97] : memref<1x8x32xf32, #tpu.memory_space<vmem>>, vector<1x8x32xf32>
    %248 = vector.shape_cast %247 : vector<1x8x32xf32> to vector<8x32xf32>
    %249 = vector.shape_cast %246 : vector<8x32xf32> to vector<1x8x32xf32>
    tpu.vector_store %arg20[%c0_95, %c0_96, %c0_97], %249 {strides = array<i32>} : memref<1x8x32xf32, #tpu.memory_space<vmem>>, vector<1x8x32xf32>,
    return
  }
  func.func @transform_0(%arg0: i32) -> (i32, i32, i32) {
    %c0_i32 = arith.constant 0 : i32
    %c0_i32_0 = arith.constant 0 : i32
    %c0_i32_1 = arith.constant 0 : i32
    return %arg0, %c0_i32, %c0_i32_0 : i32, i32, i32
  }
  func.func @transform_1(%arg0: i32) -> (i32, i32, i32) {
    %c0_i32 = arith.constant 0 : i32
    %c0_i32_0 = arith.constant 0 : i32
    %c0_i32_1 = arith.constant 0 : i32
    return %arg0, %c0_i32, %c0_i32_0 : i32, i32, i32
  }
  func.func @transform_2(%arg0: i32) -> (i32, i32) {
    %c0_i32 = arith.constant 0 : i32
    %c0_i32_0 = arith.constant 0 : i32
    %c0_i32_1 = arith.constant 0 : i32
    return %c0_i32, %c0_i32_0 : i32, i32
  }
  func.func @transform_3(%arg0: i32) -> (i32, i32) {
    %c0_i32 = arith.constant 0 : i32
    %c0_i32_0 = arith.constant 0 : i32
    %c0_i32_1 = arith.constant 0 : i32
    return %c0_i32, %c0_i32_0 : i32, i32
  }
  func.func @transform_4(%arg0: i32) -> (i32, i32) {
    %c0_i32 = arith.constant 0 : i32
    %c0_i32_0 = arith.constant 0 : i32
    %c0_i32_1 = arith.constant 0 : i32
    return %c0_i32, %c0_i32_0 : i32, i32
  }
  func.func @transform_5(%arg0: i32) -> (i32, i32) {
    %c0_i32 = arith.constant 0 : i32
    %c0_i32_0 = arith.constant 0 : i32
    %c0_i32_1 = arith.constant 0 : i32
    return %c0_i32, %c0_i32_0 : i32, i32
  }
  func.func @transform_6(%arg0: i32) -> (i32, i32) {
    %c0_i32 = arith.constant 0 : i32
    %c0_i32_0 = arith.constant 0 : i32
    %c0_i32_1 = arith.constant 0 : i32
    return %c0_i32, %c0_i32_0 : i32, i32
  }
  func.func @transform_7(%arg0: i32) -> (i32, i32) {
    %c0_i32 = arith.constant 0 : i32
    %c0_i32_0 = arith.constant 0 : i32
    %c0_i32_1 = arith.constant 0 : i32
    return %c0_i32, %c0_i32_0 : i32, i32
  }
  func.func @transform_8(%arg0: i32) -> (i32, i32) {
    %c0_i32 = arith.constant 0 : i32
    %c0_i32_0 = arith.constant 0 : i32
    %c0_i32_1 = arith.constant 0 : i32
    return %c0_i32, %c0_i32_0 : i32, i32
  }
  func.func @transform_9(%arg0: i32) -> (i32, i32) {
    %c0_i32 = arith.constant 0 : i32
    %c0_i32_0 = arith.constant 0 : i32
    %c0_i32_1 = arith.constant 0 : i32
    return %c0_i32, %c0_i32_0 : i32, i32
  }
  func.func @transform_10(%arg0: i32) -> (i32, i32) {
    %c0_i32 = arith.constant 0 : i32
    %c0_i32_0 = arith.constant 0 : i32
    %c0_i32_1 = arith.constant 0 : i32
    return %c0_i32, %c0_i32_0 : i32, i32
  }
  func.func @transform_11(%arg0: i32) -> (i32, i32) {
    %c0_i32 = arith.constant 0 : i32
    %c0_i32_0 = arith.constant 0 : i32
    %c0_i32_1 = arith.constant 0 : i32
    return %c0_i32, %c0_i32_0 : i32, i32
  }
  func.func @transform_12(%arg0: i32) -> (i32, i32) {
    %c0_i32 = arith.constant 0 : i32
    %c0_i32_0 = arith.constant 0 : i32
    %c0_i32_1 = arith.constant 0 : i32
    return %c0_i32, %c0_i32_0 : i32, i32
  }
  func.func @transform_13(%arg0: i32) -> (i32, i32) {
    %c0_i32 = arith.constant 0 : i32
    %c0_i32_0 = arith.constant 0 : i32
    %c0_i32_1 = arith.constant 0 : i32
    return %c0_i32, %c0_i32_0 : i32, i32
  }
  func.func @transform_14(%arg0: i32) -> (i32, i32) {
    %c0_i32 = arith.constant 0 : i32
    %c0_i32_0 = arith.constant 0 : i32
    %c0_i32_1 = arith.constant 0 : i32
    return %c0_i32, %c0_i32_0 : i32, i32
  }
  func.func @transform_15(%arg0: i32) -> (i32, i32) {
    %c0_i32 = arith.constant 0 : i32
    %c0_i32_0 = arith.constant 0 : i32
    %c0_i32_1 = arith.constant 0 : i32
    return %c0_i32, %c0_i32_0 : i32, i32
  }
  func.func @transform_16(%arg0: i32) -> (i32, i32) {
    %c0_i32 = arith.constant 0 : i32
    %c0_i32_0 = arith.constant 0 : i32
    %c0_i32_1 = arith.constant 0 : i32
    return %c0_i32, %c0_i32_0 : i32, i32
  }
  func.func @transform_17(%arg0: i32) -> (i32, i32) {
    %c0_i32 = arith.constant 0 : i32
    %c0_i32_0 = arith.constant 0 : i32
    %c0_i32_1 = arith.constant 0 : i32
    return %c0_i32, %c0_i32_0 : i32, i32
  }
  func.func @transform_18(%arg0: i32) -> (i32, i32) {
    %c0_i32 = arith.constant 0 : i32
    %c0_i32_0 = arith.constant 0 : i32
    %c0_i32_1 = arith.constant 0 : i32
    return %c0_i32, %c0_i32_0 : i32, i32
  }
  func.func @transform_19(%arg0: i32) -> (i32, i32, i32) {
    %c0_i32 = arith.constant 0 : i32
    %c0_i32_0 = arith.constant 0 : i32
    %c0_i32_1 = arith.constant 0 : i32
    return %arg0, %c0_i32, %c0_i32_0 : i32, i32, i32
  }
}

module attributes {stable_mosaic.version = 11 : i64} {
  func.func @layernorm_kernel(%arg0: i32, %arg1: memref<16x32xf32, #tpu.memory_space<vmem>>, %arg2: memref<1x32xf32, #tpu.memory_space<vmem>>, %arg3: memref<1x32xf32, #tpu.memory_space<vmem>>, %arg4: memref<16x32xf32, #tpu.memory_space<vmem>>) attributes {dimension_semantics = [#tpu.dimension_semantics<parallel>], iteration_bounds = array<i64: 1>, scalar_prefetch = 0 : i64, scratch_operands = 0 : i64, tpu.core_type = #tpu.core_type<tc>, window_params = [{transform_indices = @transform_0, window_bounds = array<i64: 16, 32>}, {pipeline_mode = #tpu.pipeline_mode<synchronous>, transform_indices = @transform_1, window_bounds = array<i64: 1, 32>}, {pipeline_mode = #tpu.pipeline_mode<synchronous>, transform_indices = @transform_2, window_bounds = array<i64: 1, 32>}, {transform_indices = @transform_3, window_bounds = array<i64: 16, 32>}]} {
    %c0 = arith.constant 0 : index
    %c0_0 = arith.constant 0 : index
    %0 = vector.load %arg1[%c0, %c0_0] : memref<16x32xf32, #tpu.memory_space<vmem>>, vector<16x32xf32>
    %c0_1 = arith.constant 0 : index
    %c0_2 = arith.constant 0 : index
    %1 = vector.load %arg2[%c0_1, %c0_2] : memref<1x32xf32, #tpu.memory_space<vmem>>, vector<1x32xf32>
    %c0_3 = arith.constant 0 : index
    %c0_4 = arith.constant 0 : index
    %2 = vector.load %arg3[%c0_3, %c0_4] : memref<1x32xf32, #tpu.memory_space<vmem>>, vector<1x32xf32>
    %cst = arith.constant dense<0.000000e+00> : vector<16xf32>
    %3 = vector.multi_reduction <add>, %0, %cst [1] : vector<16x32xf32> to vector<16xf32>
    %4 = vector.shape_cast %3 : vector<16xf32> to vector<16x1xf32>
    %cst_5 = arith.constant 3.200000e+01 : f32
    %5 = vector.broadcast %cst_5 : f32 to vector<16x1xf32>
    %6 = arith.divf %4, %5 : vector<16x1xf32>
    %7 = vector.broadcast %6 : vector<16x1xf32> to vector<16x32xf32>
    %8 = arith.subf %0, %7 : vector<16x32xf32>
    %9 = arith.mulf %8, %8 : vector<16x32xf32>
    %cst_6 = arith.constant dense<0.000000e+00> : vector<16xf32>
    %10 = vector.multi_reduction <add>, %9, %cst_6 [1] : vector<16x32xf32> to vector<16xf32>
    %11 = vector.shape_cast %10 : vector<16xf32> to vector<16x1xf32>
    %cst_7 = arith.constant 3.200000e+01 : f32
    %12 = vector.broadcast %cst_7 : f32 to vector<16x1xf32>
    %13 = arith.divf %11, %12 : vector<16x1xf32>
    %14 = vector.broadcast %6 : vector<16x1xf32> to vector<16x32xf32>
    %15 = arith.subf %0, %14 : vector<16x32xf32>
    %cst_8 = arith.constant 9.99999974E-6 : f32
    %16 = vector.broadcast %cst_8 : f32 to vector<16x1xf32>
    %17 = arith.addf %13, %16 : vector<16x1xf32>
    %18 = math.rsqrt %17 : vector<16x1xf32>
    %19 = vector.broadcast %18 : vector<16x1xf32> to vector<16x32xf32>
    %20 = arith.mulf %15, %19 : vector<16x32xf32>
    %21 = vector.broadcast %1 : vector<1x32xf32> to vector<16x32xf32>
    %22 = arith.mulf %20, %21 : vector<16x32xf32>
    %23 = vector.broadcast %2 : vector<1x32xf32> to vector<16x32xf32>
    %24 = arith.addf %22, %23 : vector<16x32xf32>
    %c0_9 = arith.constant 0 : index
    %c0_10 = arith.constant 0 : index
    %25 = vector.load %arg4[%c0_9, %c0_10] : memref<16x32xf32, #tpu.memory_space<vmem>>, vector<16x32xf32>
    tpu.vector_store %arg4[%c0_9, %c0_10], %24 {strides = array<i32>} : memref<16x32xf32, #tpu.memory_space<vmem>>, vector<16x32xf32>,
    return
  }
  func.func @transform_0(%arg0: i32) -> (i32, i32) {
    %c0_i32 = arith.constant 0 : i32
    %c0_i32_0 = arith.constant 0 : i32
    return %arg0, %c0_i32 : i32, i32
  }
  func.func @transform_1(%arg0: i32) -> (i32, i32) {
    %c0_i32 = arith.constant 0 : i32
    %c0_i32_0 = arith.constant 0 : i32
    %c0_i32_1 = arith.constant 0 : i32
    return %c0_i32, %c0_i32_0 : i32, i32
  }
  func.func @transform_2(%arg0: i32) -> (i32, i32) {
    %c0_i32 = arith.constant 0 : i32
    %c0_i32_0 = arith.constant 0 : i32
    %c0_i32_1 = arith.constant 0 : i32
    return %c0_i32, %c0_i32_0 : i32, i32
  }
  func.func @transform_3(%arg0: i32) -> (i32, i32) {
    %c0_i32 = arith.constant 0 : i32
    %c0_i32_0 = arith.constant 0 : i32
    return %arg0, %c0_i32 : i32, i32
  }
}

module attributes {stable_mosaic.version = 11 : i64} {
  func.func @ff_block_kernel(%arg0: i32, %arg1: memref<16x32xf32, #tpu.memory_space<vmem>>, %arg2: memref<1x32xf32, #tpu.memory_space<vmem>>, %arg3: memref<1x32xf32, #tpu.memory_space<vmem>>, %arg4: memref<32x128xbf16, #tpu.memory_space<vmem>>, %arg5: memref<1x128xf32, #tpu.memory_space<vmem>>, %arg6: memref<128x32xbf16, #tpu.memory_space<vmem>>, %arg7: memref<1x32xf32, #tpu.memory_space<vmem>>, %arg8: memref<1x32xf32, #tpu.memory_space<vmem>>, %arg9: memref<1x32xf32, #tpu.memory_space<vmem>>, %arg10: memref<16x32xf32, #tpu.memory_space<vmem>>) attributes {dimension_semantics = [#tpu.dimension_semantics<parallel>], iteration_bounds = array<i64: 1>, scalar_prefetch = 0 : i64, scratch_operands = 0 : i64, tpu.core_type = #tpu.core_type<tc>, window_params = [{transform_indices = @transform_0, window_bounds = array<i64: 16, 32>}, {pipeline_mode = #tpu.pipeline_mode<synchronous>, transform_indices = @transform_1, window_bounds = array<i64: 1, 32>}, {pipeline_mode = #tpu.pipeline_mode<synchronous>, transform_indices = @transform_2, window_bounds = array<i64: 1, 32>}, {pipeline_mode = #tpu.pipeline_mode<synchronous>, transform_indices = @transform_3, window_bounds = array<i64: 32, 128>}, {pipeline_mode = #tpu.pipeline_mode<synchronous>, transform_indices = @transform_4, window_bounds = array<i64: 1, 128>}, {pipeline_mode = #tpu.pipeline_mode<synchronous>, transform_indices = @transform_5, window_bounds = array<i64: 128, 32>}, {pipeline_mode = #tpu.pipeline_mode<synchronous>, transform_indices = @transform_6, window_bounds = array<i64: 1, 32>}, {pipeline_mode = #tpu.pipeline_mode<synchronous>, transform_indices = @transform_7, window_bounds = array<i64: 1, 32>}, {pipeline_mode = #tpu.pipeline_mode<synchronous>, transform_indices = @transform_8, window_bounds = array<i64: 1, 32>}, {transform_indices = @transform_9, window_bounds = array<i64: 16, 32>}]} {
    %c0 = arith.constant 0 : index
    %c0_0 = arith.constant 0 : index
    %0 = vector.load %arg1[%c0, %c0_0] : memref<16x32xf32, #tpu.memory_space<vmem>>, vector<16x32xf32>
    %c0_1 = arith.constant 0 : index
    %c0_2 = arith.constant 0 : index
    %1 = vector.load %arg2[%c0_1, %c0_2] : memref<1x32xf32, #tpu.memory_space<vmem>>, vector<1x32xf32>
    %c0_3 = arith.constant 0 : index
    %c0_4 = arith.constant 0 : index
    %2 = vector.load %arg3[%c0_3, %c0_4] : memref<1x32xf32, #tpu.memory_space<vmem>>, vector<1x32xf32>
    %cst = arith.constant dense<0.000000e+00> : vector<16xf32>
    %3 = vector.multi_reduction <add>, %0, %cst [1] : vector<16x32xf32> to vector<16xf32>
    %4 = vector.shape_cast %3 : vector<16xf32> to vector<16x1xf32>
    %cst_5 = arith.constant 3.200000e+01 : f32
    %5 = vector.broadcast %cst_5 : f32 to vector<16x1xf32>
    %6 = arith.divf %4, %5 : vector<16x1xf32>
    %7 = vector.broadcast %6 : vector<16x1xf32> to vector<16x32xf32>
    %8 = arith.subf %0, %7 : vector<16x32xf32>
    %9 = arith.mulf %8, %8 : vector<16x32xf32>
    %cst_6 = arith.constant dense<0.000000e+00> : vector<16xf32>
    %10 = vector.multi_reduction <add>, %9, %cst_6 [1] : vector<16x32xf32> to vector<16xf32>
    %11 = vector.shape_cast %10 : vector<16xf32> to vector<16x1xf32>
    %cst_7 = arith.constant 3.200000e+01 : f32
    %12 = vector.broadcast %cst_7 : f32 to vector<16x1xf32>
    %13 = arith.divf %11, %12 : vector<16x1xf32>
    %14 = vector.broadcast %6 : vector<16x1xf32> to vector<16x32xf32>
    %15 = arith.subf %0, %14 : vector<16x32xf32>
    %cst_8 = arith.constant 9.99999974E-6 : f32
    %16 = vector.broadcast %cst_8 : f32 to vector<16x1xf32>
    %17 = arith.addf %13, %16 : vector<16x1xf32>
    %18 = math.rsqrt %17 : vector<16x1xf32>
    %19 = vector.broadcast %18 : vector<16x1xf32> to vector<16x32xf32>
    %20 = arith.mulf %15, %19 : vector<16x32xf32>
    %21 = vector.broadcast %1 : vector<1x32xf32> to vector<16x32xf32>
    %22 = arith.mulf %20, %21 : vector<16x32xf32>
    %23 = vector.broadcast %2 : vector<1x32xf32> to vector<16x32xf32>
    %24 = arith.addf %22, %23 : vector<16x32xf32>
    %c0_9 = arith.constant 0 : index
    %c0_10 = arith.constant 0 : index
    %25 = vector.load %arg4[%c0_9, %c0_10] : memref<32x128xbf16, #tpu.memory_space<vmem>>, vector<32x128xbf16>
    %26 = arith.truncf %24 : vector<16x32xf32> to vector<16x32xbf16>
    %cst_11 = arith.constant dense<0.000000e+00> : vector<16x128xf32>
    %27 = tpu.matmul %26, %25, %cst_11 {dimension_numbers = #tpu.dot_dimension_numbers<[1], [0], [0], [1], [0, 0, 1, 1], [], []>} : vector<16x32xbf16>, vector<32x128xbf16>, vector<16x128xf32> -> vector<16x128xf32>
    %c0_12 = arith.constant 0 : index
    %c0_13 = arith.constant 0 : index
    %28 = vector.load %arg5[%c0_12, %c0_13] : memref<1x128xf32, #tpu.memory_space<vmem>>, vector<1x128xf32>
    %29 = vector.broadcast %28 : vector<1x128xf32> to vector<16x128xf32>
    %30 = arith.addf %27, %29 : vector<16x128xf32>
    %31 = arith.negf %30 : vector<16x128xf32>
    %32 = math.exp %31 : vector<16x128xf32>
    %cst_14 = arith.constant 1.000000e+00 : f32
    %33 = vector.broadcast %cst_14 : f32 to vector<16x128xf32>
    %34 = arith.addf %33, %32 : vector<16x128xf32>
    %35 = arith.divf %33, %34 : vector<16x128xf32>
    %36 = arith.mulf %30, %35 : vector<16x128xf32>
    %c0_15 = arith.constant 0 : index
    %c0_16 = arith.constant 0 : index
    %37 = vector.load %arg6[%c0_15, %c0_16] : memref<128x32xbf16, #tpu.memory_space<vmem>>, vector<128x32xbf16>
    %38 = arith.truncf %36 : vector<16x128xf32> to vector<16x128xbf16>
    %cst_17 = arith.constant dense<0.000000e+00> : vector<16x32xf32>
    %39 = tpu.matmul %38, %37, %cst_17 {dimension_numbers = #tpu.dot_dimension_numbers<[1], [0], [0], [1], [0, 0, 1, 1], [], []>} : vector<16x128xbf16>, vector<128x32xbf16>, vector<16x32xf32> -> vector<16x32xf32>
    %c0_18 = arith.constant 0 : index
    %c0_19 = arith.constant 0 : index
    %40 = vector.load %arg7[%c0_18, %c0_19] : memref<1x32xf32, #tpu.memory_space<vmem>>, vector<1x32xf32>
    %41 = vector.broadcast %40 : vector<1x32xf32> to vector<16x32xf32>
    %42 = arith.addf %39, %41 : vector<16x32xf32>
    %cst_20 = arith.constant 5.000000e-01 : f32
    %43 = vector.broadcast %cst_20 : f32 to vector<16x32xf32>
    %44 = arith.mulf %43, %42 : vector<16x32xf32>
    %45 = arith.addf %0, %44 : vector<16x32xf32>
    %c0_21 = arith.constant 0 : index
    %c0_22 = arith.constant 0 : index
    %46 = vector.load %arg8[%c0_21, %c0_22] : memref<1x32xf32, #tpu.memory_space<vmem>>, vector<1x32xf32>
    %c0_23 = arith.constant 0 : index
    %c0_24 = arith.constant 0 : index
    %47 = vector.load %arg9[%c0_23, %c0_24] : memref<1x32xf32, #tpu.memory_space<vmem>>, vector<1x32xf32>
    %cst_25 = arith.constant dense<0.000000e+00> : vector<16xf32>
    %48 = vector.multi_reduction <add>, %45, %cst_25 [1] : vector<16x32xf32> to vector<16xf32>
    %49 = vector.shape_cast %48 : vector<16xf32> to vector<16x1xf32>
    %cst_26 = arith.constant 3.200000e+01 : f32
    %50 = vector.broadcast %cst_26 : f32 to vector<16x1xf32>
    %51 = arith.divf %49, %50 : vector<16x1xf32>
    %52 = vector.broadcast %51 : vector<16x1xf32> to vector<16x32xf32>
    %53 = arith.subf %45, %52 : vector<16x32xf32>
    %54 = arith.mulf %53, %53 : vector<16x32xf32>
    %cst_27 = arith.constant dense<0.000000e+00> : vector<16xf32>
    %55 = vector.multi_reduction <add>, %54, %cst_27 [1] : vector<16x32xf32> to vector<16xf32>
    %56 = vector.shape_cast %55 : vector<16xf32> to vector<16x1xf32>
    %cst_28 = arith.constant 3.200000e+01 : f32
    %57 = vector.broadcast %cst_28 : f32 to vector<16x1xf32>
    %58 = arith.divf %56, %57 : vector<16x1xf32>
    %59 = vector.broadcast %51 : vector<16x1xf32> to vector<16x32xf32>
    %60 = arith.subf %45, %59 : vector<16x32xf32>
    %cst_29 = arith.constant 9.99999974E-6 : f32
    %61 = vector.broadcast %cst_29 : f32 to vector<16x1xf32>
    %62 = arith.addf %58, %61 : vector<16x1xf32>
    %63 = math.rsqrt %62 : vector<16x1xf32>
    %64 = vector.broadcast %63 : vector<16x1xf32> to vector<16x32xf32>
    %65 = arith.mulf %60, %64 : vector<16x32xf32>
    %66 = vector.broadcast %46 : vector<1x32xf32> to vector<16x32xf32>
    %67 = arith.mulf %65, %66 : vector<16x32xf32>
    %68 = vector.broadcast %47 : vector<1x32xf32> to vector<16x32xf32>
    %69 = arith.addf %67, %68 : vector<16x32xf32>
    %c0_30 = arith.constant 0 : index
    %c0_31 = arith.constant 0 : index
    %70 = vector.load %arg10[%c0_30, %c0_31] : memref<16x32xf32, #tpu.memory_space<vmem>>, vector<16x32xf32>
    tpu.vector_store %arg10[%c0_30, %c0_31], %69 {strides = array<i32>} : memref<16x32xf32, #tpu.memory_space<vmem>>, vector<16x32xf32>,
    return
  }
  func.func @transform_0(%arg0: i32) -> (i32, i32) {
    %c0_i32 = arith.constant 0 : i32
    %c0_i32_0 = arith.constant 0 : i32
    return %arg0, %c0_i32 : i32, i32
  }
  func.func @transform_1(%arg0: i32) -> (i32, i32) {
    %c0_i32 = arith.constant 0 : i32
    %c0_i32_0 = arith.constant 0 : i32
    %c0_i32_1 = arith.constant 0 : i32
    return %c0_i32, %c0_i32_0 : i32, i32
  }
  func.func @transform_2(%arg0: i32) -> (i32, i32) {
    %c0_i32 = arith.constant 0 : i32
    %c0_i32_0 = arith.constant 0 : i32
    %c0_i32_1 = arith.constant 0 : i32
    return %c0_i32, %c0_i32_0 : i32, i32
  }
  func.func @transform_3(%arg0: i32) -> (i32, i32) {
    %c0_i32 = arith.constant 0 : i32
    %c0_i32_0 = arith.constant 0 : i32
    %c0_i32_1 = arith.constant 0 : i32
    return %c0_i32, %c0_i32_0 : i32, i32
  }
  func.func @transform_4(%arg0: i32) -> (i32, i32) {
    %c0_i32 = arith.constant 0 : i32
    %c0_i32_0 = arith.constant 0 : i32
    %c0_i32_1 = arith.constant 0 : i32
    return %c0_i32, %c0_i32_0 : i32, i32
  }
  func.func @transform_5(%arg0: i32) -> (i32, i32) {
    %c0_i32 = arith.constant 0 : i32
    %c0_i32_0 = arith.constant 0 : i32
    %c0_i32_1 = arith.constant 0 : i32
    return %c0_i32, %c0_i32_0 : i32, i32
  }
  func.func @transform_6(%arg0: i32) -> (i32, i32) {
    %c0_i32 = arith.constant 0 : i32
    %c0_i32_0 = arith.constant 0 : i32
    %c0_i32_1 = arith.constant 0 : i32
    return %c0_i32, %c0_i32_0 : i32, i32
  }
  func.func @transform_7(%arg0: i32) -> (i32, i32) {
    %c0_i32 = arith.constant 0 : i32
    %c0_i32_0 = arith.constant 0 : i32
    %c0_i32_1 = arith.constant 0 : i32
    return %c0_i32, %c0_i32_0 : i32, i32
  }
  func.func @transform_8(%arg0: i32) -> (i32, i32) {
    %c0_i32 = arith.constant 0 : i32
    %c0_i32_0 = arith.constant 0 : i32
    %c0_i32_1 = arith.constant 0 : i32
    return %c0_i32, %c0_i32_0 : i32, i32
  }
  func.func @transform_9(%arg0: i32) -> (i32, i32) {
    %c0_i32 = arith.constant 0 : i32
    %c0_i32_0 = arith.constant 0 : i32
    return %arg0, %c0_i32 : i32, i32
  }
}

module attributes {stable_mosaic.version = 11 : i64} {
  func.func @mlm_head_kernel(%arg0: i32, %arg1: i32, %arg2: memref<16x32xf32, #tpu.memory_space<vmem>>, %arg3: memref<16x1xi32, #tpu.memory_space<vmem>>, %arg4: memref<32x32xbf16, #tpu.memory_space<vmem>>, %arg5: memref<1x32xf32, #tpu.memory_space<vmem>>, %arg6: memref<1x32xf32, #tpu.memory_space<vmem>>, %arg7: memref<1x32xf32, #tpu.memory_space<vmem>>, %arg8: memref<32x64xbf16, #tpu.memory_space<vmem>>, %arg9: memref<1x64xf32, #tpu.memory_space<vmem>>, %arg10: memref<16x64xbf16, #tpu.memory_space<vmem>>, %arg11: memref<16x1xf32, #tpu.memory_space<vmem>>, %arg12: memref<16x1xf32, #tpu.memory_space<vmem>>, %arg13: memref<16x32xbf16, #tpu.memory_space<vmem>>, %arg14: memref<16x1xf32, #tpu.memory_space<vmem>>, %arg15: memref<16x1xf32, #tpu.memory_space<vmem>>, %arg16: memref<16x1xf32, #tpu.memory_space<vmem>>) attributes {dimension_semantics = [#tpu.dimension_semantics<parallel>, #tpu.dimension_semantics<arbitrary>], iteration_bounds = array<i64: 1, 1>, scalar_prefetch = 0 : i64, scratch_operands = 4 : i64, tpu.core_type = #tpu.core_type<tc>, window_params = [{transform_indices = @transform_0, window_bounds = array<i64: 16, 32>}, {transform_indices = @transform_1, window_bounds = array<i64: 16, 1>}, {pipeline_mode = #tpu.pipeline_mode<synchronous>, transform_indices = @transform_2, window_bounds = array<i64: 32, 32>}, {pipeline_mode = #tpu.pipeline_mode<synchronous>, transform_indices = @transform_3, window_bounds = array<i64: 1, 32>}, {pipeline_mode = #tpu.pipeline_mode<synchronous>, transform_indices = @transform_4, window_bounds = array<i64: 1, 32>}, {pipeline_mode = #tpu.pipeline_mode<synchronous>, transform_indices = @transform_5, window_bounds = array<i64: 1, 32>}, {transform_indices = @transform_6, window_bounds = array<i64: 32, 64>}, {transform_indices = @transform_7, window_bounds = array<i64: 1, 64>}, {transform_indices = @transform_8, window_bounds = array<i64: 16, 64>}, {transform_indices = @transform_9, window_bounds = array<i64: 16, 1>}, {transform_indices = @transform_10, window_bounds = array<i64: 16, 1>}]} {
    %c0_i32 = arith.constant 0 : i32
    %0 = arith.cmpi eq, %arg1, %c0_i32 : i32
    %1 = arith.extui %0 : i1 to i32
    %c0_i32_0 = arith.constant 0 : i32
    %2 = arith.cmpi ne, %1, %c0_i32_0 : i32
    scf.if %2 {
      %c0_32 = arith.constant 0 : index
      %c0_33 = arith.constant 0 : index
      %49 = vector.load %arg2[%c0_32, %c0_33] : memref<16x32xf32, #tpu.memory_space<vmem>>, vector<16x32xf32>
      %c0_34 = arith.constant 0 : index
      %c0_35 = arith.constant 0 : index
      %50 = vector.load %arg4[%c0_34, %c0_35] : memref<32x32xbf16, #tpu.memory_space<vmem>>, vector<32x32xbf16>
      %51 = arith.truncf %49 : vector<16x32xf32> to vector<16x32xbf16>
      %cst_36 = arith.constant dense<0.000000e+00> : vector<16x32xf32>
      %52 = tpu.matmul %51, %50, %cst_36 {dimension_numbers = #tpu.dot_dimension_numbers<[1], [0], [0], [1], [0, 0, 1, 1], [], []>} : vector<16x32xbf16>, vector<32x32xbf16>, vector<16x32xf32> -> vector<16x32xf32>
      %c0_37 = arith.constant 0 : index
      %c0_38 = arith.constant 0 : index
      %53 = vector.load %arg5[%c0_37, %c0_38] : memref<1x32xf32, #tpu.memory_space<vmem>>, vector<1x32xf32>
      %54 = vector.broadcast %53 : vector<1x32xf32> to vector<16x32xf32>
      %55 = arith.addf %52, %54 : vector<16x32xf32>
      %cst_39 = arith.constant 5.000000e-01 : f32
      %56 = vector.broadcast %cst_39 : f32 to vector<16x32xf32>
      %57 = arith.mulf %56, %55 : vector<16x32xf32>
      %cst_40 = arith.constant 2.000000e+00 : f32
      %58 = math.sqrt %cst_40 : f32
      %cst_41 = arith.constant 1.000000e+00 : f32
      %59 = arith.divf %cst_41, %58 : f32
      %60 = vector.broadcast %59 : f32 to vector<16x32xf32>
      %61 = arith.mulf %55, %60 : vector<16x32xf32>
      %62 = math.erf %61 : vector<16x32xf32>
      %cst_42 = arith.constant 1.000000e+00 : f32
      %63 = vector.broadcast %cst_42 : f32 to vector<16x32xf32>
      %64 = arith.addf %63, %62 : vector<16x32xf32>
      %65 = arith.mulf %57, %64 : vector<16x32xf32>
      %c0_43 = arith.constant 0 : index
      %c0_44 = arith.constant 0 : index
      %66 = vector.load %arg6[%c0_43, %c0_44] : memref<1x32xf32, #tpu.memory_space<vmem>>, vector<1x32xf32>
      %c0_45 = arith.constant 0 : index
      %c0_46 = arith.constant 0 : index
      %67 = vector.load %arg7[%c0_45, %c0_46] : memref<1x32xf32, #tpu.memory_space<vmem>>, vector<1x32xf32>
      %cst_47 = arith.constant dense<0.000000e+00> : vector<16xf32>
      %68 = vector.multi_reduction <add>, %65, %cst_47 [1] : vector<16x32xf32> to vector<16xf32>
      %69 = vector.shape_cast %68 : vector<16xf32> to vector<16x1xf32>
      %cst_48 = arith.constant 3.200000e+01 : f32
      %70 = vector.broadcast %cst_48 : f32 to vector<16x1xf32>
      %71 = arith.divf %69, %70 : vector<16x1xf32>
      %72 = vector.broadcast %71 : vector<16x1xf32> to vector<16x32xf32>
      %73 = arith.subf %65, %72 : vector<16x32xf32>
      %74 = arith.mulf %73, %73 : vector<16x32xf32>
      %cst_49 = arith.constant dense<0.000000e+00> : vector<16xf32>
      %75 = vector.multi_reduction <add>, %74, %cst_49 [1] : vector<16x32xf32> to vector<16xf32>
      %76 = vector.shape_cast %75 : vector<16xf32> to vector<16x1xf32>
      %cst_50 = arith.constant 3.200000e+01 : f32
      %77 = vector.broadcast %cst_50 : f32 to vector<16x1xf32>
      %78 = arith.divf %76, %77 : vector<16x1xf32>
      %79 = vector.broadcast %71 : vector<16x1xf32> to vector<16x32xf32>
      %80 = arith.subf %65, %79 : vector<16x32xf32>
      %cst_51 = arith.constant 9.99999996E-13 : f32
      %81 = vector.broadcast %cst_51 : f32 to vector<16x1xf32>
      %82 = arith.addf %78, %81 : vector<16x1xf32>
      %83 = math.rsqrt %82 : vector<16x1xf32>
      %84 = vector.broadcast %83 : vector<16x1xf32> to vector<16x32xf32>
      %85 = arith.mulf %80, %84 : vector<16x32xf32>
      %86 = vector.broadcast %66 : vector<1x32xf32> to vector<16x32xf32>
      %87 = arith.mulf %85, %86 : vector<16x32xf32>
      %88 = vector.broadcast %67 : vector<1x32xf32> to vector<16x32xf32>
      %89 = arith.addf %87, %88 : vector<16x32xf32>
      %90 = arith.truncf %89 : vector<16x32xf32> to vector<16x32xbf16>
      %c0_52 = arith.constant 0 : index
      %c0_53 = arith.constant 0 : index
      %91 = vector.load %arg13[%c0_52, %c0_53] : memref<16x32xbf16, #tpu.memory_space<vmem>>, vector<16x32xbf16>
      tpu.vector_store %arg13[%c0_52, %c0_53], %90 {strides = array<i32>} : memref<16x32xbf16, #tpu.memory_space<vmem>>, vector<16x32xbf16>,
      %cst_54 = arith.constant -1.000000e+30 : f32
      %92 = vector.broadcast %cst_54 : f32 to vector<16x1xf32>
      %c0_55 = arith.constant 0 : index
      %c0_56 = arith.constant 0 : index
      %93 = vector.load %arg14[%c0_55, %c0_56] : memref<16x1xf32, #tpu.memory_space<vmem>>, vector<16x1xf32>
      tpu.vector_store %arg14[%c0_55, %c0_56], %92 {strides = array<i32>} : memref<16x1xf32, #tpu.memory_space<vmem>>, vector<16x1xf32>,
      %cst_57 = arith.constant 0.000000e+00 : f32
      %94 = vector.broadcast %cst_57 : f32 to vector<16x1xf32>
      %c0_58 = arith.constant 0 : index
      %c0_59 = arith.constant 0 : index
      %95 = vector.load %arg15[%c0_58, %c0_59] : memref<16x1xf32, #tpu.memory_space<vmem>>, vector<16x1xf32>
      tpu.vector_store %arg15[%c0_58, %c0_59], %94 {strides = array<i32>} : memref<16x1xf32, #tpu.memory_space<vmem>>, vector<16x1xf32>,
      %cst_60 = arith.constant 0.000000e+00 : f32
      %96 = vector.broadcast %cst_60 : f32 to vector<16x1xf32>
      %c0_61 = arith.constant 0 : index
      %c0_62 = arith.constant 0 : index
      %97 = vector.load %arg16[%c0_61, %c0_62] : memref<16x1xf32, #tpu.memory_space<vmem>>, vector<16x1xf32>
      tpu.vector_store %arg16[%c0_61, %c0_62], %96 {strides = array<i32>} : memref<16x1xf32, #tpu.memory_space<vmem>>, vector<16x1xf32>,
    } else {
    }
    %c0 = arith.constant 0 : index
    %c0_1 = arith.constant 0 : index
    %3 = vector.load %arg8[%c0, %c0_1] : memref<32x64xbf16, #tpu.memory_space<vmem>>, vector<32x64xbf16>
    %c0_2 = arith.constant 0 : index
    %c0_3 = arith.constant 0 : index
    %4 = vector.load %arg13[%c0_2, %c0_3] : memref<16x32xbf16, #tpu.memory_space<vmem>>, vector<16x32xbf16>
    %cst = arith.constant dense<0.000000e+00> : vector<16x64xf32>
    %5 = tpu.matmul %4, %3, %cst {dimension_numbers = #tpu.dot_dimension_numbers<[1], [0], [0], [1], [0, 0, 1, 1], [], []>} : vector<16x32xbf16>, vector<32x64xbf16>, vector<16x64xf32> -> vector<16x64xf32>
    %c0_4 = arith.constant 0 : index
    %c0_5 = arith.constant 0 : index
    %6 = vector.load %arg9[%c0_4, %c0_5] : memref<1x64xf32, #tpu.memory_space<vmem>>, vector<1x64xf32>
    %7 = vector.broadcast %6 : vector<1x64xf32> to vector<16x64xf32>
    %8 = arith.addf %5, %7 : vector<16x64xf32>
    %9 = arith.truncf %8 : vector<16x64xf32> to vector<16x64xbf16>
    %c0_6 = arith.constant 0 : index
    %c0_7 = arith.constant 0 : index
    %10 = vector.load %arg10[%c0_6, %c0_7] : memref<16x64xbf16, #tpu.memory_space<vmem>>, vector<16x64xbf16>
    tpu.vector_store %arg10[%c0_6, %c0_7], %9 {strides = array<i32>} : memref<16x64xbf16, #tpu.memory_space<vmem>>, vector<16x64xbf16>,
    %c64_i32 = arith.constant 64 : i32
    %11 = arith.muli %arg1, %c64_i32 : i32
    %12 = tpu.iota {dimensions = array<i32: 1>} : vector<16x64xi32>
    %13 = vector.broadcast %11 : i32 to vector<16x64xi32>
    %14 = arith.addi %13, %12 : vector<16x64xi32>
    %c64_i32_8 = arith.constant 64 : i32
    %15 = vector.broadcast %c64_i32_8 : i32 to vector<16x64xi32>
    %16 = arith.cmpi slt, %14, %15 : vector<16x64xi32>
    %cst_9 = arith.constant -1.000000e+30 : f32
    %17 = vector.broadcast %cst_9 : f32 to vector<16x64xf32>
    %18 = arith.select %16, %8, %17 : vector<16x64xi1>, vector<16x64xf32>
    %cst_10 = arith.constant dense<0xFF800000> : vector<16xf32>
    %19 = vector.multi_reduction <maximumf>, %18, %cst_10 [1] : vector<16x64xf32> to vector<16xf32>
    %20 = vector.shape_cast %19 : vector<16xf32> to vector<16x1xf32>
    %c0_11 = arith.constant 0 : index
    %c0_12 = arith.constant 0 : index
    %21 = vector.load %arg14[%c0_11, %c0_12] : memref<16x1xf32, #tpu.memory_space<vmem>>, vector<16x1xf32>
    %22 = arith.maximumf %21, %20 : vector<16x1xf32>
    %c0_13 = arith.constant 0 : index
    %c0_14 = arith.constant 0 : index
    %23 = vector.load %arg15[%c0_13, %c0_14] : memref<16x1xf32, #tpu.memory_space<vmem>>, vector<16x1xf32>
    %c0_15 = arith.constant 0 : index
    %c0_16 = arith.constant 0 : index
    %24 = vector.load %arg14[%c0_15, %c0_16] : memref<16x1xf32, #tpu.memory_space<vmem>>, vector<16x1xf32>
    %25 = arith.subf %24, %22 : vector<16x1xf32>
    %26 = math.exp %25 : vector<16x1xf32>
    %27 = arith.mulf %23, %26 : vector<16x1xf32>
    %28 = vector.broadcast %22 : vector<16x1xf32> to vector<16x64xf32>
    %29 = arith.subf %18, %28 : vector<16x64xf32>
    %30 = math.exp %29 : vector<16x64xf32>
    %cst_17 = arith.constant dense<0.000000e+00> : vector<16xf32>
    %31 = vector.multi_reduction <add>, %30, %cst_17 [1] : vector<16x64xf32> to vector<16xf32>
    %32 = vector.shape_cast %31 : vector<16xf32> to vector<16x1xf32>
    %33 = arith.addf %27, %32 : vector<16x1xf32>
    %c0_18 = arith.constant 0 : index
    %c0_19 = arith.constant 0 : index
    %34 = vector.load %arg15[%c0_18, %c0_19] : memref<16x1xf32, #tpu.memory_space<vmem>>, vector<16x1xf32>
    tpu.vector_store %arg15[%c0_18, %c0_19], %33 {strides = array<i32>} : memref<16x1xf32, #tpu.memory_space<vmem>>, vector<16x1xf32>,
    %c0_20 = arith.constant 0 : index
    %c0_21 = arith.constant 0 : index
    %35 = vector.load %arg14[%c0_20, %c0_21] : memref<16x1xf32, #tpu.memory_space<vmem>>, vector<16x1xf32>
    tpu.vector_store %arg14[%c0_20, %c0_21], %22 {strides = array<i32>} : memref<16x1xf32, #tpu.memory_space<vmem>>, vector<16x1xf32>,
    %c0_22 = arith.constant 0 : index
    %c0_23 = arith.constant 0 : index
    %36 = vector.load %arg3[%c0_22, %c0_23] : memref<16x1xi32, #tpu.memory_space<vmem>>, vector<16x1xi32>
    %37 = vector.broadcast %36 : vector<16x1xi32> to vector<16x64xi32>
    %38 = arith.cmpi eq, %14, %37 : vector<16x64xi32>
    %c0_24 = arith.constant 0 : index
    %c0_25 = arith.constant 0 : index
    %39 = vector.load %arg16[%c0_24, %c0_25] : memref<16x1xf32, #tpu.memory_space<vmem>>, vector<16x1xf32>
    %cst_26 = arith.constant 0.000000e+00 : f32
    %40 = vector.broadcast %cst_26 : f32 to vector<16x64xf32>
    %41 = arith.select %38, %8, %40 : vector<16x64xi1>, vector<16x64xf32>
    %cst_27 = arith.constant dense<0.000000e+00> : vector<16xf32>
    %42 = vector.multi_reduction <add>, %41, %cst_27 [1] : vector<16x64xf32> to vector<16xf32>
    %43 = vector.shape_cast %42 : vector<16xf32> to vector<16x1xf32>
    %44 = arith.addf %39, %43 : vector<16x1xf32>
    %c0_28 = arith.constant 0 : index
    %c0_29 = arith.constant 0 : index
    %45 = vector.load %arg16[%c0_28, %c0_29] : memref<16x1xf32, #tpu.memory_space<vmem>>, vector<16x1xf32>
    tpu.vector_store %arg16[%c0_28, %c0_29], %44 {strides = array<i32>} : memref<16x1xf32, #tpu.memory_space<vmem>>, vector<16x1xf32>,
    %c0_i32_30 = arith.constant 0 : i32
    %46 = arith.cmpi eq, %arg1, %c0_i32_30 : i32
    %47 = arith.extui %46 : i1 to i32
    %c0_i32_31 = arith.constant 0 : i32
    %48 = arith.cmpi ne, %47, %c0_i32_31 : i32
    scf.if %48 {
      %c0_32 = arith.constant 0 : index
      %c0_33 = arith.constant 0 : index
      %49 = vector.load %arg14[%c0_32, %c0_33] : memref<16x1xf32, #tpu.memory_space<vmem>>, vector<16x1xf32>
      %c0_34 = arith.constant 0 : index
      %c0_35 = arith.constant 0 : index
      %50 = vector.load %arg15[%c0_34, %c0_35] : memref<16x1xf32, #tpu.memory_space<vmem>>, vector<16x1xf32>
      %51 = math.log %50 : vector<16x1xf32>
      %52 = arith.addf %49, %51 : vector<16x1xf32>
      %c0_36 = arith.constant 0 : index
      %c0_37 = arith.constant 0 : index
      %53 = vector.load %arg11[%c0_36, %c0_37] : memref<16x1xf32, #tpu.memory_space<vmem>>, vector<16x1xf32>
      tpu.vector_store %arg11[%c0_36, %c0_37], %52 {strides = array<i32>} : memref<16x1xf32, #tpu.memory_space<vmem>>, vector<16x1xf32>,
      %c0_38 = arith.constant 0 : index
      %c0_39 = arith.constant 0 : index
      %54 = vector.load %arg16[%c0_38, %c0_39] : memref<16x1xf32, #tpu.memory_space<vmem>>, vector<16x1xf32>
      %c0_40 = arith.constant 0 : index
      %c0_41 = arith.constant 0 : index
      %55 = vector.load %arg12[%c0_40, %c0_41] : memref<16x1xf32, #tpu.memory_space<vmem>>, vector<16x1xf32>
      tpu.vector_store %arg12[%c0_40, %c0_41], %54 {strides = array<i32>} : memref<16x1xf32, #tpu.memory_space<vmem>>, vector<16x1xf32>,
    } else {
    }
    return
  }
  func.func @transform_0(%arg0: i32, %arg1: i32) -> (i32, i32) {
    %c0_i32 = arith.constant 0 : i32
    %c0_i32_0 = arith.constant 0 : i32
    return %arg0, %c0_i32 : i32, i32
  }
  func.func @transform_1(%arg0: i32, %arg1: i32) -> (i32, i32) {
    %c0_i32 = arith.constant 0 : i32
    %c0_i32_0 = arith.constant 0 : i32
    return %arg0, %c0_i32 : i32, i32
  }
  func.func @transform_2(%arg0: i32, %arg1: i32) -> (i32, i32) {
    %c0_i32 = arith.constant 0 : i32
    %c0_i32_0 = arith.constant 0 : i32
    %c0_i32_1 = arith.constant 0 : i32
    return %c0_i32, %c0_i32_0 : i32, i32
  }
  func.func @transform_3(%arg0: i32, %arg1: i32) -> (i32, i32) {
    %c0_i32 = arith.constant 0 : i32
    %c0_i32_0 = arith.constant 0 : i32
    %c0_i32_1 = arith.constant 0 : i32
    return %c0_i32, %c0_i32_0 : i32, i32
  }
  func.func @transform_4(%arg0: i32, %arg1: i32) -> (i32, i32) {
    %c0_i32 = arith.constant 0 : i32
    %c0_i32_0 = arith.constant 0 : i32
    %c0_i32_1 = arith.constant 0 : i32
    return %c0_i32, %c0_i32_0 : i32, i32
  }
  func.func @transform_5(%arg0: i32, %arg1: i32) -> (i32, i32) {
    %c0_i32 = arith.constant 0 : i32
    %c0_i32_0 = arith.constant 0 : i32
    %c0_i32_1 = arith.constant 0 : i32
    return %c0_i32, %c0_i32_0 : i32, i32
  }
  func.func @transform_6(%arg0: i32, %arg1: i32) -> (i32, i32) {
    %c0_i32 = arith.constant 0 : i32
    %c0_i32_0 = arith.constant 0 : i32
    return %c0_i32, %arg1 : i32, i32
  }
  func.func @transform_7(%arg0: i32, %arg1: i32) -> (i32, i32) {
    %c0_i32 = arith.constant 0 : i32
    %c0_i32_0 = arith.constant 0 : i32
    return %c0_i32, %arg1 : i32, i32
  }
  func.func @transform_8(%arg0: i32, %arg1: i32) -> (i32, i32) {
    %c0_i32 = arith.constant 0 : i32
    return %arg0, %arg1 : i32, i32
  }
  func.func @transform_9(%arg0: i32, %arg1: i32) -> (i32, i32) {
    %c0_i32 = arith.constant 0 : i32
    %c0_i32_0 = arith.constant 0 : i32
    return %arg0, %c0_i32 : i32, i32
  }
  func.func @transform_10(%arg0: i32, %arg1: i32) -> (i32, i32) {
    %c0_i32 = arith.constant 0 : i32
    %c0_i32_0 = arith.constant 0 : i32
    return %arg0, %c0_i32 : i32, i32
  }
}

</mosaic_0001>

<bundles_post_ra>
// kernel: tpu_custom_call.1
= control target key start
LH: loop header
LB: loop body
LE: loop exit
PB: predicated region body
PF: predicated region fallthrough
CT: control target
= control target key end

     0   :  { %7 = vsyncpa [#allocation3], 0  ;;  %s591_s0 = inlined_call_operand.hbm [shape: f32[16,128], index: 0, kind: input, shape index: {}]   ;;  %s592_s1 = inlined_call_operand.vmem [shape: f32[1,128], index: 1, kind: input, shape index: {}]   ;;  %s593_s2 = inlined_call_operand.hbm [shape: f32[16,128], index: 2, kind: output, shape index: {}]  }
   0x1   :  { %9 = vsyncpa [#allocation3 + $0x1], 0 }
   0x2   :  { %10 = vsyncpa [#allocation4], 0 }
   0x3   :  { %12 = vsyncpa [#allocation4 + $0x1], 0  ;;  %s427_s9 = smov 0   ;;  %s429_s10 = smov 0  }
   0x4   :  { %s431_s11 = smov 0   ;;  %s433_s12 = smov 0  }
   0x5 LB: > { %s448_s13 = sadd.s32 4294967295, %s408_s12   ;;  %s253_s14 = sadd.s32 4294967294, %s408_s12   ;;  %s408_s12 = sphi %s433_s12, %s608_s12   ;;  %s404_s11 = sphi %s431_s11, %s607_s11   ;;  %s400_s10 = sphi %s429_s10, %s606_s10   ;;  %s396_s9 = sphi %s427_s9, %s605_s9  }
   0x6   : > { %s452_s15 = sadd.s32 1, %s408_s12   ;;  %s25_s16 = sadd.s32 1, %s404_s11 }
   0x7   : > { %s22_s17 = ssub.s32 %s408_s12, %s452_s15  ;;  %p32_p0 = scmp.ne.s32.totalorder %s404_s11, %s400_s10 }
   0x8   : > { %p23_p1 = scmp.eq.s32.totalorder %s22_s17, 0  ;;  %p33_p2 = scmp.eq.s32.totalorder %s408_s12, 0 }
   0x9   : > { %p38_p3 = scmp.ne.s32.totalorder %s400_s10, %s396_s9  ;;  %p39_p4 = scmp.eq.s32.totalorder %s448_s13, 0 }
   0xa   : > { %s464_s18 = scalar_select %p23_p1, %s404_s11, %s25_s16  }
   0xb   : > { %p466_p5 = por %p33_p2, %p32_p0  ;;  %p470_p6 = por %p39_p4, %p38_p3 }
   0xc   : > { %p83_p7 = scmp.eq.s32.totalorder %s448_s13, 1  ;;  %p89_p8 = scmp.eq.s32.totalorder %s253_s14, 1 }
   0xd   : > { %p278_p10 = scmp.lt.s32.totalorder %s408_s12, 2  ;;  %s112_s23 = sand.u32 1, %s404_s11  }
   0xe   : > { %p477_p11 = por %p83_p7, %p32_p0  ;;  %p481_p12 = por %p89_p8, %p38_p3 }
   0xf   : > { %s257_s24 = sshll.u32 %s408_s12, 7  ;;  %s256_s25 = sshll.u32 %s112_s23, 3 }
  0x10   : > { %s597_s21 = scalar_select %p477_p11, 1, 0 }
  0x11   : > { %s598_s22 = scalar_select %p481_p12, 1, 0 }
  0x12   : > { %s490_s28 = scalar_lea.hbm %s591_s0, %s257_s24  ;;  %s116_s29 = scalar_lea.vmem [#allocation2], %s256_s25 }
  0x13   : > { %s123_s30 = sshll.u32 %s116_s29, 4  ;;  %p494_p13 = pnand %p278_p10, %p466_p5  ;;  %s498_s30 = int_to_ptr.vmem [resolvable:$true] %s123_s30 }
  0x14   : > { %s113_s4 = scalar_lea.sflag [#allocation3], %s112_s23  ;;  %s312_s5 = scalar_lea.hbm %s490_s28, 128 }
  0x15   : > { %p313_p2 = scmp.ne.s32.totalorder %s490_s28, %s312_s5  ;;  %p314_p3 = pneg %p494_p13 }
  0x16   : > { %s317_s8 = scalar_lea.hbm %s591_s0, 256  ;;  %p318_p5 = scmp.lt.u32.totalorder %s490_s28, %s591_s0 }
  0x17   : > { %p315_p4 = pnand %p314_p3, %p313_p2  ;;  %p319_p8 = scmp.lt.u32.totalorder %s317_s8, %s312_s5 }
  0x18   : > { %p321_p9 = scmp.lt.u32.totalorder %s312_s5, %s490_s28 }
  0x19   : > { %p316_p7 = pneg %p315_p4  ;;  %p320_p10 = por %p319_p8, %p318_p5 }
  0x1b   : > { %p322_p0 = por %p321_p9, %p320_p10 }
  0x1d   : > { %p323_p1 = pnand %p322_p0, %p316_p7 }
  0x1f   : > { %326 = shalt.err (!%p323_p1)
}
  0x20   : > { %s327_s17 = scalar_lea.vmem %s498_s30, 128  ;;  %s410_s19 = smov [#allocation2]  }
  0x21   : > { %p328_p2 = scmp.ne.s32.totalorder %s498_s30, %s327_s17  ;;  %s332_s23 = sshll.u32 %s410_s19, 4  ;;  %s333_s23 = int_to_ptr.vmem [resolvable:$false] %s332_s23 }
  0x22   : > { %s334_s24 = scalar_lea.vmem %s333_s23, 256  ;;  %p335_p11 = scmp.lt.s32.totalorder %s498_s30, %s333_s23 }
  0x23   : > { %p330_p4 = pnand %p328_p2, %p314_p3  ;;  %p336_p5 = scmp.lt.s32.totalorder %s334_s24, %s327_s17 }
  0x25   : > { %p331_p12 = pneg %p330_p4  ;;  %p337_p8 = por %p336_p5, %p335_p11 }
  0x27   : > { %p338_p9 = pnand %p337_p8, %p331_p12 }
  0x29   : > { %341 = shalt.err (!%p338_p9)
}
  0x2a   : > { %273 = dma.hbm_to_vmem [thread:$0]  (!%p494_p13), %s490_s28, 128, %s498_s30, %s113_s4  }
  0x2b   : > { %p600_p0 = scmp.lt.s32.totalorder %s408_s12, 3  ;;  %p601_p1 = scmp.ge.s32.totalorder %s408_s12, 1 }
  0x2d   : > { %p129_p3 = pnand %p601_p1, %p600_p0 }
  0x2e   : > { %s532_s25 = sand.u32 (!%p129_p3), 1, %s400_s10  }
  0x2f   : > { %132 = sbr.rel (%p129_p3) target bundleno = 81 (0x51), region = 28  ;;  %s259_s26 = sshll.u32 (!%p129_p3), %s532_s25, 3 }
  0x30   : > { %s135_s27 = scalar_lea.sflag (!%p129_p3), [#allocation3], %s532_s25  ;;  %s138_s29 = scalar_lea.vmem (!%p129_p3), [#allocation2], %s259_s26 }
  0x36   : > { %387 = dma.done.wait (%p470_p6), %s135_s27, 128  }
  0x37   : > { %389 = vsyncadd (%p470_p6), %s135_s27, 4294967168  ;;  %s158_s28 = scalar_lea.vmem [#allocation5], %s259_s26  ;;  %s263_s3 = sshll.u32 %s448_s13, 7  ;;  %v159_v0 = vld [vmem:[%s138_s29] sm:$0xff] }
  0x38   : > { %s183_s30 = sshll.u32 %s158_s28, 4  ;;  %v261_v1 = vld [vmem:[%s592_s1] ss:$0 sm:$0xff]  ;;  %s549_s20 = scalar_lea.hbm %s593_s2, %s263_s3  ;;  %s544_s30 = int_to_ptr.vmem [resolvable:$true] %s183_s30 }
  0x39   : > { %v167_v2 = vadd.f32 %v261_v1, %v159_v0  ;;  %s170_s8 = scalar_lea.sflag [#allocation4], %s532_s25  ;;  %s342_s14 = scalar_lea.vmem %s544_s30, 128 }
  0x3a   : > { %p343_p6 = scmp.ne.s32.totalorder %s544_s30, %s342_s14  ;;  %p602_p11 = scmp.ne.s32.totalorder %s597_s21, 0 }
  0x3b   : > { %168 = vst [vmem:[%s158_s28] sm:$0xff] %v167_v2  ;;  %s411_s13 = smov [#allocation5]  }
  0x3c   : > { %p344_p12 = pnand %p343_p6, %p602_p11  ;;  %s346_s16 = sshll.u32 %s411_s13, 4  ;;  %s347_s16 = int_to_ptr.vmem [resolvable:$false] %s346_s16 }
  0x3d   : > { %s348_s17 = scalar_lea.vmem %s347_s16, 256  ;;  %p349_p7 = scmp.lt.s32.totalorder %s544_s30, %s347_s16 }
  0x3e   : > { %p345_p13 = pneg %p344_p12  ;;  %p350_p10 = scmp.lt.s32.totalorder %s348_s17, %s342_s14 }
  0x40   : > { %p351_p2 = por %p350_p10, %p349_p7 }
  0x42   : > { %p352_p4 = pnand %p351_p2, %p345_p13 }
  0x44   : > { %355 = shalt.err (!%p352_p4)
}
  0x45   : > { %s356_s19 = scalar_lea.hbm %s549_s20, 128  ;;  %s360_s25 = scalar_lea.hbm %s593_s2, 256 }
  0x46   : > { %p357_p5 = scmp.ne.s32.totalorder %s549_s20, %s356_s19  ;;  %p361_p0 = scmp.lt.u32.totalorder %s549_s20, %s593_s2 }
  0x47   : > { %p362_p1 = scmp.lt.u32.totalorder %s360_s25, %s356_s19  ;;  %p364_p6 = scmp.lt.u32.totalorder %s356_s19, %s549_s20 }
  0x48   : > { %p358_p8 = pnand %p357_p5, %p602_p11 }
  0x49   : > { %p363_p3 = por %p362_p1, %p361_p0 }
  0x4a   : > { %p359_p9 = pneg %p358_p8 }
  0x4b   : > { %p365_p12 = por %p364_p6, %p363_p3 }
  0x4d   : > { %p366_p13 = pnand %p365_p12, %p359_p9 }
  0x4f   : > { %369 = shalt.err (!%p366_p13)
}
  0x50   : > { %268 = dma.vmem_to_hbm [thread:$0]  (%p602_p11), %s544_s30, 128, %s549_s20, %s170_s8  }
  0x51 PF: > { %s195_s29 = sand.u32 1, %s396_s9   ;;  %p603_p7 = scmp.ne.s32.totalorder %s598_s22, 0 }
  0x52   : > { %p604_p10 = scmp.ge.s32.totalorder %s408_s12, 2  ;;  %s196_s28 = scalar_lea.sflag [#allocation4], %s195_s29 }
  0x54   : > { %p275_p2 = pnand %p604_p10, %p603_p7 }
  0x56   : > { %391 = dma.done.wait (!%p275_p2), %s196_s28, 128  }
  0x57   : > { %393 = vsyncadd (!%p275_p2), %s196_s28, 4294967168  ;;  %p15_p4 = scmp.ge.s32.totalorder %s452_s15, 4   ;;  %s605_s9 = smov %s400_s10 }
  0x58   : > { %s606_s10 = smov %s404_s11  ;;  %s607_s11 = smov %s464_s18 }
  0x59   : > { %s608_s12 = smov %s452_s15  ;;  %17 = sbr.rel (!%p15_p4) target bundleno = 5 (0x5), region = 73 }
  0x60   :  { %201 = vsyncpa [#allocation3], 1 }
  0x61   :  { %203 = vsyncpa [#allocation3 + $0x1], 1 }
  0x62   :  { %204 = vsyncpa [#allocation4], 1 }
  0x63   :  { %206 = vsyncpa [#allocation4 + $0x1], 1 }

// kernel: bertformer_forward.8
= control target key start
LH: loop header
LB: loop body
LE: loop exit
PB: predicated region body
PF: predicated region fallthrough
CT: control target
= control target key end

     0   :  { %vm18_vm0 = vcmask 261120   ;;  %s118_s0 = inlined_call_operand.vmem [shape: f32[16,32], index: 0, kind: input, shape index: {}]   ;;  %s119_s1 = inlined_call_operand.vmem [shape: f32[1,32], index: 1, kind: input, shape index: {}]   ;;  %s120_s2 = inlined_call_operand.vmem [shape: f32[1,32], index: 2, kind: input, shape index: {}]   ;;  %s121_s3 = inlined_call_operand.vmem [shape: f32[16,32], index: 3, kind: output, shape index: {}]  }
   0x1   :  { %v14_v0 = vld [vmem:[%s118_s0] sm:$0xff]  ;;  %v15_v1 = vld [vmem:[%s118_s0 + $0x8] sm:$0xff] }
   0x2   :  { %v19_v2 = vsel %vm18_vm0, %v14_v0, 0.0  ;;  %v22_v3 = vsel %vm18_vm0, %v15_v1, 0.0  ;;  %v68_v21 = vld [vmem:[%s119_s1] ss:$0 sm:$0xff] }
   0x3   :  { %20 = vadd.xlane.f32.xlu0 %v19_v2  ;;  %v69_v23 = vld [vmem:[%s120_s2] ss:$0 sm:$0xff] }
   0x7   :  { %23 = vadd.xlane.f32.xlu0 %v22_v3 }
  0x90   :  { %v21_v4 = vpop.xlane.xlu0 %20 }
  0x91   :  { %v26_v5 = vmul.f32 0.03125, %v21_v4 }
  0x93   :  { %v28_v6 = vsub.f32 %v14_v0, %v26_v5 }
  0x94   :  { %v24_v7 = vpop.xlane.xlu0 %23 }
  0x95   :  { %v27_v8 = vmul.f32 0.03125, %v24_v7  ;;  %v30_v9 = vmul.f32 %v28_v6, %v28_v6 }
  0x97   :  { %v29_v10 = vsub.f32 %v15_v1, %v27_v8  ;;  %v32_v11 = vsel %vm18_vm0, %v30_v9, 0.0 }
  0x98   :  { %33 = vadd.xlane.f32.xlu1 %v32_v11 }
  0x99   :  { %v31_v12 = vmul.f32 %v29_v10, %v29_v10 }
  0x9b   :  { %v35_v13 = vsel %vm18_vm0, %v31_v12, 0.0 }
  0x9c   :  { %36 = vadd.xlane.f32.xlu1 %v35_v13 }
 0x125   :  { %v34_v14 = vpop.xlane.xlu1 %33 }
 0x126   :  { %v38_v15 = vmul.f32 0.03125, %v34_v14 }
 0x128   :  { %v40_v16 = vadd.f32 1e-05, %v38_v15 }
 0x129   :  { %v37_v17 = vpop.xlane.xlu1 %36 }
 0x12a   :  { %70 = vrsqrt.f32 %v40_v16  ;;  %v39_v18 = vmul.f32 0.03125, %v37_v17 }
 0x12c   :  { %v41_v19 = vadd.f32 1e-05, %v39_v18 }
 0x12e   :  { %72 = vrsqrt.f32 %v41_v19 }
 0x134   :  { %v71_v20 = vpop.eup %70 }
 0x135   :  { %v44_v22 = vmul.f32 %v71_v20, %v28_v6 }
 0x137   :  { %v52_v24 = vmul.f32 %v68_v21, %v44_v22 }
 0x138   :  { %v73_v25 = vpop.eup %72 }
 0x139   :  { %v60_v26 = vadd.f32 %v69_v23, %v52_v24  ;;  %v45_v27 = vmul.f32 %v73_v25, %v29_v10 }
 0x13b   :  { %62 = vst.msk [vmem:[%s121_s3] sm:$0xff] %vm18_vm0, %v60_v26  ;;  %v53_v28 = vmul.f32 %v68_v21, %v45_v27 }
 0x13d   :  { %v61_v29 = vadd.f32 %v69_v23, %v53_v28 }
 0x13f   :  { %63 = vst.msk [vmem:[%s121_s3 + $0x8] sm:$0xff] %vm18_vm0, %v61_v29 }

// kernel: bertformer_forward.9
= control target key start
LH: loop header
LB: loop body
LE: loop exit
PB: predicated region body
PF: predicated region fallthrough
CT: control target
= control target key end

     0   :  { %vm31_vm0 = vcmask 261120   ;;  %v361_v15 = vmov 0.0   ;;  %vm362_vm1 = vmmov 0   ;;  %s474_s0 = inlined_call_operand.vmem [shape: f32[16,32], index: 0, kind: input, shape index: {}]   ;;  %s475_s3 = inlined_call_operand.vmem [shape: bf16[32,128], index: 3, kind: input, shape index: {}]   ;;  %s476_s1 = inlined_call_operand.vmem [shape: f32[1,32], index: 1, kind: input, shape index: {}]   ;;  %s477_s2 = inlined_call_operand.vmem [shape: f32[1,32], index: 2, kind: input, shape index: {}]   ;;  %s478_s5 = inlined_call_operand.vmem [shape: bf16[128,32], index: 5, kind: input, shape index: {}]   ;;  %s479_s4 = inlined_call_operand.vmem [shape: f32[1,128], index: 4, kind: input, shape index: {}]   ;;  %s480_s6 = inlined_call_operand.vmem [shape: f32[1,32], index: 6, kind: input, shape index: {}]   ;;  %s481_s7 = inlined_call_operand.vmem [shape: f32[16,32], index: 7, kind: output, shape index: {}]  }
   0x1   :  { %v406_v0 = vld [vmem:[%s474_s0] sm:$0xff]  ;;  %v411_v1 = vld [vmem:[%s474_s0 + $0x8] sm:$0xff]  ;;  %309 = vmatprep.subr.bf16.mxu0 %v361_v15  ;;  %317 = vmatprep.subr.bf16.mxu1 %v361_v15  ;;  %v343_v36 = vld [vmem:[%s478_s5 + $0x10] sm:$0xff]  }
   0x2   :  { %v32_v2 = vsel %vm31_vm0, %v406_v0, 0.0  ;;  %v35_v3 = vsel %vm31_vm0, %v411_v1, 0.0  ;;  %v339_v14 = vld [vmem:[%s475_s3] sm:$0xff]   ;;  %v340_v16 = vld [vmem:[%s475_s3 + $0x8] sm:$0xff]   ;;  %313 = vmatprep.mubr.msk.bf16.mxu0 %vm362_vm1, %v361_v15  ;;  %333 = vmatprep.mubr.msk.bf16.mxu1 %vm362_vm1, %v361_v15  ;;  %v344_v37 = vld [vmem:[%s478_s5 + $0x18] sm:$0xff]  }
   0x3   :  { %33 = vadd.xlane.f32.xlu0 %v32_v2  ;;  %310 = vmatpush3.bf16.msra.mxu0 %v339_v14  ;;  %v280_v25 = vld [vmem:[%s476_s1] ss:$0 sm:$0xff]  ;;  %v342_v35 = vld [vmem:[%s478_s5 + $0x8] sm:$0xff]   ;;  %v347_v40 = vld [vmem:[%s478_s5 + $0x30] sm:$0xff]  }
   0x4   :  { %311 = vmatprep.subr.bf16.mxu0 %v361_v15  ;;  %v281_v29 = vld [vmem:[%s477_s2] ss:$0 sm:$0xff]  ;;  %v346_v39 = vld [vmem:[%s478_s5 + $0x28] sm:$0xff]   ;;  %v348_v41 = vld [vmem:[%s478_s5 + $0x38] sm:$0xff]  }
   0x5   :  { %v341_v34 = vld [vmem:[%s478_s5] sm:$0xff]  }
   0x6   :  { %318 = vmatpush3.bf16.msra.mxu1 %v341_v34  ;;  %v345_v38 = vld [vmem:[%s478_s5 + $0x20] sm:$0xff]  }
   0x7   :  { %36 = vadd.xlane.f32.xlu0 %v35_v3  ;;  %312 = vmatpush3.bf16.msra.mxu0 %v340_v16  ;;  %v282_v42 = vld [vmem:[%s479_s4] ss:$0 sm:$0xff] }
   0x8   :  { %319 = vmatprep.subr.bf16.mxu1 %v361_v15  ;;  %v288_v60 = vld [vmem:[%s480_s6] ss:$0 sm:$0xff] }
   0xa   :  { %320 = vmatpush3.bf16.msra.mxu1 %v342_v35 }
   0xb   :  { %321 = vmatprep.subr.bf16.mxu1 %v361_v15 }
   0xe   :  { %322 = vmatpush3.bf16.msra.mxu1 %v343_v36 }
   0xf   :  { %323 = vmatprep.subr.bf16.mxu1 %v361_v15 }
  0x12   :  { %324 = vmatpush3.bf16.msra.mxu1 %v344_v37 }
  0x13   :  { %325 = vmatprep.subr.bf16.mxu1 %v361_v15 }
  0x16   :  { %326 = vmatpush3.bf16.msra.mxu1 %v345_v38 }
  0x17   :  { %327 = vmatprep.subr.bf16.mxu1 %v361_v15 }
  0x1a   :  { %328 = vmatpush3.bf16.msra.mxu1 %v346_v39 }
  0x1b   :  { %329 = vmatprep.subr.bf16.mxu1 %v361_v15 }
  0x1e   :  { %330 = vmatpush3.bf16.msra.mxu1 %v347_v40 }
  0x1f   :  { %331 = vmatprep.subr.bf16.mxu1 %v361_v15 }
  0x22   :  { %332 = vmatpush3.bf16.msra.mxu1 %v348_v41 }
  0x90   :  { %v34_v4 = vpop.xlane.xlu0 %33 }
  0x91   :  { %v39_v5 = vmul.f32 0.03125, %v34_v4 }
  0x93   :  { %v41_v6 = vsub.f32 %v406_v0, %v39_v5 }
  0x94   :  { %v37_v7 = vpop.xlane.xlu0 %36 }
  0x95   :  { %v40_v8 = vmul.f32 0.03125, %v37_v7  ;;  %v43_v9 = vmul.f32 %v41_v6, %v41_v6 }
  0x97   :  { %v42_v10 = vsub.f32 %v411_v1, %v40_v8  ;;  %v45_v11 = vsel %vm31_vm0, %v43_v9, 0.0 }
  0x98   :  { %46 = vadd.xlane.f32.xlu1 %v45_v11 }
  0x99   :  { %v44_v12 = vmul.f32 %v42_v10, %v42_v10 }
  0x9b   :  { %v48_v13 = vsel %vm31_vm0, %v44_v12, 0.0 }
  0x9c   :  { %49 = vadd.xlane.f32.xlu1 %v48_v13 }
 0x125   :  { %v47_v17 = vpop.xlane.xlu1 %46 }
 0x126   :  { %v51_v18 = vmul.f32 0.03125, %v47_v17 }
 0x128   :  { %v53_v19 = vadd.f32 1e-05, %v51_v18 }
 0x129   :  { %v50_v20 = vpop.xlane.xlu1 %49 }
 0x12a   :  { %349 = vrsqrt.f32 %v53_v19  ;;  %v52_v21 = vmul.f32 0.03125, %v50_v20 }
 0x12c   :  { %v54_v22 = vadd.f32 1e-05, %v52_v21 }
 0x12e   :  { %351 = vrsqrt.f32 %v54_v22 }
 0x134   :  { %v350_v23 = vpop.eup %349 }
 0x135   :  { %v57_v24 = vmul.f32 %v350_v23, %v41_v6 }
 0x137   :  { %v65_v28 = vmul.f32 %v280_v25, %v57_v24 }
 0x138   :  { %v352_v26 = vpop.eup %351 }
 0x139   :  { %v58_v27 = vmul.f32 %v352_v26, %v42_v10  ;;  %v73_v31 = vadd.f32 %v281_v29, %v65_v28 }
 0x13b   :  { %v66_v30 = vmul.f32 %v280_v25, %v58_v27 }
 0x13d   :  { %v74_v32 = vadd.f32 %v281_v29, %v66_v30 }
 0x13f   :  { %v79_v33 = vpack.c.bf16 %v74_v32, %v73_v31 }
 0x141   :  { %314 = vmatmul.mubr.msk.bf16.vlgmr.msra.gmra.mrb[0].mxu0 %vm31_vm0, %v79_v33 }
 0x214   :  { %v136_v43 = vpop.f32.mrb[0].mxu0 }
 0x215   :  { %v137_v44 = vadd.f32 %v282_v42, %v136_v43  ;;  %v315_v45 = vpop.f32.mrb[1].mxu0 }
 0x216   :  { %v139_v46 = vpop.f32.mrb[2].mxu0 }
 0x217   :  { %v286_v47 = vmul.f32 -1.442695, %v137_v44  ;;  %v140_v48 = vadd.f32 %v282_v42, %v139_v46  ;;  %v316_v49 = vpop.f32.mrb[3].mxu0 }
 0x219   :  { %353 = vpow2.f32 %v286_v47  ;;  %v287_v50 = vmul.f32 -1.442695, %v140_v48 }
 0x21b   :  { %355 = vpow2.f32 %v287_v50 }
 0x223   :  { %v354_v51 = vpop.eup %353 }
 0x224   :  { %v149_v52 = vadd.f32 1.0, %v354_v51 }
 0x225   :  { %v356_v53 = vpop.eup %355 }
 0x226   :  { %357 = vrcp.f32 %v149_v52  ;;  %v150_v54 = vadd.f32 1.0, %v356_v53 }
 0x228   :  { %359 = vrcp.f32 %v150_v54 }
 0x230   :  { %v358_v55 = vpop.eup %357 }
 0x231   :  { %v155_v57 = vmul.f32 %v358_v55, %v137_v44 }
 0x232   :  { %v360_v56 = vpop.eup %359 }
 0x233   :  { %v156_v58 = vmul.f32 %v360_v56, %v140_v48 }
 0x235   :  { %v173_v59 = vpack.c.bf16 %v156_v58, %v155_v57 }
 0x237   :  { %334 = vmatmul.mubr.bf16.vlgmr.msra.gmra.mrb[0].mxu1 %v173_v59 }
 0x30a   :  { %v263_v61 = vpop.f32.mrb[0].mxu1 }
 0x30b   :  { %v264_v62 = vadd.f32 %v288_v60, %v263_v61  ;;  %v335_v63 = vpop.f32.mrb[1].mxu1 }
 0x30c   :  { %v266_v2 = vpop.f32.mrb[2].mxu1 }
 0x30d   :  { %v270_v3 = vmul.f32 0.5, %v264_v62  ;;  %v267_v4 = vadd.f32 %v288_v60, %v266_v2  ;;  %v336_v5 = vpop.f32.mrb[3].mxu1 }
 0x30f   :  { %v272_v6 = vadd.f32 %v270_v3, %v406_v0  ;;  %v271_v7 = vmul.f32 0.5, %v267_v4 }
 0x311   :  { %274 = vst.msk [vmem:[%s481_s7] sm:$0xff] %vm31_vm0, %v272_v6  ;;  %v273_v8 = vadd.f32 %v271_v7, %v411_v1 }
 0x313   :  { %275 = vst.msk [vmem:[%s481_s7 + $0x8] sm:$0xff] %vm31_vm0, %v273_v8 }

// kernel: bertformer_forward.11
= control target key start
LH: loop header
LB: loop body
LE: loop exit
PB: predicated region body
PF: predicated region fallthrough
CT: control target
= control target key end

     0   :  { %vm37_vm0 = vcmask 261120   ;;  %v417_v15 = vmov 0.0   ;;  %vm418_vm1 = vmmov 0   ;;  %s550_s0 = inlined_call_operand.vmem [shape: f32[16,32], index: 0, kind: input, shape index: {}]   ;;  %s551_s3 = inlined_call_operand.vmem [shape: bf16[32,128], index: 3, kind: input, shape index: {}]   ;;  %s552_s1 = inlined_call_operand.vmem [shape: f32[1,32], index: 1, kind: input, shape index: {}]   ;;  %s553_s2 = inlined_call_operand.vmem [shape: f32[1,32], index: 2, kind: input, shape index: {}]   ;;  %s554_s5 = inlined_call_operand.vmem [shape: bf16[128,32], index: 5, kind: input, shape index: {}]   ;;  %s555_s4 = inlined_call_operand.vmem [shape: f32[1,128], index: 4, kind: input, shape index: {}]   ;;  %s556_s6 = inlined_call_operand.vmem [shape: f32[1,32], index: 6, kind: input, shape index: {}]   ;;  %s557_s7 = inlined_call_operand.vmem [shape: f32[1,32], index: 7, kind: input, shape index: {}]   ;;  %s558_s8 = inlined_call_operand.vmem [shape: f32[1,32], index: 8, kind: input, shape index: {}]   ;;  %s559_s9 = inlined_call_operand.vmem [shape: f32[16,32], index: 9, kind: output, shape index: {}]  }
   0x1   :  { %v472_v0 = vld [vmem:[%s550_s0] sm:$0xff]  ;;  %v477_v1 = vld [vmem:[%s550_s0 + $0x8] sm:$0xff]  ;;  %361 = vmatprep.subr.bf16.mxu0 %v417_v15  ;;  %369 = vmatprep.subr.bf16.mxu1 %v417_v15  ;;  %v395_v36 = vld [vmem:[%s554_s5 + $0x10] sm:$0xff]  }
   0x2   :  { %v38_v2 = vsel %vm37_vm0, %v472_v0, 0.0  ;;  %v41_v3 = vsel %vm37_vm0, %v477_v1, 0.0  ;;  %v391_v14 = vld [vmem:[%s551_s3] sm:$0xff]   ;;  %v392_v16 = vld [vmem:[%s551_s3 + $0x8] sm:$0xff]   ;;  %365 = vmatprep.mubr.msk.bf16.mxu0 %vm418_vm1, %v417_v15  ;;  %385 = vmatprep.mubr.msk.bf16.mxu1 %vm418_vm1, %v417_v15  ;;  %v396_v37 = vld [vmem:[%s554_s5 + $0x18] sm:$0xff]  }
   0x3   :  { %39 = vadd.xlane.f32.xlu0 %v38_v2  ;;  %362 = vmatpush3.bf16.msra.mxu0 %v391_v14  ;;  %v330_v25 = vld [vmem:[%s552_s1] ss:$0 sm:$0xff]  ;;  %v394_v35 = vld [vmem:[%s554_s5 + $0x8] sm:$0xff]   ;;  %v399_v40 = vld [vmem:[%s554_s5 + $0x30] sm:$0xff]  }
   0x4   :  { %363 = vmatprep.subr.bf16.mxu0 %v417_v15  ;;  %v331_v29 = vld [vmem:[%s553_s2] ss:$0 sm:$0xff]  ;;  %v398_v39 = vld [vmem:[%s554_s5 + $0x28] sm:$0xff]   ;;  %v400_v41 = vld [vmem:[%s554_s5 + $0x38] sm:$0xff]  }
   0x5   :  { %v393_v34 = vld [vmem:[%s554_s5] sm:$0xff]  }
   0x6   :  { %370 = vmatpush3.bf16.msra.mxu1 %v393_v34  ;;  %v397_v38 = vld [vmem:[%s554_s5 + $0x20] sm:$0xff]  }
   0x7   :  { %42 = vadd.xlane.f32.xlu0 %v41_v3  ;;  %364 = vmatpush3.bf16.msra.mxu0 %v392_v16  ;;  %v332_v42 = vld [vmem:[%s555_s4] ss:$0 sm:$0xff] }
   0x8   :  { %371 = vmatprep.subr.bf16.mxu1 %v417_v15  ;;  %v338_v60 = vld [vmem:[%s556_s6] ss:$0 sm:$0xff] }
   0xa   :  { %372 = vmatpush3.bf16.msra.mxu1 %v394_v35 }
   0xb   :  { %373 = vmatprep.subr.bf16.mxu1 %v417_v15 }
   0xe   :  { %374 = vmatpush3.bf16.msra.mxu1 %v395_v36 }
   0xf   :  { %375 = vmatprep.subr.bf16.mxu1 %v417_v15 }
  0x12   :  { %376 = vmatpush3.bf16.msra.mxu1 %v396_v37 }
  0x13   :  { %377 = vmatprep.subr.bf16.mxu1 %v417_v15 }
  0x16   :  { %378 = vmatpush3.bf16.msra.mxu1 %v397_v38 }
  0x17   :  { %379 = vmatprep.subr.bf16.mxu1 %v417_v15 }
  0x1a   :  { %380 = vmatpush3.bf16.msra.mxu1 %v398_v39 }
  0x1b   :  { %381 = vmatprep.subr.bf16.mxu1 %v417_v15 }
  0x1e   :  { %382 = vmatpush3.bf16.msra.mxu1 %v399_v40 }
  0x1f   :  { %383 = vmatprep.subr.bf16.mxu1 %v417_v15 }
  0x22   :  { %384 = vmatpush3.bf16.msra.mxu1 %v400_v41 }
  0x90   :  { %v40_v4 = vpop.xlane.xlu0 %39 }
  0x91   :  { %v45_v5 = vmul.f32 0.03125, %v40_v4 }
  0x93   :  { %v47_v6 = vsub.f32 %v472_v0, %v45_v5 }
  0x94   :  { %v43_v7 = vpop.xlane.xlu0 %42 }
  0x95   :  { %v46_v8 = vmul.f32 0.03125, %v43_v7  ;;  %v49_v9 = vmul.f32 %v47_v6, %v47_v6 }
  0x97   :  { %v48_v10 = vsub.f32 %v477_v1, %v46_v8  ;;  %v51_v11 = vsel %vm37_vm0, %v49_v9, 0.0 }
  0x98   :  { %52 = vadd.xlane.f32.xlu1 %v51_v11 }
  0x99   :  { %v50_v12 = vmul.f32 %v48_v10, %v48_v10 }
  0x9b   :  { %v54_v13 = vsel %vm37_vm0, %v50_v12, 0.0 }
  0x9c   :  { %55 = vadd.xlane.f32.xlu1 %v54_v13 }
 0x125   :  { %v53_v17 = vpop.xlane.xlu1 %52 }
 0x126   :  { %v57_v18 = vmul.f32 0.03125, %v53_v17 }
 0x128   :  { %v59_v19 = vadd.f32 1e-05, %v57_v18 }
 0x129   :  { %v56_v20 = vpop.xlane.xlu1 %55 }
 0x12a   :  { %401 = vrsqrt.f32 %v59_v19  ;;  %v58_v21 = vmul.f32 0.03125, %v56_v20 }
 0x12c   :  { %v60_v22 = vadd.f32 1e-05, %v58_v21 }
 0x12e   :  { %403 = vrsqrt.f32 %v60_v22 }
 0x134   :  { %v402_v23 = vpop.eup %401 }
 0x135   :  { %v63_v24 = vmul.f32 %v402_v23, %v47_v6 }
 0x137   :  { %v71_v28 = vmul.f32 %v330_v25, %v63_v24 }
 0x138   :  { %v404_v26 = vpop.eup %403 }
 0x139   :  { %v64_v27 = vmul.f32 %v404_v26, %v48_v10  ;;  %v79_v31 = vadd.f32 %v331_v29, %v71_v28  ;;  %v347_v26 = vld [vmem:[%s557_s7] ss:$0 sm:$0xff] }
 0x13b   :  { %v72_v30 = vmul.f32 %v330_v25, %v64_v27 }
 0x13d   :  { %v80_v32 = vadd.f32 %v331_v29, %v72_v30  ;;  %v348_v29 = vld [vmem:[%s558_s8] ss:$0 sm:$0xff] }
 0x13f   :  { %v85_v33 = vpack.c.bf16 %v80_v32, %v79_v31 }
 0x141   :  { %366 = vmatmul.mubr.msk.bf16.vlgmr.msra.gmra.mrb[0].mxu0 %vm37_vm0, %v85_v33 }
 0x214   :  { %v142_v43 = vpop.f32.mrb[0].mxu0 }
 0x215   :  { %v143_v44 = vadd.f32 %v332_v42, %v142_v43  ;;  %v367_v45 = vpop.f32.mrb[1].mxu0 }
 0x216   :  { %v145_v46 = vpop.f32.mrb[2].mxu0 }
 0x217   :  { %v336_v47 = vmul.f32 -1.442695, %v143_v44  ;;  %v146_v48 = vadd.f32 %v332_v42, %v145_v46  ;;  %v368_v49 = vpop.f32.mrb[3].mxu0 }
 0x219   :  { %405 = vpow2.f32 %v336_v47  ;;  %v337_v50 = vmul.f32 -1.442695, %v146_v48 }
 0x21b   :  { %407 = vpow2.f32 %v337_v50 }
 0x223   :  { %v406_v51 = vpop.eup %405 }
 0x224   :  { %v155_v52 = vadd.f32 1.0, %v406_v51 }
 0x225   :  { %v408_v53 = vpop.eup %407 }
 0x226   :  { %409 = vrcp.f32 %v155_v52  ;;  %v156_v54 = vadd.f32 1.0, %v408_v53 }
 0x228   :  { %411 = vrcp.f32 %v156_v54 }
 0x230   :  { %v410_v55 = vpop.eup %409 }
 0x231   :  { %v161_v57 = vmul.f32 %v410_v55, %v143_v44 }
 0x232   :  { %v412_v56 = vpop.eup %411 }
 0x233   :  { %v162_v58 = vmul.f32 %v412_v56, %v146_v48 }
 0x235   :  { %v179_v59 = vpack.c.bf16 %v162_v58, %v161_v57 }
 0x237   :  { %386 = vmatmul.mubr.bf16.vlgmr.msra.gmra.mrb[0].mxu1 %v179_v59 }
 0x30a   :  { %v269_v61 = vpop.f32.mrb[0].mxu1 }
 0x30b   :  { %v270_v62 = vadd.f32 %v338_v60, %v269_v61  ;;  %v387_v63 = vpop.f32.mrb[1].mxu1 }
 0x30c   :  { %v272_v2 = vpop.f32.mrb[2].mxu1 }
 0x30d   :  { %v276_v3 = vmul.f32 0.5, %v270_v62  ;;  %v273_v4 = vadd.f32 %v338_v60, %v272_v2  ;;  %v388_v5 = vpop.f32.mrb[3].mxu1 }
 0x30f   :  { %v277_v6 = vmul.f32 0.5, %v273_v4  ;;  %v278_v7 = vadd.f32 %v276_v3, %v472_v0 }
 0x311   :  { %v282_v8 = vsel %vm37_vm0, %v278_v7, 0.0  ;;  %v279_v9 = vadd.f32 %v277_v6, %v477_v1 }
 0x312   :  { %283 = vadd.xlane.f32.xlu0 %v282_v8 }
 0x313   :  { %v285_v10 = vsel %vm37_vm0, %v279_v9, 0.0 }
 0x314   :  { %286 = vadd.xlane.f32.xlu1 %v285_v10 }
 0x39f   :  { %v284_v11 = vpop.xlane.xlu0 %283 }
 0x3a0   :  { %v288_v12 = vmul.f32 0.03125, %v284_v11 }
 0x3a1   :  { %v287_v13 = vpop.xlane.xlu1 %286 }
 0x3a2   :  { %v290_v14 = vsub.f32 %v278_v7, %v288_v12  ;;  %v289_v15 = vmul.f32 0.03125, %v287_v13 }
 0x3a4   :  { %v291_v16 = vsub.f32 %v279_v9, %v289_v15  ;;  %v292_v17 = vmul.f32 %v290_v14, %v290_v14 }
 0x3a6   :  { %v294_v18 = vsel %vm37_vm0, %v292_v17, 0.0  ;;  %v293_v19 = vmul.f32 %v291_v16, %v291_v16 }
 0x3a7   :  { %295 = vadd.xlane.f32.xlu0 %v294_v18 }
 0x3a8   :  { %v297_v0 = vsel %vm37_vm0, %v293_v19, 0.0 }
 0x3a9   :  { %298 = vadd.xlane.f32.xlu1 %v297_v0 }
 0x434   :  { %v296_v20 = vpop.xlane.xlu0 %295 }
 0x435   :  { %v300_v1 = vmul.f32 0.03125, %v296_v20 }
 0x436   :  { %v299_v21 = vpop.xlane.xlu1 %298 }
 0x437   :  { %v302_v22 = vadd.f32 1e-05, %v300_v1  ;;  %v301_v23 = vmul.f32 0.03125, %v299_v21 }
 0x439   :  { %413 = vrsqrt.f32 %v302_v22  ;;  %v303_v24 = vadd.f32 1e-05, %v301_v23 }
 0x43b   :  { %415 = vrsqrt.f32 %v303_v24 }
 0x443   :  { %v414_v25 = vpop.eup %413 }
 0x444   :  { %v306_v27 = vmul.f32 %v414_v25, %v290_v14 }
 0x445   :  { %v416_v28 = vpop.eup %415 }
 0x446   :  { %v314_v30 = vmul.f32 %v347_v26, %v306_v27  ;;  %v307_v31 = vmul.f32 %v416_v28, %v291_v16 }
 0x448   :  { %v322_v32 = vadd.f32 %v348_v29, %v314_v30  ;;  %v315_v33 = vmul.f32 %v347_v26, %v307_v31 }
 0x44a   :  { %324 = vst.msk [vmem:[%s559_s9] sm:$0xff] %vm37_vm0, %v322_v32  ;;  %v323_v34 = vadd.f32 %v348_v29, %v315_v33 }
 0x44c   :  { %325 = vst.msk [vmem:[%s559_s9 + $0x8] sm:$0xff] %vm37_vm0, %v323_v34 }

// kernel: bertformer_forward.10
= control target key start
LH: loop header
LB: loop body
LE: loop exit
PB: predicated region body
PF: predicated region fallthrough
CT: control target
= control target key end

     0   :  { %s2144_s0 = inlined_call_operand.vmem [shape: f32[2,8,32], index: 0, kind: input, shape index: {}]   ;;  %s2145_s1 = inlined_call_operand.vmem [shape: f32[2,1,8], index: 1, kind: input, shape index: {}]   ;;  %s2146_s2 = inlined_call_operand.vmem [shape: f32[1,32], index: 2, kind: input, shape index: {}]   ;;  %s2147_s3 = inlined_call_operand.vmem [shape: f32[1,32], index: 3, kind: input, shape index: {}]   ;;  %s2148_s4 = inlined_call_operand.vmem [shape: bf16[32,96], index: 4, kind: input, shape index: {}]   ;;  %s2149_s5 = inlined_call_operand.vmem [shape: bf16[32,32], index: 5, kind: input, shape index: {}]   ;;  %s2150_s6 = inlined_call_operand.vmem [shape: f32[1,32], index: 6, kind: input, shape index: {}]   ;;  %s2151_s7 = inlined_call_operand.vmem [shape: f32[1,32], index: 7, kind: input, shape index: {}]   ;;  %s2152_s8 = inlined_call_operand.vmem [shape: f32[1,32], index: 8, kind: input, shape index: {}]   ;;  %s2153_s9 = inlined_call_operand.vmem [shape: bf16[32,128], index: 9, kind: input, shape index: {}]   ;;  %s2154_s10 = inlined_call_operand.vmem [shape: f32[1,128], index: 10, kind: input, shape index: {}]   ;;  %s2155_s11 = inlined_call_operand.vmem [shape: f32[3,64], index: 11, kind: input, shape index: {}]   ;;  %s2156_s12 = inlined_call_operand.vmem [shape: f32[1,64], index: 12, kind: input, shape index: {}]   ;;  %s2157_s13 = inlined_call_operand.vmem [shape: f32[1,64], index: 13, kind: input, shape index: {}]   ;;  %s2158_s14 = inlined_call_operand.vmem [shape: f32[1,64], index: 14, kind: input, shape index: {}]   ;;  %s2159_s15 = inlined_call_operand.vmem [shape: f32[1,64], index: 15, kind: input, shape index: {}]   ;;  %s2160_s16 = inlined_call_operand.vmem [shape: f32[1,64], index: 16, kind: input, shape index: {}]   ;;  %s2161_s17 = inlined_call_operand.vmem [shape: bf16[64,32], index: 17, kind: input, shape index: {}]   ;;  %s2162_s18 = inlined_call_operand.vmem [shape: f32[1,32], index: 18, kind: input, shape index: {}]   ;;  %s2163_s19 = inlined_call_operand.vmem [shape: f32[2,8,32], index: 19, kind: output, shape index: {}]  }
   0x1   :  { %2164 = sst [smem:[#allocation3_spill]] %s2144_s0  ;;  %s1944_s0 = smov 0  }
   0x2   :  { %2165 = sst [smem:[#allocation4_spill]] %s2145_s1 }
   0x3   :  { %2166 = sst [smem:[#allocation5_spill]] %s2146_s2 }
   0x4   :  { %2167 = sst [smem:[#allocation6_spill]] %s2147_s3 }
   0x5 LB: > { %s1594_s30 = sadd.s32 4294967295, %s1826_s0   ;;  %p1598_p0 = scmp.ge.s32.totalorder %s1826_s0, 1  ;;  %s1826_s0 = sphi %s1944_s0, %s29_s0  }
   0x6   : > { %p544_p1 = scmp.lt.s32.totalorder %s1826_s0, 3 }
   0x8   : > { %p545_p2 = pnand %p1598_p0, %p544_p1 }
   0x9   : > { %p601_p3 = scmp.lt.s32.totalorder (!%p545_p2), %s1594_s30, 1  ;;  %vm617_vm0 = vcmask (!%p545_p2), 261120   ;;  %s2168_s22 = sld [smem:[#allocation3_spill]] (!%p545_p2)  ;;  %v1780_v7 = vld [vmem:[%s2148_s4] sm:$0xff] (!%p545_p2)   ;;  %v1828_v8 = vmov (!%p545_p2), 0.0   ;;  %vm1829_vm1 = vmmov (!%p545_p2), 0  }
   0xa   : > { %548 = sbr.rel (%p545_p2) target bundleno = 2755 (0xac3), region = 96  ;;  %1672 = vmatprep.subr.bf16.mxu0 (!%p545_p2), %v1828_v8  ;;  %1676 = vmatprep.mubr.msk.bf16.mxu0 (!%p545_p2), %vm1829_vm1, %v1828_v8  ;;  %v1781_v9 = vld [vmem:[%s2148_s4 + $0x8] sm:$0xff] (!%p545_p2)   ;;  %s2169_s28 = sld [smem:[#allocation5_spill]] (!%p545_p2)  ;;  %vm718_vm2 = vcmask (!%p545_p2), 64512   ;;  %vm782_vm3 = vcmask (!%p545_p2), 1043456   ;;  %vm942_vm4 = vcmask (!%p545_p2), 130112  }
   0xb   : > { %1673 = vmatpush3.bf16.msra.mxu0 (!%p545_p2), %v1780_v7  ;;  %1680 = vmatprep.subr.bf16.mxu1 (!%p545_p2), %v1828_v8  ;;  %s2170_s1 = sld [smem:[#allocation6_spill]] (!%p545_p2)  ;;  %s1832_s23 = smov (!%p545_p2), 88   ;;  %vm1058_vm5 = vcmask (!%p545_p2), 195712   ;;  %vm1174_vm6 = vcmask (!%p545_p2), 261312   ;;  %vm1486_vm9 = vcmask (!%p545_p2), 523264  }
   0xc   : > { %1674 = vmatprep.subr.bf16.mxu0 (!%p545_p2), %v1828_v8  ;;  %1682 = vmatprep.mubr.msk.bf16.mxu1 (!%p545_p2), %vm1829_vm1, %v1828_v8  ;;  %s1833_s24 = smov (!%p545_p2), 80   ;;  %s1834_s25 = smov (!%p545_p2), 112  }
   0xd   : > { %s1835_s3 = smov (!%p545_p2), 72   ;;  %s1836_s26 = smov (!%p545_p2), 104  }
   0xe   : > { %s2171_s29 = sld [smem:[#allocation4_spill]] (!%p545_p2) }
   0xf   : > { %1675 = vmatpush3.bf16.msra.mxu0 (!%p545_p2), %v1781_v9 }
  0x10   : > { %1686 = vmatprep.subr.bf16.mxu0 (!%p545_p2), %v1828_v8  ;;  %v1601_v14 = vld [vmem:[%s2169_s28] ss:$0 sm:$0xff] (!%p545_p2)  ;;  %s1842_s28 = smov (!%p545_p2), 16  }
  0x11   : > { %s2173_s30 = smov (!%p601_p3, %s1594_s30), 1  ;;  %v1602_v16 = vld [vmem:[%s2170_s1] ss:$0 sm:$0xff]  ;;  %s1837_s1 = smov 64  }
  0x12   : > { %s1599_s20 = sshll.u32 %s2173_s30, 3 }
  0x13   : > { %s604_s2 = scalar_lea.vmem %s2168_s22, %s1599_s20  ;;  %s1830_s22 = smov 96  }
  0x14   : > { %v1960_v0 = vld [vmem:[%s604_s2] sm:$0xff]  ;;  %s1831_s2 = smov 120   ;;  %s607_s21 = scalar_lea.vmem %s2171_s29, %s2173_s30 }
  0x15   : > { %v618_v1 = vsel %vm617_vm0, %v1960_v0, 0.0  ;;  %v1606_v38 = vld [vmem:[%s607_s21] ss:$0 sm:$0xff]  ;;  %s1843_s29 = smov 24  }
  0x16   : > { %619 = vadd.xlane.f32.xlu0 %v618_v1 }
  0xa3   : > { %v620_v2 = vpop.xlane.xlu0 %619 }
  0xa4   : > { %v622_v3 = vmul.f32 0.03125, %v620_v2 }
  0xa6   : > { %v623_v4 = vsub.f32 %v1960_v0, %v622_v3 }
  0xa8   : > { %v624_v5 = vmul.f32 %v623_v4, %v623_v4 }
  0xaa   : > { %v625_v6 = vsel %vm617_vm0, %v624_v5, 0.0 }
  0xab   : > { %626 = vadd.xlane.f32.xlu0 %v625_v6 }
 0x138   : > { %v627_v10 = vpop.xlane.xlu0 %626 }
 0x139   : > { %v628_v11 = vmul.f32 0.03125, %v627_v10 }
 0x13b   : > { %v629_v12 = vadd.f32 1e-05, %v628_v11 }
 0x13d   : > { %1790 = vrsqrt.f32 %v629_v12 }
 0x147   : > { %v1791_v13 = vpop.eup %1790 }
 0x148   : > { %v631_v15 = vmul.f32 %v1791_v13, %v623_v4 }
 0x14a   : > { %v638_v17 = vmul.f32 %v1601_v14, %v631_v15 }
 0x14c   : > { %v645_v18 = vadd.f32 %v1602_v16, %v638_v17 }
 0x14e   : > { %v650_v19 = vpack.c.bf16 %v645_v18, %v645_v18 }
 0x150   : > { %1677 = vmatmul.mubr.msk.bf16.vlgmr.msra.gmra.mrb[0].mxu0 %vm617_vm0, %v650_v19 }
 0x151   : > { %1688 = vmatprep.mubr.msk.bf16.mxu0 %vm1829_vm1, %v1828_v8 }
 0x223   : > { %v700_v20 = vpop.f32.mrb[0].mxu0 }
 0x224   : > { %v706_v21 = vmul.f32 0.35355338, %v700_v20  ;;  %v1989_v22 = vpack.c.bf16 %v700_v20, %v700_v20  ;;  %v1678_v23 = vpop.f32.mrb[1].mxu0 }
 0x225   : > { %v703_v24 = vpop.f32.mrb[2].mxu0 }
 0x226   : > { %v707_v25 = vpack.c.bf16 %v706_v21, %v706_v21  ;;  %716 = vrot.lane.b32.xlu1 %v1989_v22, %s1830_s22  ;;  %v1679_v26 = vpop.f32.mrb[3].mxu0  ;;  %s1838_s22 = smov 56  }
 0x228   : > { %828 = vrot.lane.b32.xlu0 %v707_v25, %s1831_s2  ;;  %s1839_s2 = smov 48  }
 0x22a   : > { %830 = vrot.lane.b32.xlu1 %v1989_v22, %s1832_s23  ;;  %s1840_s23 = smov 40  }
 0x22e   : > { %946 = vrot.lane.b32.xlu1 %v1989_v22, %s1833_s24  ;;  %s1841_s24 = smov 8  }
 0x232   : > { %944 = vrot.lane.b32.xlu1 %v707_v25, %s1834_s25  ;;  %s611_s25 = scalar_lea.vmem %s2163_s19, %s1599_s20 }
 0x236   : > { %1062 = vrot.lane.b32.xlu1 %v1989_v22, %s1835_s3 }
 0x23a   : > { %1060 = vrot.lane.b32.xlu1 %v707_v25, %s1836_s26 }
 0x298   : > { %v717_v27 = vpop.permute.xlu1 %716 }
 0x299   : > { %v723_v28 = vsel %vm718_vm2, %v717_v27, 0 }
 0x29a   : > { %1681 = vmatpush3.bf16.xpose.msra.mxu1 %v723_v28  ;;  %v829_v32 = vpop.permute.xlu0 %828 }
 0x29b   : > { %1692 = vmatprep.subr.bf16.mxu1 %v1828_v8 }
 0x29c   : > { %v831_v29 = vpop.permute.xlu1 %830 }
 0x29d   : > { %v836_v30 = vsel %vm718_vm2, %v831_v29, 0 }
 0x2a0   : > { %v947_v31 = vpop.permute.xlu1 %946 }
 0x2a1   : > { %1683 = vmatmul.mubr.msk.bf16.vlgmr.msra.gmra.mrb[0].mxu1 %vm718_vm2, %v707_v25  ;;  %v952_v34 = vsel %vm718_vm2, %v947_v31, 0 }
 0x2a2   : > { %1693 = vmatpush3.bf16.xpose.msra.mxu1 %v836_v30  ;;  %1694 = vmatprep.mubr.msk.bf16.mxu1 %vm1829_vm1, %v1828_v8 }
 0x2a3   : > { %1704 = vmatprep.subr.bf16.mxu1 %v1828_v8 }
 0x2a4   : > { %v945_v33 = vpop.permute.xlu1 %944 }
 0x2a8   : > { %v1063_v35 = vpop.permute.xlu1 %1062 }
 0x2a9   : > { %1695 = vmatmul.mubr.msk.bf16.vlgmr.msra.gmra.mrb[4].mxu1 %vm718_vm2, %v829_v32  ;;  %v1068_v36 = vsel %vm718_vm2, %v1063_v35, 0 }
 0x2aa   : > { %1705 = vmatpush3.bf16.xpose.msra.mxu1 %v952_v34  ;;  %1706 = vmatprep.mubr.msk.bf16.mxu1 %vm1829_vm1, %v1828_v8 }
 0x2ab   : > { %1716 = vmatprep.subr.bf16.mxu1 %v1828_v8 }
 0x2ac   : > { %v1061_v37 = vpop.permute.xlu1 %1060 }
 0x2b1   : > { %1707 = vmatmul.mubr.msk.bf16.vlgmr.msra.gmra.mrb[8].mxu1 %vm718_vm2, %v945_v33 }
 0x2b2   : > { %1717 = vmatpush3.bf16.xpose.msra.mxu1 %v1068_v36  ;;  %1718 = vmatprep.mubr.msk.bf16.mxu1 %vm1829_vm1, %v1828_v8 }
 0x2b3   : > { %1728 = vmatprep.subr.bf16.mxu1 %v1828_v8 }
 0x2b9   : > { %1719 = vmatmul.mubr.msk.bf16.vlgmr.msra.gmra.mrb[12].mxu1 %vm718_vm2, %v1061_v37 }
 0x2ba   : > { %1732 = vmatprep.mubr.msk.bf16.mxu1 %vm1829_vm1, %v1828_v8 }
 0x374   : > { %v759_v39 = vpop.f32.mrb[0].mxu1 }
 0x375   : > { %v760_v40 = vadd.f32 %v1606_v38, %v759_v39  ;;  %v1684_v41 = vpop.f32.mrb[1].mxu1 }
 0x376   : > { %v762_v42 = vpop.f32.mrb[2].mxu1 }
 0x377   : > { %v1685_v43 = vpop.f32.mrb[3].mxu1  ;;  %v765_v44 = vsel %vm718_vm2, %v760_v40, -inf }
 0x378   : > { %766 = vmax.xlane.f32.xlu1 %v765_v44 }
 0x37c   : > { %v872_v45 = vpop.f32.mrb[4].mxu1 }
 0x37d   : > { %v873_v46 = vadd.f32 %v1606_v38, %v872_v45  ;;  %v1696_v47 = vpop.f32.mrb[5].mxu1 }
 0x37e   : > { %v875_v48 = vpop.f32.mrb[6].mxu1 }
 0x37f   : > { %v1697_v49 = vpop.f32.mrb[7].mxu1  ;;  %v878_v50 = vsel %vm718_vm2, %v873_v46, -inf }
 0x380   : > { %879 = vmax.xlane.f32.xlu0 %v878_v50 }
 0x384   : > { %v988_v51 = vpop.f32.mrb[8].mxu1 }
 0x385   : > { %v989_v52 = vadd.f32 %v1606_v38, %v988_v51  ;;  %v1708_v53 = vpop.f32.mrb[9].mxu1 }
 0x386   : > { %v991_v54 = vpop.f32.mrb[10].mxu1  ;;  %v1782_v53 = vld [vmem:[%s2149_s5] sm:$0xff]  }
 0x387   : > { %v1709_v55 = vpop.f32.mrb[11].mxu1  ;;  %v994_v56 = vsel %vm718_vm2, %v989_v52, -inf  ;;  %1729 = vmatpush3.bf16.msra.mxu1 %v1782_v53  ;;  %v1783_v54 = vld [vmem:[%s2149_s5 + $0x8] sm:$0xff]  }
 0x388   : > { %995 = vmax.xlane.f32.xlu1 %v994_v56  ;;  %1730 = vmatprep.subr.bf16.mxu1 %v1828_v8 }
 0x38b   : > { %1731 = vmatpush3.bf16.msra.mxu1 %v1783_v54 }
 0x38c   : > { %v1104_v57 = vpop.f32.mrb[12].mxu1  ;;  %1744 = vmatprep.subr.bf16.mxu1 %v1828_v8 }
 0x38d   : > { %v1105_v58 = vadd.f32 %v1606_v38, %v1104_v57  ;;  %v1720_v59 = vpop.f32.mrb[13].mxu1 }
 0x38e   : > { %v1107_v60 = vpop.f32.mrb[14].mxu1 }
 0x38f   : > { %v1721_v61 = vpop.f32.mrb[15].mxu1  ;;  %v1110_v62 = vsel %vm718_vm2, %v1105_v58, -inf }
 0x390   : > { %1111 = vmax.xlane.f32.xlu0 %v1110_v62 }
 0x405   : > { %v767_v63 = vpop.xlane.xlu1 %766 }
 0x406   : > { %v768_v1 = vsub.f32 %v760_v40, %v767_v63 }
 0x408   : > { %v769_v2 = vmul.f32 1.442695, %v768_v1 }
 0x40a   : > { %1792 = vpow2.f32 %v769_v2 }
 0x40d   : > { %v880_v3 = vpop.xlane.xlu0 %879 }
 0x40e   : > { %v881_v4 = vsub.f32 %v873_v46, %v880_v3 }
 0x410   : > { %v882_v5 = vmul.f32 1.442695, %v881_v4 }
 0x412   : > { %1794 = vpow2.f32 %v882_v5  ;;  %v1615_v5 = vld [vmem:[%s2150_s6] ss:$0 sm:$0xff] }
 0x414   : > { %v1793_v6 = vpop.eup %1792 }
 0x415   : > { %v771_v7 = vsel %vm718_vm2, %v1793_v6, 0.0  ;;  %v996_v16 = vpop.xlane.xlu1 %995 }
 0x416   : > { %772 = vadd.xlane.f32.xlu1 %v771_v7  ;;  %v997_v17 = vsub.f32 %v989_v52, %v996_v16 }
 0x418   : > { %v998_v18 = vmul.f32 1.442695, %v997_v17 }
 0x41c   : > { %v1795_v9 = vpop.eup %1794 }
 0x41d   : > { %v1112_v10 = vpop.xlane.xlu0 %1111  ;;  %v884_v11 = vsel %vm718_vm2, %v1795_v9, 0.0 }
 0x41e   : > { %v1113_v12 = vsub.f32 %v1105_v58, %v1112_v10  ;;  %885 = vadd.xlane.f32.xlu0 %v884_v11 }
 0x420   : > { %v1114_v13 = vmul.f32 1.442695, %v1113_v12 }
 0x422   : > { %1796 = vpow2.f32 %v1114_v13 }
 0x423   : > { %1798 = vpow2.f32 %v998_v18 }
 0x427   : > { %777 = vrot.lane.b32.xlu1 %v1989_v22, %s1837_s1 }
 0x42c   : > { %v1797_v14 = vpop.eup %1796 }
 0x42d   : > { %v1116_v15 = vsel %vm718_vm2, %v1797_v14, 0.0  ;;  %v1799_v19 = vpop.eup %1798 }
 0x42e   : > { %1117 = vadd.xlane.f32.xlu0 %v1116_v15  ;;  %v1000_v20 = vsel %vm718_vm2, %v1799_v19, 0.0 }
 0x444   : > { %890 = vrot.lane.b32.xlu0 %v1989_v22, %s1838_s22 }
 0x44b   : > { %1001 = vadd.xlane.f32.xlu1 %v1000_v20 }
 0x45c   : > { %1006 = vrot.lane.b32.xlu1 %v1989_v22, %s1839_s2 }
 0x460   : > { %1122 = vrot.lane.b32.xlu1 %v1989_v22, %s1840_s23 }
 0x4a3   : > { %v773_v21 = vpop.xlane.xlu1 %772 }
 0x4a4   : > { %1800 = vrcp.f32 %v773_v21 }
 0x4a7   : > { %v778_v23 = vpop.permute.xlu1 %777 }
 0x4a8   : > { %v784_v24 = vsel %vm782_vm3, %v778_v23, 0 }
 0x4a9   : > { %1687 = vmatpush3.bf16.msra.mxu0 %v784_v24 }
 0x4aa   : > { %1698 = vmatprep.subr.bf16.mxu0 %v1828_v8 }
 0x4ab   : > { %v886_v26 = vpop.xlane.xlu0 %885 }
 0x4ac   : > { %1802 = vrcp.f32 %v886_v26 }
 0x4ae   : > { %v1801_v25 = vpop.eup %1800 }
 0x4af   : > { %v775_v27 = vmul.f32 %v1801_v25, %v1793_v6  ;;  %v1619_v25 = vld [vmem:[%s2151_s7] ss:$0 sm:$0xff] }
 0x4b1   : > { %v776_v28 = vpack.c.bf16 %v775_v27, %v775_v27  ;;  %v1620_v27 = vld [vmem:[%s2152_s8] ss:$0 sm:$0xff] }
 0x4b3   : > { %1689 = vmatmul.mubr.msk.bf16.vlgmr.msra.gmra.mrb[4].mxu0 %vm718_vm2, %v776_v28 }
 0x4b4   : > { %1700 = vmatprep.mubr.msk.bf16.mxu0 %vm1829_vm1, %v1828_v8 }
 0x4b6   : > { %v1803_v22 = vpop.eup %1802 }
 0x4b7   : > { %v888_v30 = vmul.f32 %v1803_v22, %v1795_v9 }
 0x4b9   : > { %v889_v33 = vpack.c.bf16 %v888_v30, %v888_v30  ;;  %v1621_v30 = vld [vmem:[%s2154_s10] ss:$0 sm:$0xff] }
 0x4bb   : > { %v1118_v29 = vpop.xlane.xlu0 %1117 }
 0x4bf   : > { %v891_v31 = vpop.permute.xlu0 %890 }
 0x4c0   : > { %v896_v32 = vsel %vm782_vm3, %v891_v31, 0 }
 0x4c1   : > { %1699 = vmatpush3.bf16.msra.mxu0 %v896_v32 }
 0x4c2   : > { %1710 = vmatprep.subr.bf16.mxu0 %v1828_v8 }
 0x4c4   : > { %1701 = vmatmul.mubr.msk.bf16.vlgmr.msra.gmra.mrb[8].mxu0 %vm718_vm2, %v889_v33 }
 0x4c5   : > { %1712 = vmatprep.mubr.msk.bf16.mxu0 %vm1829_vm1, %v1828_v8 }
 0x4d8   : > { %v1002_v34 = vpop.xlane.xlu1 %1001 }
 0x4d9   : > { %1804 = vrcp.f32 %v1002_v34 }
 0x4da   : > { %1806 = vrcp.f32 %v1118_v29 }
 0x4dc   : > { %v1007_v35 = vpop.permute.xlu1 %1006 }
 0x4dd   : > { %v1012_v36 = vsel %vm782_vm3, %v1007_v35, 0 }
 0x4de   : > { %1711 = vmatpush3.bf16.msra.mxu0 %v1012_v36 }
 0x4df   : > { %1722 = vmatprep.subr.bf16.mxu0 %v1828_v8 }
 0x4e0   : > { %v1123_v39 = vpop.permute.xlu1 %1122 }
 0x4e1   : > { %v1128_v42 = vsel %vm782_vm3, %v1123_v39, 0 }
 0x4e3   : > { %v1805_v37 = vpop.eup %1804 }
 0x4e4   : > { %v1004_v38 = vmul.f32 %v1805_v37, %v1799_v19  ;;  %v1807_v41 = vpop.eup %1806  ;;  %v1784_v19 = vld [vmem:[%s2153_s9] sm:$0xff]  }
 0x4e5   : > { %v1120_v43 = vmul.f32 %v1807_v41, %v1797_v14  ;;  %v1787_v41 = vld [vmem:[%s2161_s17 + $0x8] sm:$0xff]  }
 0x4e6   : > { %v1005_v40 = vpack.c.bf16 %v1004_v38, %v1004_v38 }
 0x4e7   : > { %v1121_v44 = vpack.c.bf16 %v1120_v43, %v1120_v43  ;;  %v1789_v43 = vld [vmem:[%s2161_s17 + $0x18] sm:$0xff]  }
 0x4e8   : > { %1713 = vmatmul.mubr.msk.bf16.vlgmr.msra.gmra.mrb[12].mxu0 %vm718_vm2, %v1005_v40  ;;  %v1786_v40 = vld [vmem:[%s2161_s17] sm:$0xff]  }
 0x4e9   : > { %1723 = vmatpush3.bf16.msra.mxu0 %v1128_v42  ;;  %1724 = vmatprep.mubr.msk.bf16.mxu0 %vm1829_vm1, %v1828_v8  ;;  %v1788_v42 = vld [vmem:[%s2161_s17 + $0x10] sm:$0xff]  }
 0x4ea   : > { %1736 = vmatprep.subr.bf16.mxu0 %v1828_v8 }
 0x4f0   : > { %1725 = vmatmul.mubr.msk.bf16.vlgmr.msra.gmra.mrb[16].mxu0 %vm718_vm2, %v1121_v44  ;;  %v1352_v44 = vlaneseq }
 0x4f1   : > { %1740 = vmatprep.mubr.msk.bf16.mxu0 %vm1829_vm1, %v1828_v8  ;;  %1737 = vmatpush3.bf16.msra.mxu0 %v1784_v19 }
 0x4f2   : > { %1738 = vmatprep.subr.bf16.mxu0 %v1828_v8 }
 0x586   : > { %v820_v45 = vpop.f32.mrb[4].mxu0 }
 0x587   : > { %826 = vst.msk [vmem:[#allocation2] sm:$0xff] %vm718_vm2, %v820_v45  ;;  %v1690_v46 = vpop.f32.mrb[5].mxu0  ;;  %v1413_v45 = vld [vmem:[%s2160_s16] sm:$0x1] }
 0x588   : > { %v823_v47 = vpop.f32.mrb[6].mxu0  ;;  %v1353_v46 = vshrl.u32 %v1352_v44, 7 }
 0x589   : > { %v1691_v48 = vpop.f32.mrb[7].mxu0  ;;  %v1414_v47 = vadd.f32 1e-05, %v1413_v45 }
 0x58a   : > { %v1355_v48 = vadd.s32 4294967295, %v1353_v46 }
 0x58c   : > { %vm1356_vm7 = vcmp.ge.s32.totalorder %v1355_v48, 0 }
 0x597   : > { %v932_v49 = vpop.f32.mrb[8].mxu0 }
 0x598   : > { %939 = vrot.lane.b32.xlu0 %v932_v49, %s1841_s24  ;;  %v1702_v50 = vpop.f32.mrb[9].mxu0  ;;  %v1383_v49 = vadd.s32 1, %v1353_v46 }
 0x599   : > { %v935_v51 = vpop.f32.mrb[10].mxu0 }
 0x59a   : > { %v1703_v52 = vpop.f32.mrb[11].mxu0  ;;  %vm1385_vm8 = vcmp.le.s32.totalorder %v1383_v49, 7 }
 0x59b   : > { %v1626_v52 = vld [vmem:[%s2155_s11] ss:$0 sm:$0xff] }
 0x5bb   : > { %v1048_v55 = vpop.f32.mrb[12].mxu0 }
 0x5bc   : > { %1055 = vrot.lane.b32.xlu1 %v1048_v55, %s1842_s28  ;;  %v1714_v56 = vpop.f32.mrb[13].mxu0  ;;  %v1628_v55 = vld [vmem:[%s2155_s11 + $0x2] ss:$0 sm:$0xff] }
 0x5bd   : > { %v1051_v57 = vpop.f32.mrb[14].mxu0 }
 0x5be   : > { %v1715_v58 = vpop.f32.mrb[15].mxu0 }
 0x5c3   : > { %v1164_v59 = vpop.f32.mrb[16].mxu0 }
 0x5c4   : > { %1171 = vrot.lane.b32.xlu0 %v1164_v59, %s1843_s29  ;;  %v1726_v60 = vpop.f32.mrb[17].mxu0 }
 0x5c5   : > { %v1167_v61 = vpop.f32.mrb[18].mxu0  ;;  %v1419_v60 = vsub.s32 0, %v1353_v46 }
 0x5c6   : > { %v1727_v62 = vpop.f32.mrb[19].mxu0 }
 0x60a   : > { %v940_v63 = vpop.permute.xlu0 %939 }
 0x60b   : > { %943 = vst.msk [vmem:[#allocation2] sm:$0xff] %vm942_vm4, %v940_v63 }
 0x62e   : > { %v1056_v1 = vpop.permute.xlu1 %1055 }
 0x62f   : > { %1059 = vst.msk [vmem:[#allocation2] sm:$0xff] %vm1058_vm5, %v1056_v1  ;;  %v1629_v1 = vld [vmem:[%s2156_s12] ss:$0 sm:$0xff] }
 0x636   : > { %v1172_v2 = vpop.permute.xlu0 %1171 }
 0x637   : > { %1175 = vst.msk [vmem:[#allocation2] sm:$0xff] %vm1174_vm6, %v1172_v2 }
 0x63e   : > { %v1180_v3 = vld [vmem:[#allocation2] sm:$0xff] }
 0x63f   : > { %v1181_v4 = vpack.c.bf16 %v1180_v3, %v1180_v3  ;;  %v1630_v3 = vld [vmem:[%s2159_s15] ss:$0 sm:$0xff] }
 0x641   : > { %1733 = vmatmul.mubr.msk.bf16.vlgmr.msra.gmra.mrb[16].mxu1 %vm617_vm0, %v1181_v4 }
 0x642   : > { %1752 = vmatprep.mubr.msk.bf16.mxu1 %vm1829_vm1, %v1828_v8  ;;  %1745 = vmatpush3.bf16.msra.mxu1 %v1786_v40 }
 0x643   : > { %1746 = vmatprep.subr.bf16.mxu1 %v1828_v8 }
 0x646   : > { %1747 = vmatpush3.bf16.msra.mxu1 %v1787_v41 }
 0x647   : > { %1748 = vmatprep.subr.bf16.mxu1 %v1828_v8 }
 0x64a   : > { %1749 = vmatpush3.bf16.msra.mxu1 %v1788_v42 }
 0x64b   : > { %1750 = vmatprep.subr.bf16.mxu1 %v1828_v8  ;;  %v1627_v8 = vld [vmem:[%s2155_s11 + $0x1] ss:$0 sm:$0xff] }
 0x64e   : > { %1751 = vmatpush3.bf16.msra.mxu1 %v1789_v43 }
 0x714   : > { %v1238_v6 = vpop.f32.mrb[16].mxu1 }
 0x715   : > { %v1239_v7 = vadd.f32 %v1615_v5, %v1238_v6  ;;  %v1734_v9 = vpop.f32.mrb[17].mxu1 }
 0x716   : > { %v1241_v10 = vpop.f32.mrb[18].mxu1 }
 0x717   : > { %v2068_v11 = vadd.f32 %v1239_v7, %v1960_v0  ;;  %v1735_v12 = vpop.f32.mrb[19].mxu1  ;;  %v1785_v0 = vld [vmem:[%s2153_s9 + $0x8] sm:$0xff]   ;;  %v1631_v7 = vld [vmem:[%s2157_s13] ss:$0 sm:$0xff] }
 0x718   : > { %1739 = vmatpush3.bf16.msra.mxu0 %v1785_v0  ;;  %v1632_v10 = vld [vmem:[%s2158_s14] ss:$0 sm:$0xff] }
 0x719   : > { %v1247_v13 = vsel %vm617_vm0, %v2068_v11, 0.0  ;;  %v1634_v0 = vld [vmem:[%s2162_s18] ss:$0 sm:$0xff] }
 0x71a   : > { %1248 = vadd.xlane.f32.xlu1 %v1247_v13 }
 0x7a7   : > { %v1249_v14 = vpop.xlane.xlu1 %1248 }
 0x7a8   : > { %v1250_v15 = vmul.f32 0.03125, %v1249_v14 }
 0x7aa   : > { %v1251_v16 = vsub.f32 %v2068_v11, %v1250_v15 }
 0x7ac   : > { %v1252_v17 = vmul.f32 %v1251_v16, %v1251_v16 }
 0x7ae   : > { %v1253_v18 = vsel %vm617_vm0, %v1252_v17, 0.0 }
 0x7af   : > { %1254 = vadd.xlane.f32.xlu0 %v1253_v18 }
 0x83c   : > { %v1255_v20 = vpop.xlane.xlu0 %1254 }
 0x83d   : > { %v1256_v21 = vmul.f32 0.03125, %v1255_v20 }
 0x83f   : > { %v1257_v23 = vadd.f32 1e-05, %v1256_v21 }
 0x841   : > { %1808 = vrsqrt.f32 %v1257_v23 }
 0x84b   : > { %v1809_v24 = vpop.eup %1808 }
 0x84c   : > { %v1259_v26 = vmul.f32 %v1809_v24, %v1251_v16 }
 0x84e   : > { %v1266_v28 = vmul.f32 %v1619_v25, %v1259_v26 }
 0x850   : > { %v1273_v22 = vadd.f32 %v1620_v27, %v1266_v28 }
 0x852   : > { %v1278_v29 = vpack.c.bf16 %v1273_v22, %v1273_v22 }
 0x854   : > { %1741 = vmatmul.mubr.msk.bf16.vlgmr.msra.gmra.mrb[20].mxu0 %vm617_vm0, %v1278_v29 }
 0x927   : > { %v1335_v31 = vpop.f32.mrb[20].mxu0 }
 0x928   : > { %v1336_v32 = vadd.f32 %v1621_v30, %v1335_v31  ;;  %v1742_v33 = vpop.f32.mrb[21].mxu0 }
 0x929   : > { %v1338_v34 = vpop.f32.mrb[22].mxu0 }
 0x92a   : > { %v1625_v35 = vmul.f32 -1.442695, %v1336_v32  ;;  %v1743_v36 = vpop.f32.mrb[23].mxu0 }
 0x92c   : > { %1810 = vpow2.f32 %v1625_v35 }
 0x936   : > { %v1811_v37 = vpop.eup %1810 }
 0x937   : > { %v1344_v38 = vadd.f32 1.0, %v1811_v37 }
 0x939   : > { %1812 = vrcp.f32 %v1344_v38 }
 0x93a   : > { %1814 = vrsqrt.f32 %v1414_v47 }
 0x943   : > { %v1813_v39 = vpop.eup %1812 }
 0x944   : > { %1348 = vrot.lane.b32.xlu0 %v1813_v39, %s1837_s1  ;;  %v1815_v63 = vpop.eup %1814 }
 0x945   : > { %v1420_v4 = vrot.slane %v1815_v63, %v1419_v60 }
 0x9b6   : > { %v1349_v50 = vpop.permute.xlu0 %1348 }
 0x9b7   : > { %v1351_v51 = vmul.f32 %v1349_v50, %v1336_v32 }
 0x9b9   : > { %v1354_v53 = vrot.slane %v1351_v51, 7  ;;  %v1382_v54 = vrot.slane %v1351_v51, 1  ;;  %v1380_v59 = vmul.f32 %v1627_v8, %v1351_v51 }
 0x9bb   : > { %v1361_v56 = vsel %vm1356_vm7, %v1354_v53, 0.0  ;;  %v1389_v57 = vsel %vm1385_vm8, %v1382_v54, 0.0 }
 0x9bc   : > { %v1367_v58 = vmul.f32 %v1626_v52, %v1361_v56  ;;  %v1395_v62 = vmul.f32 %v1628_v55, %v1389_v57 }
 0x9be   : > { %v1381_v61 = vadd.f32 %v1380_v59, %v1367_v58 }
 0x9c0   : > { %v1396_v2 = vadd.f32 %v1395_v62, %v1381_v61 }
 0x9c2   : > { %v1404_v5 = vadd.f32 %v1629_v1, %v1396_v2 }
 0x9c4   : > { %v1412_v6 = vsub.f32 %v1404_v5, %v1630_v3 }
 0x9c6   : > { %v1422_v9 = vmul.f32 %v1420_v4, %v1412_v6 }
 0x9c8   : > { %v1430_v12 = vmul.f32 %v1631_v7, %v1422_v9 }
 0x9ca   : > { %v1438_v13 = vadd.f32 %v1632_v10, %v1430_v12 }
 0x9cc   : > { %v1633_v14 = vmul.f32 -1.442695, %v1438_v13 }
 0x9ce   : > { %1816 = vpow2.f32 %v1633_v14 }
 0x9d8   : > { %v1817_v15 = vpop.eup %1816 }
 0x9d9   : > { %v1442_v16 = vadd.f32 1.0, %v1817_v15 }
 0x9db   : > { %1818 = vrcp.f32 %v1442_v16 }
 0x9e5   : > { %v1819_v17 = vpop.eup %1818 }
 0x9e6   : > { %v1445_v18 = vmul.f32 %v1819_v17, %v1438_v13 }
 0x9e8   : > { %v1454_v19 = vpack.c.bf16 %v1445_v18, %v1445_v18 }
 0x9ea   : > { %1753 = vmatmul.mubr.msk.bf16.vlgmr.msra.gmra.mrb[20].mxu1 %vm1486_vm9, %v1454_v19 }
 0xabd   : > { %v1524_v20 = vpop.f32.mrb[20].mxu1 }
 0xabe   : > { %v1525_v21 = vadd.f32 %v1634_v0, %v1524_v20  ;;  %v1754_v23 = vpop.f32.mrb[21].mxu1 }
 0xabf   : > { %v1527_v24 = vpop.f32.mrb[22].mxu1 }
 0xac0   : > { %v1530_v25 = vadd.f32 %v1525_v21, %v2068_v11  ;;  %v1755_v26 = vpop.f32.mrb[23].mxu1 }
 0xac2   : > { %1531 = vst.msk [vmem:[%s611_s25] sm:$0xff] %vm617_vm0, %v1530_v25 }
 0xac3 PF: > { %s29_s0 = sadd.s32 1, %s1826_s0  }
 0xac4   : > { %p26_p4 = scmp.ge.s32.totalorder %s29_s0, 4  }
 0xac6   :  { %28 = sbr.rel (!%p26_p4) target bundleno = 5 (0x5), region = 129 }

// kernel: bertformer_forward.15
= control target key start
LH: loop header
LB: loop body
LE: loop exit
PB: predicated region body
PF: predicated region fallthrough
CT: control target
= control target key end

     0   :  { %v471_v1 = vmov 0.0   ;;  %vm472_vm0 = vmmov 0   ;;  %s632_s0 = inlined_call_operand.vmem [shape: f32[16,32], index: 0, kind: input, shape index: {}]   ;;  %s633_s1 = inlined_call_operand.vmem [shape: s32[16,1], index: 1, kind: input, shape index: {}]   ;;  %s634_s2 = inlined_call_operand.vmem [shape: bf16[32,32], index: 2, kind: input, shape index: {}]   ;;  %s635_s3 = inlined_call_operand.vmem [shape: f32[1,32], index: 3, kind: input, shape index: {}]   ;;  %s636_s4 = inlined_call_operand.vmem [shape: f32[1,32], index: 4, kind: input, shape index: {}]   ;;  %s637_s5 = inlined_call_operand.vmem [shape: f32[1,32], index: 5, kind: input, shape index: {}]   ;;  %s638_s6 = inlined_call_operand.vmem [shape: bf16[32,64], index: 6, kind: input, shape index: {}]   ;;  %s639_s7 = inlined_call_operand.vmem [shape: f32[1,64], index: 7, kind: input, shape index: {}]   ;;  %s640_s8 = inlined_call_operand.hbm [shape: bf16[16,64], index: 8, kind: output, shape index: {0}]   ;;  %s641_s9 = inlined_call_operand.vmem [shape: f32[16,1], index: 9, kind: output, shape index: {1}]   ;;  %s642_s10 = inlined_call_operand.vmem [shape: f32[16,1], index: 10, kind: output, shape index: {2}]  }
   0x1   :  { %v423_v0 = vld [vmem:[%s634_s2] sm:$0xff]   ;;  %398 = vmatprep.subr.bf16.mxu0 %v471_v1  ;;  %406 = vmatprep.subr.bf16.mxu1 %v471_v1  ;;  %v424_v2 = vld [vmem:[%s634_s2 + $0x8] sm:$0xff]  }
   0x2   :  { %399 = vmatpush3.bf16.msra.mxu0 %v423_v0  ;;  %402 = vmatprep.mubr.msk.bf16.mxu0 %vm472_vm0, %v471_v1  ;;  %v38_v3 = vld [vmem:[%s632_s0] sm:$0xff]  ;;  %v39_v4 = vld [vmem:[%s632_s0 + $0x8] sm:$0xff] }
   0x3   :  { %400 = vmatprep.subr.bf16.mxu0 %v471_v1  ;;  %410 = vmatprep.mubr.msk.bf16.mxu1 %vm472_vm0, %v471_v1 }
   0x4   :  { %16 = vsyncpa [#allocation7], 0  ;;  %v44_v5 = vpack.c.bf16 %v39_v4, %v38_v3  ;;  %vm64_vm1 = vcmask 261120   ;;  %v378_v6 = vld [vmem:[%s635_s3] ss:$0 sm:$0xff]  ;;  %v426_v36 = vld [vmem:[%s638_s6 + $0x8] sm:$0xff]   ;;  %v254_v56 = vlaneseq }
   0x5   :  { %v425_v35 = vld [vmem:[%s638_s6] sm:$0xff]   ;;  %vm166_vm2 = vcmask 7168   ;;  %v473_v55 = vmov -1e+30   ;;  %vm261_vm4 = vcmask 523264   ;;  %vm250_vm5 = vcmask 519168  }
   0x6   :  { %401 = vmatpush3.bf16.msra.mxu0 %v424_v2  ;;  %407 = vmatpush3.bf16.msra.mxu1 %v425_v35  ;;  %v382_v45 = vld [vmem:[%s636_s4] ss:$0 sm:$0xff]  ;;  %167 = vst.msk [vmem:[#allocation3] sm:$0xff] %vm166_vm2, %v473_v55  ;;  %168 = vst.msk [vmem:[#allocation3 + $0x8] sm:$0xff] %vm166_vm2, %v473_v55  ;;  %v255_v57 = vand.u32 127, %v254_v56 }
   0x7   :  { %408 = vmatprep.subr.bf16.mxu1 %v471_v1  ;;  %v383_v49 = vld [vmem:[%s637_s5] ss:$0 sm:$0xff]  ;;  %169 = vst.msk [vmem:[#allocation4] sm:$0xff] %vm166_vm2, %v471_v1  ;;  %170 = vst.msk [vmem:[#allocation4 + $0x8] sm:$0xff] %vm166_vm2, %v471_v1 }
   0x8   :  { %171 = vst.msk [vmem:[#allocation5] sm:$0xff] %vm166_vm2, %v471_v1  ;;  %172 = vst.msk [vmem:[#allocation5 + $0x8] sm:$0xff] %vm166_vm2, %v471_v1  ;;  %v384_v58 = vld [vmem:[%s639_s7] ss:$0 sm:$0xff]  ;;  %vm258_vm3 = vcmp.lt.s32.totalorder %v255_v57, 64 }
   0x9   :  { %403 = vmatmul.mubr.msk.bf16.vlgmr.msra.gmra.mrb[0].mxu0 %vm64_vm1, %v44_v5 }
   0xa   :  { %409 = vmatpush3.bf16.msra.mxu1 %v426_v36 }
  0xdc   :  { %v102_v7 = vpop.f32.mrb[0].mxu0 }
  0xdd   :  { %v103_v8 = vadd.f32 %v378_v6, %v102_v7  ;;  %v404_v9 = vpop.f32.mrb[1].mxu0  ;;  %v474_v7 = vmov 0  }
  0xde   :  { %v105_v10 = vpop.f32.mrb[2].mxu0  ;;  %421 = vset.pattern.permute.xlu0 %v474_v7  ;;  %422 = vset.pattern.permute.xlu1 %v474_v7 }
  0xdf   :  { %v111_v11 = vmul.f32 0.70710677, %v103_v8  ;;  %v106_v12 = vadd.f32 %v378_v6, %v105_v10  ;;  %v405_v13 = vpop.f32.mrb[3].mxu0  ;;  %v109_v16 = vmul.f32 0.5, %v103_v8  ;;  %v268_v8 = vld [vmem:[#allocation3] sm:$0xff]  ;;  %v269_v10 = vld [vmem:[#allocation3 + $0x8] sm:$0xff] }
  0xe1   :  { %427 = verf.f32 %v111_v11  ;;  %v112_v14 = vmul.f32 0.70710677, %v106_v12  ;;  %v110_v19 = vmul.f32 0.5, %v106_v12 }
  0xe3   :  { %429 = verf.f32 %v112_v14 }
  0xeb   :  { %v428_v15 = vpop.eup %427 }
  0xec   :  { %v115_v17 = vadd.f32 1.0, %v428_v15 }
  0xed   :  { %v430_v18 = vpop.eup %429 }
  0xee   :  { %v117_v20 = vmul.f32 %v115_v17, %v109_v16  ;;  %v116_v21 = vadd.f32 1.0, %v430_v18  ;;  %v311_v16 = vld [vmem:[%s633_s1] sm:$0xff]  ;;  %v312_v17 = vld [vmem:[%s633_s1 + $0x8] sm:$0xff]  ;;  %s475_s1 = smov [#allocation6]  }
  0xef   :  { %s359_s30 = sshll.u32 %s475_s1, 4  ;;  %s360_s30 = int_to_ptr.vmem [resolvable:$true] %s359_s30 }
  0xf0   :  { %v121_v22 = vsel %vm64_vm1, %v117_v20, 0.0  ;;  %v118_v23 = vmul.f32 %v116_v21, %v110_v19  ;;  %s447_s11 = scalar_lea.vmem %s360_s30, 128  ;;  %p452_p1 = scmp.lt.s32.totalorder %s360_s30, %s360_s30 }
  0xf1   :  { %122 = vadd.xlane.f32.xlu0 %v121_v22  ;;  %p448_p0 = scmp.ne.s32.totalorder %s360_s30, %s447_s11  ;;  %p453_p2 = scmp.lt.s32.totalorder %s447_s11, %s447_s11 }
  0xf2   :  { %v124_v24 = vsel %vm64_vm1, %v118_v23, 0.0 }
  0xf3   :  { %p454_p3 = por %p453_p2, %p452_p1 }
  0xf5   :  { %125 = vadd.xlane.f32.xlu0 %v124_v24  ;;  %p455_p4 = pnand %p454_p3, %p448_p0 }
 0x17e   :  { %v123_v25 = vpop.xlane.xlu0 %122 }
 0x17f   :  { %v128_v26 = vmul.f32 0.03125, %v123_v25 }
 0x181   :  { %v130_v27 = vsub.f32 %v117_v20, %v128_v26 }
 0x182   :  { %v126_v28 = vpop.xlane.xlu0 %125 }
 0x183   :  { %v129_v29 = vmul.f32 0.03125, %v126_v28  ;;  %v132_v30 = vmul.f32 %v130_v27, %v130_v27 }
 0x185   :  { %v131_v31 = vsub.f32 %v118_v23, %v129_v29  ;;  %v134_v32 = vsel %vm64_vm1, %v132_v30, 0.0 }
 0x186   :  { %135 = vadd.xlane.f32.xlu1 %v134_v32 }
 0x187   :  { %v133_v33 = vmul.f32 %v131_v31, %v131_v31 }
 0x189   :  { %v137_v34 = vsel %vm64_vm1, %v133_v33, 0.0 }
 0x18a   :  { %138 = vadd.xlane.f32.xlu1 %v137_v34 }
 0x213   :  { %v136_v37 = vpop.xlane.xlu1 %135 }
 0x214   :  { %v140_v38 = vmul.f32 0.03125, %v136_v37 }
 0x216   :  { %v142_v39 = vadd.f32 1e-12, %v140_v38 }
 0x217   :  { %v139_v40 = vpop.xlane.xlu1 %138 }
 0x218   :  { %431 = vrsqrt.f32 %v142_v39  ;;  %v141_v41 = vmul.f32 0.03125, %v139_v40 }
 0x21a   :  { %v143_v42 = vadd.f32 1e-12, %v141_v41 }
 0x21c   :  { %433 = vrsqrt.f32 %v143_v42 }
 0x222   :  { %v432_v43 = vpop.eup %431 }
 0x223   :  { %v146_v44 = vmul.f32 %v432_v43, %v130_v27 }
 0x225   :  { %v154_v47 = vmul.f32 %v382_v45, %v146_v44 }
 0x226   :  { %v434_v46 = vpop.eup %433 }
 0x227   :  { %v147_v48 = vmul.f32 %v434_v46, %v131_v31  ;;  %v162_v51 = vadd.f32 %v383_v49, %v154_v47 }
 0x229   :  { %v155_v50 = vmul.f32 %v382_v45, %v147_v48 }
 0x22b   :  { %v163_v52 = vadd.f32 %v383_v49, %v155_v50 }
 0x22d   :  { %v164_v53 = vpack.c.bf16 %v163_v52, %v162_v51 }
 0x22f   :  { %165 = vst.msk [vmem:[#allocation2] sm:$0xff] %vm64_vm1, %v164_v53 }
 0x236   :  { %v177_v54 = vld [vmem:[#allocation2] sm:$0xff] }
 0x237   :  { %411 = vmatmul.mubr.msk.bf16.vlgmr.msra.gmra.mrb[0].mxu1 %vm64_vm1, %v177_v54 }
 0x30a   :  { %v235_v59 = vpop.f32.mrb[0].mxu1 }
 0x30b   :  { %v236_v60 = vadd.f32 %v384_v58, %v235_v59  ;;  %v412_v61 = vpop.f32.mrb[1].mxu1 }
 0x30c   :  { %v238_v62 = vpop.f32.mrb[2].mxu1 }
 0x30d   :  { %v390_v63 = vpack.c.bf16 %v236_v60, %v236_v60  ;;  %v239_v0 = vadd.f32 %v384_v58, %v238_v62  ;;  %v413_v2 = vpop.f32.mrb[3].mxu1  ;;  %v259_v3 = vsel %vm258_vm3, %v236_v60, -1e+30 }
 0x30e   :  { %v262_v4 = vsel %vm261_vm4, %v259_v3, -inf }
 0x30f   :  { %251 = vst.msk [vmem:[#allocation6] sm:$0xf] %vm250_vm5, %v390_v63  ;;  %v391_v1 = vpack.c.bf16 %v239_v0, %v239_v0  ;;  %263 = vmax.xlane.f32.xlu0 %v262_v4  ;;  %v260_v5 = vsel %vm258_vm3, %v239_v0, -1e+30 }
 0x310   :  { %v265_v6 = vsel %vm261_vm4, %v260_v5, -inf }
 0x311   :  { %252 = vst.msk [vmem:[#allocation6 + $0x4] sm:$0xf] %vm250_vm5, %v391_v1  ;;  %266 = vmax.xlane.f32.xlu1 %v265_v6 }
 0x39c   :  { %v264_v9 = vpop.xlane.xlu0 %263 }
 0x39d   :  { %v270_v11 = vmax.f32 %v268_v8, %v264_v9 }
 0x39e   :  { %v267_v12 = vpop.xlane.xlu1 %266 }
 0x39f   :  { %v274_v13 = vsub.f32 %v268_v8, %v270_v11  ;;  %309 = vst.msk [vmem:[#allocation3] sm:$0xff] %vm166_vm2, %v270_v11  ;;  %v271_v14 = vmax.f32 %v269_v10, %v267_v12  ;;  %284 = vperm.xlu0 %421, %v270_v11  }
 0x3a1   :  { %v275_v15 = vsub.f32 %v269_v10, %v271_v14  ;;  %310 = vst.msk [vmem:[#allocation3 + $0x8] sm:$0xff] %vm166_vm2, %v271_v14  ;;  %289 = vperm.xlu1 %422, %v271_v14  }
 0x3a5   :  { %314 = vperm.xlu1 %422, %v311_v16  }
 0x3a9   :  { %317 = vperm.xlu1 %422, %v312_v17  }
 0x41e   :  { %v285_v18 = vpop.permute.xlu0 %284 }
 0x41f   :  { %v292_v19 = vsub.f32 %v259_v3, %v285_v18 }
 0x420   :  { %v290_v20 = vpop.permute.xlu1 %289 }
 0x421   :  { %v294_v21 = vmul.f32 1.442695, %v292_v19  ;;  %v293_v22 = vsub.f32 %v260_v5, %v290_v20 }
 0x423   :  { %435 = vpow2.f32 %v294_v21  ;;  %v296_v23 = vmul.f32 1.442695, %v293_v22 }
 0x424   :  { %v315_v24 = vpop.permute.xlu1 %314 }
 0x425   :  { %437 = vpow2.f32 %v296_v23  ;;  %vm319_vm6 = vcmp.eq.s32.totalorder %v255_v57, %v315_v24 }
 0x426   :  { %v323_v29 = vsel %vm319_vm6, %v236_v60, 0.0 }
 0x427   :  { %v325_v31 = vsel %vm261_vm4, %v323_v29, 0.0 }
 0x428   :  { %v318_v26 = vpop.permute.xlu1 %317 }
 0x429   :  { %vm320_vm7 = vcmp.eq.s32.totalorder %v255_v57, %v318_v26 }
 0x42a   :  { %v324_v32 = vsel %vm320_vm7, %v239_v0, 0.0 }
 0x42b   :  { %v328_v33 = vsel %vm261_vm4, %v324_v32, 0.0 }
 0x42d   :  { %v436_v25 = vpop.eup %435 }
 0x42e   :  { %v298_v27 = vsel %vm261_vm4, %v436_v25, 0.0 }
 0x42f   :  { %v438_v28 = vpop.eup %437  ;;  %299 = vadd.xlane.f32.xlu1 %v298_v27 }
 0x430   :  { %v301_v30 = vsel %vm261_vm4, %v438_v28, 0.0 }
 0x431   :  { %302 = vadd.xlane.f32.xlu0 %v301_v30 }
 0x433   :  { %326 = vadd.xlane.f32.xlu1 %v325_v31 }
 0x437   :  { %329 = vadd.xlane.f32.xlu1 %v328_v33 }
 0x438   :  { %458 = shalt.err (!%p455_p4)
}
 0x439   :  { %s459_s14 = scalar_lea.hbm %s640_s8, 128 }
 0x43a   :  { %p460_p5 = scmp.ne.s32.totalorder %s640_s8, %s459_s14  ;;  %p463_p6 = scmp.lt.u32.totalorder %s459_s14, %s640_s8 }
 0x43c   :  { %p465_p7 = pnand %p463_p6, %p460_p5 }
 0x43e   :  { %468 = shalt.err (!%p465_p7)
}
 0x43f   :  { %s476_s19 = smov 64   ;;  %s477_s20 = smov 4   ;;  %v276_v34 = vmul.f32 1.442695, %v274_v13  ;;  %v278_v35 = vmul.f32 1.442695, %v275_v15 }
 0x440   :  { %365 = dma.vmem_to_hbm [thread:$0]  %s360_s30, 128, %s640_s8, [#allocation7], %s476_s19, %s476_s19, %s477_s20   ;;  %v272_v37 = vld [vmem:[#allocation4] sm:$0xff]  ;;  %v273_v39 = vld [vmem:[#allocation4 + $0x8] sm:$0xff]  ;;  %v321_v45 = vld [vmem:[#allocation5] sm:$0xff] }
 0x441   :  { %439 = vpow2.f32 %v276_v34  ;;  %v322_v49 = vld [vmem:[#allocation5 + $0x8] sm:$0xff]  ;;  %v338_v59 = vld [vmem:[#allocation3] sm:$0xff] }
 0x442   :  { %441 = vpow2.f32 %v278_v35  ;;  %v339_v62 = vld [vmem:[#allocation3 + $0x8] sm:$0xff] }
 0x44b   :  { %v440_v36 = vpop.eup %439 }
 0x44c   :  { %v442_v38 = vpop.eup %441  ;;  %v280_v40 = vmul.f32 %v440_v36, %v272_v37 }
 0x44d   :  { %v281_v43 = vmul.f32 %v442_v38, %v273_v39 }
 0x4bc   :  { %v300_v41 = vpop.xlane.xlu1 %299 }
 0x4bd   :  { %v304_v42 = vadd.f32 %v300_v41, %v280_v40 }
 0x4be   :  { %v303_v44 = vpop.xlane.xlu0 %302 }
 0x4bf   :  { %307 = vst.msk [vmem:[#allocation4] sm:$0xff] %vm166_vm2, %v304_v42  ;;  %v305_v46 = vadd.f32 %v303_v44, %v281_v43 }
 0x4c0   :  { %v327_v47 = vpop.xlane.xlu1 %326 }
 0x4c1   :  { %308 = vst.msk [vmem:[#allocation4 + $0x8] sm:$0xff] %vm166_vm2, %v305_v46  ;;  %v331_v48 = vadd.f32 %v327_v47, %v321_v45 }
 0x4c3   :  { %333 = vst.msk [vmem:[#allocation5] sm:$0xff] %vm166_vm2, %v331_v48 }
 0x4c4   :  { %v330_v50 = vpop.xlane.xlu1 %329 }
 0x4c5   :  { %v332_v51 = vadd.f32 %v330_v50, %v322_v49 }
 0x4c6   :  { %v340_v52 = vld [vmem:[#allocation4] sm:$0xff] }
 0x4c7   :  { %443 = vlog2.f32 %v340_v52  ;;  %334 = vst.msk [vmem:[#allocation5 + $0x8] sm:$0xff] %vm166_vm2, %v332_v51 }
 0x4c8   :  { %v341_v53 = vld [vmem:[#allocation4 + $0x8] sm:$0xff] }
 0x4c9   :  { %445 = vlog2.f32 %v341_v53 }
 0x4ca   :  { %v350_v54 = vld [vmem:[#allocation5] sm:$0xff] }
 0x4cb   :  { %352 = vst.msk [vmem:[%s642_s10] sm:$0xff] %vm166_vm2, %v350_v54 }
 0x4ce   :  { %v351_v55 = vld [vmem:[#allocation5 + $0x8] sm:$0xff] }
 0x4cf   :  { %353 = vst.msk [vmem:[%s642_s10 + $0x8] sm:$0xff] %vm166_vm2, %v351_v55 }
 0x4d1   :  { %v444_v56 = vpop.eup %443 }
 0x4d2   :  { %v343_v57 = vmul.f32 0.6931472, %v444_v56 }
 0x4d3   :  { %v446_v58 = vpop.eup %445 }
 0x4d4   :  { %v346_v60 = vadd.f32 %v343_v57, %v338_v59  ;;  %v345_v61 = vmul.f32 0.6931472, %v446_v58 }
 0x4d6   :  { %348 = vst.msk [vmem:[%s641_s9] sm:$0xff] %vm166_vm2, %v346_v60  ;;  %v347_v63 = vadd.f32 %v345_v61, %v339_v62 }
 0x4d8   :  { %349 = vst.msk [vmem:[%s641_s9 + $0x8] sm:$0xff] %vm166_vm2, %v347_v63 }
 0x4d9   :  { %469 = dma.done.wait [#allocation7], 128  }
 0x4da   :  { %470 = vsyncadd [#allocation7], 4294967168 }
 0x4db   :  { %377 = vsyncpa [#allocation7], 1 }

</bundles_post_ra>
